<compile_context>
chip_gen: v6e
topology: v6e:2x2x1
jax: 0.10.0
libtpu: 0.0.40
codegen_flags: <defaults>
</compile_context>

<pallas_src>
import functools

import jax
import jax.numpy as jnp
from jax import lax
from jax.experimental import pallas as pl
from jax.experimental.pallas import tpu as pltpu

# ---- small synthetic config (BERT-like, num_labels=15 as in the module) ----
VOCAB = 128
MAX_POS = 64
HIDDEN = 32
NUM_HEADS = 4
HEAD_DIM = HIDDEN // NUM_HEADS
INTERMEDIATE = 64
NUM_LAYERS = 2
NUM_LABELS = 15
LANE_OUT = 128            # pad classifier output to a full 128-lane slab
LN_EPS = 1e-12

PARAM_ORDER = ("wq", "bq", "wk", "bk", "wv", "bv", "wo", "bo",
               "ln1_g", "ln1_b", "w1", "b1", "w2", "b2", "ln2_g", "ln2_b",
               "wp", "bp", "wc_pad", "bc_pad")


def _layer_norm(x, gamma, beta):
    mu = jnp.mean(x, axis=-1, keepdims=True)
    var = jnp.mean((x - mu) ** 2, axis=-1, keepdims=True)
    return (x - mu) * lax.rsqrt(var + LN_EPS) * gamma + beta


# ------------------------- fused Pallas kernel -------------------------------
def fused_bert_kernel(x_ref, mask_ref,
                      wq_ref, bq_ref, wk_ref, bk_ref, wv_ref, bv_ref,
                      wo_ref, bo_ref, ln1g_ref, ln1b_ref,
                      w1_ref, b1_ref, w2_ref, b2_ref, ln2g_ref, ln2b_ref,
                      wp_ref, bp_ref, wc_ref, bc_ref,
                      out_ref, *, batch, seq, num_heads, num_layers):
    """All encoder layers + pooler + classifier; activations stay in VMEM."""
    x = x_ref[...]                                    # (B*S, H) float32
    H = x.shape[-1]
    hd = H // num_heads
    scale = 1.0 / (float(hd) ** 0.5)

    # Additive attention bias, computed ONCE per forward (hoisted out of loops).
    bias = (1.0 - mask_ref[...]) * (-1e9)             # (B, S)

    for l in range(num_layers):                       # static unroll over layers
        wq = wq_ref[l]
        wk = wk_ref[l]
        wv = wv_ref[l]
        wo = wo_ref[l]
        q = jnp.dot(x, wq, preferred_element_type=jnp.float32) + bq_ref[l]
        k = jnp.dot(x, wk, preferred_element_type=jnp.float32) + bk_ref[l]
        v = jnp.dot(x, wv, preferred_element_type=jnp.float32) + bv_ref[l]

        # Attention: per-batch (S,S) score blocks, per-head accumulation into a
        # lane-dense (S, H) slab (no lane concatenate).
        slabs = []
        for b in range(batch):                        # static; B*S rows total
            r0 = b * seq
            qb = q[r0:r0 + seq, :] * scale
            kb = k[r0:r0 + seq, :]
            vb = v[r0:r0 + seq, :]
            bias_b = bias[b:b + 1, :]                 # (1, S)
            acc = jnp.zeros((seq, H), jnp.float32)
            for h in range(num_heads):                # static unroll over heads
                c0 = h * hd
                s = lax.dot_general(qb[:, c0:c0 + hd], kb[:, c0:c0 + hd],
                                    (((1,), (1,)), ((), ())),
                                    preferred_element_type=jnp.float32)
                s = s + bias_b
                s = s - jnp.max(s, axis=-1, keepdims=True)
                p = jnp.exp(s)
                p = p * pl.reciprocal(jnp.sum(p, axis=-1, keepdims=True),
                                      approx=True)
                ctx = jnp.dot(p, vb[:, c0:c0 + hd],
                              preferred_element_type=jnp.float32)
                acc = acc + jnp.dot(ctx, wo[c0:c0 + hd, :],
                                    preferred_element_type=jnp.float32)
            slabs.append(acc)
        # Sublane-aligned concat of per-batch slabs (S=8 rows each).
        attn_out = jnp.concatenate(slabs, axis=0) + bo_ref[l]

        h1 = _layer_norm(x + attn_out, ln1g_ref[l], ln1b_ref[l])

        ffn = jnp.dot(h1, w1_ref[l], preferred_element_type=jnp.float32) + b1_ref[l]
        # TODO(synk): HF DeBERTa uses exact (erf) GELU; tanh approximation here.
        ffn = jax.nn.gelu(ffn, approximate=True)
        ffn = jnp.dot(ffn, w2_ref[l], preferred_element_type=jnp.float32) + b2_ref[l]
        x = _layer_norm(h1 + ffn, ln2g_ref[l], ln2b_ref[l])

    # Pooler (dense + tanh) + classifier, applied to every row; CLS rows are
    # selected in the wrapper.  Output is a lane-dense (B*S, 128) slab so the
    # writeback uses unmasked stores.
    pooled = jnp.tanh(
        jnp.dot(x, wp_ref[...], preferred_element_type=jnp.float32) + bp_ref[...])
    out_ref[...] = (
        jnp.dot(pooled, wc_ref[...], preferred_element_type=jnp.float32) + bc_ref[...])


# ------------------------- params & forward ---------------------------------
def init_params(key):
    def dense(k, shape):
        return (0.02 * jax.random.normal(k, shape)).astype(jnp.float32)

    ks = iter(jax.random.split(key, 12))
    L, H, I = NUM_LAYERS, HIDDEN, INTERMEDIATE
    p = {
        "word_emb": dense(next(ks), (VOCAB, H)),
        "pos_emb": dense(next(ks), (MAX_POS, H)),
        "emb_ln_g": jnp.ones((1, H), jnp.float32),
        "emb_ln_b": jnp.zeros((1, H), jnp.float32),
        # per-layer weights stacked along a leading layer axis (resident in VMEM)
        "wq": dense(next(ks), (L, H, H)), "bq": jnp.zeros((L, 1, H), jnp.float32),
        "wk": dense(next(ks), (L, H, H)), "bk": jnp.zeros((L, 1, H), jnp.float32),
        "wv": dense(next(ks), (L, H, H)), "bv": jnp.zeros((L, 1, H), jnp.float32),
        "wo": dense(next(ks), (L, H, H)), "bo": jnp.zeros((L, 1, H), jnp.float32),
        "ln1_g": jnp.ones((L, 1, H), jnp.float32),
        "ln1_b": jnp.zeros((L, 1, H), jnp.float32),
        "w1": dense(next(ks), (L, H, I)), "b1": jnp.zeros((L, 1, I), jnp.float32),
        "w2": dense(next(ks), (L, I, H)), "b2": jnp.zeros((L, 1, H), jnp.float32),
        "ln2_g": jnp.ones((L, 1, H), jnp.float32),
        "ln2_b": jnp.zeros((L, 1, H), jnp.float32),
        "wp": dense(next(ks), (H, H)), "bp": jnp.zeros((1, H), jnp.float32),
    }
    wc = dense(next(ks), (H, NUM_LABELS))
    p["wc_pad"] = jnp.pad(wc, ((0, 0), (0, LANE_OUT - NUM_LABELS)))
    p["bc_pad"] = jnp.zeros((1, LANE_OUT), jnp.float32)
    return p


def forward(params, input_ids, attention_mask):
    """Equivalent of my_bert_model.forward -> logits (batch, 15)."""
    B, S = input_ids.shape
    # Embedding lookup + position embeddings + LayerNorm (plain-JAX glue).
    x = params["word_emb"][input_ids] + params["pos_emb"][jnp.arange(S)][None, :, :]
    x = _layer_norm(x, params["emb_ln_g"], params["emb_ln_b"]).astype(jnp.float32)
    x2d = x.reshape(B * S, HIDDEN)
    mask = attention_mask.astype(jnp.float32).reshape(B, S)

    flat = pl.pallas_call(
        functools.partial(fused_bert_kernel, batch=B, seq=S,
                          num_heads=NUM_HEADS, num_layers=NUM_LAYERS),
        out_shape=jax.ShapeDtypeStruct((B * S, LANE_OUT), jnp.float32),
    )(x2d, mask, *[params[k] for k in PARAM_ORDER])

    # CLS row of each batch element, unpadded label columns.
    return flat.reshape(B, S, LANE_OUT)[:, 0, :NUM_LABELS]


if __name__ == "__main__":
    B, S = 2, 8
    key = jax.random.PRNGKey(0)
    params = init_params(key)

    id_key = jax.random.fold_in(key, 999)
    input_ids = jax.random.randint(id_key, (B, S), 0, VOCAB, dtype=jnp.int32)
    attention_mask = jnp.ones((B, S), dtype=jnp.float32).at[1, S - 2:].set(0.0)

    fwd = jax.jit(forward)
    logits = fwd(params, input_ids, attention_mask)
    logits = jax.block_until_ready(logits)
    assert logits.shape == (B, NUM_LABELS) and logits.dtype == jnp.float32
    assert bool(jnp.all(jnp.isfinite(logits)))
    print("KERNEL_OK")
</pallas_src>

<mosaic_0001>
module attributes {stable_mosaic.version = 11 : i64} {
  func.func @fused_bert_kernel(%arg0: memref<16x32xf32, #tpu.memory_space<vmem>>, %arg1: memref<2x8xf32, #tpu.memory_space<vmem>>, %arg2: memref<2x32x32xf32, #tpu.memory_space<vmem>>, %arg3: memref<2x1x32xf32, #tpu.memory_space<vmem>>, %arg4: memref<2x32x32xf32, #tpu.memory_space<vmem>>, %arg5: memref<2x1x32xf32, #tpu.memory_space<vmem>>, %arg6: memref<2x32x32xf32, #tpu.memory_space<vmem>>, %arg7: memref<2x1x32xf32, #tpu.memory_space<vmem>>, %arg8: memref<2x32x32xf32, #tpu.memory_space<vmem>>, %arg9: memref<2x1x32xf32, #tpu.memory_space<vmem>>, %arg10: memref<2x1x32xf32, #tpu.memory_space<vmem>>, %arg11: memref<2x1x32xf32, #tpu.memory_space<vmem>>, %arg12: memref<2x32x64xf32, #tpu.memory_space<vmem>>, %arg13: memref<2x1x64xf32, #tpu.memory_space<vmem>>, %arg14: memref<2x64x32xf32, #tpu.memory_space<vmem>>, %arg15: memref<2x1x32xf32, #tpu.memory_space<vmem>>, %arg16: memref<2x1x32xf32, #tpu.memory_space<vmem>>, %arg17: memref<2x1x32xf32, #tpu.memory_space<vmem>>, %arg18: memref<32x32xf32, #tpu.memory_space<vmem>>, %arg19: memref<1x32xf32, #tpu.memory_space<vmem>>, %arg20: memref<32x128xf32, #tpu.memory_space<vmem>>, %arg21: memref<1x128xf32, #tpu.memory_space<vmem>>, %arg22: memref<16x128xf32, #tpu.memory_space<vmem>>) attributes {dimension_semantics = [], scalar_prefetch = 0 : i64, scratch_operands = 0 : i64, tpu.core_type = #tpu.core_type<tc>} {
    %c0 = arith.constant 0 : index
    %c0_0 = arith.constant 0 : index
    %0 = vector.load %arg0[%c0, %c0_0] : memref<16x32xf32, #tpu.memory_space<vmem>>, vector<16x32xf32>
    %c0_1 = arith.constant 0 : index
    %c0_2 = arith.constant 0 : index
    %1 = vector.load %arg1[%c0_1, %c0_2] : memref<2x8xf32, #tpu.memory_space<vmem>>, vector<2x8xf32>
    %cst = arith.constant 1.000000e+00 : f32
    %2 = vector.broadcast %cst : f32 to vector<2x8xf32>
    %3 = arith.subf %2, %1 : vector<2x8xf32>
    %cst_3 = arith.constant -1.000000e+09 : f32
    %4 = vector.broadcast %cst_3 : f32 to vector<2x8xf32>
    %5 = arith.mulf %3, %4 : vector<2x8xf32>
    %c0_4 = arith.constant 0 : index
    %c0_5 = arith.constant 0 : index
    %c0_6 = arith.constant 0 : index
    %6 = vector.load %arg2[%c0_4, %c0_5, %c0_6] : memref<2x32x32xf32, #tpu.memory_space<vmem>>, vector<1x32x32xf32>
    %7 = vector.shape_cast %6 : vector<1x32x32xf32> to vector<32x32xf32>
    %c0_7 = arith.constant 0 : index
    %c0_8 = arith.constant 0 : index
    %c0_9 = arith.constant 0 : index
    %8 = vector.load %arg4[%c0_7, %c0_8, %c0_9] : memref<2x32x32xf32, #tpu.memory_space<vmem>>, vector<1x32x32xf32>
    %9 = vector.shape_cast %8 : vector<1x32x32xf32> to vector<32x32xf32>
    %c0_10 = arith.constant 0 : index
    %c0_11 = arith.constant 0 : index
    %c0_12 = arith.constant 0 : index
    %10 = vector.load %arg6[%c0_10, %c0_11, %c0_12] : memref<2x32x32xf32, #tpu.memory_space<vmem>>, vector<1x32x32xf32>
    %11 = vector.shape_cast %10 : vector<1x32x32xf32> to vector<32x32xf32>
    %c0_13 = arith.constant 0 : index
    %c0_14 = arith.constant 0 : index
    %c0_15 = arith.constant 0 : index
    %12 = vector.load %arg8[%c0_13, %c0_14, %c0_15] : memref<2x32x32xf32, #tpu.memory_space<vmem>>, vector<1x32x32xf32>
    %13 = vector.shape_cast %12 : vector<1x32x32xf32> to vector<32x32xf32>
    %cst_16 = arith.constant dense<0.000000e+00> : vector<16x32xf32>
    %14 = tpu.matmul %0, %7, %cst_16 {dimension_numbers = #tpu.dot_dimension_numbers<[1], [0], [0], [1], [0, 0, 1, 1], [], []>} : vector<16x32xf32>, vector<32x32xf32>, vector<16x32xf32> -> vector<16x32xf32>
    %c0_17 = arith.constant 0 : index
    %c0_18 = arith.constant 0 : index
    %c0_19 = arith.constant 0 : index
    %15 = vector.load %arg3[%c0_17, %c0_18, %c0_19] : memref<2x1x32xf32, #tpu.memory_space<vmem>>, vector<1x1x32xf32>
    %16 = vector.shape_cast %15 : vector<1x1x32xf32> to vector<1x32xf32>
    %17 = vector.broadcast %16 : vector<1x32xf32> to vector<16x32xf32>
    %18 = arith.addf %14, %17 : vector<16x32xf32>
    %cst_20 = arith.constant dense<0.000000e+00> : vector<16x32xf32>
    %19 = tpu.matmul %0, %9, %cst_20 {dimension_numbers = #tpu.dot_dimension_numbers<[1], [0], [0], [1], [0, 0, 1, 1], [], []>} : vector<16x32xf32>, vector<32x32xf32>, vector<16x32xf32> -> vector<16x32xf32>
    %c0_21 = arith.constant 0 : index
    %c0_22 = arith.constant 0 : index
    %c0_23 = arith.constant 0 : index
    %20 = vector.load %arg5[%c0_21, %c0_22, %c0_23] : memref<2x1x32xf32, #tpu.memory_space<vmem>>, vector<1x1x32xf32>
    %21 = vector.shape_cast %20 : vector<1x1x32xf32> to vector<1x32xf32>
    %22 = vector.broadcast %21 : vector<1x32xf32> to vector<16x32xf32>
    %23 = arith.addf %19, %22 : vector<16x32xf32>
    %cst_24 = arith.constant dense<0.000000e+00> : vector<16x32xf32>
    %24 = tpu.matmul %0, %11, %cst_24 {dimension_numbers = #tpu.dot_dimension_numbers<[1], [0], [0], [1], [0, 0, 1, 1], [], []>} : vector<16x32xf32>, vector<32x32xf32>, vector<16x32xf32> -> vector<16x32xf32>
    %c0_25 = arith.constant 0 : index
    %c0_26 = arith.constant 0 : index
    %c0_27 = arith.constant 0 : index
    %25 = vector.load %arg7[%c0_25, %c0_26, %c0_27] : memref<2x1x32xf32, #tpu.memory_space<vmem>>, vector<1x1x32xf32>
    %26 = vector.shape_cast %25 : vector<1x1x32xf32> to vector<1x32xf32>
    %27 = vector.broadcast %26 : vector<1x32xf32> to vector<16x32xf32>
    %28 = arith.addf %24, %27 : vector<16x32xf32>
    %29 = vector.extract_strided_slice %18 {offsets = [0, 0], sizes = [8, 32], strides = [1, 1]} : vector<16x32xf32> to vector<8x32xf32>
    %cst_28 = arith.constant 0.353553385 : f32
    %30 = vector.broadcast %cst_28 : f32 to vector<8x32xf32>
    %31 = arith.mulf %29, %30 : vector<8x32xf32>
    %32 = vector.extract_strided_slice %23 {offsets = [0, 0], sizes = [8, 32], strides = [1, 1]} : vector<16x32xf32> to vector<8x32xf32>
    %33 = vector.extract_strided_slice %28 {offsets = [0, 0], sizes = [8, 32], strides = [1, 1]} : vector<16x32xf32> to vector<8x32xf32>
    %34 = vector.extract_strided_slice %5 {offsets = [0, 0], sizes = [1, 8], strides = [1, 1]} : vector<2x8xf32> to vector<1x8xf32>
    %cst_29 = arith.constant 0.000000e+00 : f32
    %35 = vector.broadcast %cst_29 : f32 to vector<8x32xf32>
    %36 = vector.extract_strided_slice %31 {offsets = [0, 0], sizes = [8, 8], strides = [1, 1]} : vector<8x32xf32> to vector<8x8xf32>
    %37 = vector.extract_strided_slice %32 {offsets = [0, 0], sizes = [8, 8], strides = [1, 1]} : vector<8x32xf32> to vector<8x8xf32>
    %cst_30 = arith.constant dense<0.000000e+00> : vector<8x8xf32>
    %38 = tpu.matmul %36, %37, %cst_30 {dimension_numbers = #tpu.dot_dimension_numbers<[1], [1], [0], [0], [0, 0, 1, 0], [], []>} : vector<8x8xf32>, vector<8x8xf32>, vector<8x8xf32> -> vector<8x8xf32>
    %39 = vector.broadcast %34 : vector<1x8xf32> to vector<8x8xf32>
    %40 = arith.addf %38, %39 : vector<8x8xf32>
    %cst_31 = arith.constant dense<0xFF800000> : vector<8xf32>
    %41 = vector.multi_reduction <maximumf>, %40, %cst_31 [1] : vector<8x8xf32> to vector<8xf32>
    %42 = vector.shape_cast %41 : vector<8xf32> to vector<8x1xf32>
    %43 = vector.broadcast %42 : vector<8x1xf32> to vector<8x8xf32>
    %44 = arith.subf %40, %43 : vector<8x8xf32>
    %45 = math.exp %44 : vector<8x8xf32>
    %cst_32 = arith.constant dense<0.000000e+00> : vector<8xf32>
    %46 = vector.multi_reduction <add>, %45, %cst_32 [1] : vector<8x8xf32> to vector<8xf32>
    %47 = vector.shape_cast %46 : vector<8xf32> to vector<8x1xf32>
    %48 = tpu.reciprocal %47 {approx = true} : vector<8x1xf32> -> vector<8x1xf32>
    %49 = vector.broadcast %48 : vector<8x1xf32> to vector<8x8xf32>
    %50 = arith.mulf %45, %49 : vector<8x8xf32>
    %51 = vector.extract_strided_slice %33 {offsets = [0, 0], sizes = [8, 8], strides = [1, 1]} : vector<8x32xf32> to vector<8x8xf32>
    %cst_33 = arith.constant dense<0.000000e+00> : vector<8x8xf32>
    %52 = tpu.matmul %50, %51, %cst_33 {dimension_numbers = #tpu.dot_dimension_numbers<[1], [0], [0], [1], [0, 0, 1, 1], [], []>} : vector<8x8xf32>, vector<8x8xf32>, vector<8x8xf32> -> vector<8x8xf32>
    %53 = vector.extract_strided_slice %13 {offsets = [0, 0], sizes = [8, 32], strides = [1, 1]} : vector<32x32xf32> to vector<8x32xf32>
    %cst_34 = arith.constant dense<0.000000e+00> : vector<8x32xf32>
    %54 = tpu.matmul %52, %53, %cst_34 {dimension_numbers = #tpu.dot_dimension_numbers<[1], [0], [0], [1], [0, 0, 1, 1], [], []>} : vector<8x8xf32>, vector<8x32xf32>, vector<8x32xf32> -> vector<8x32xf32>
    %55 = arith.addf %35, %54 : vector<8x32xf32>
    %56 = vector.extract_strided_slice %31 {offsets = [0, 8], sizes = [8, 8], strides = [1, 1]} : vector<8x32xf32> to vector<8x8xf32>
    %57 = vector.extract_strided_slice %32 {offsets = [0, 8], sizes = [8, 8], strides = [1, 1]} : vector<8x32xf32> to vector<8x8xf32>
    %cst_35 = arith.constant dense<0.000000e+00> : vector<8x8xf32>
    %58 = tpu.matmul %56, %57, %cst_35 {dimension_numbers = #tpu.dot_dimension_numbers<[1], [1], [0], [0], [0, 0, 1, 0], [], []>} : vector<8x8xf32>, vector<8x8xf32>, vector<8x8xf32> -> vector<8x8xf32>
    %59 = vector.broadcast %34 : vector<1x8xf32> to vector<8x8xf32>
    %60 = arith.addf %58, %59 : vector<8x8xf32>
    %cst_36 = arith.constant dense<0xFF800000> : vector<8xf32>
    %61 = vector.multi_reduction <maximumf>, %60, %cst_36 [1] : vector<8x8xf32> to vector<8xf32>
    %62 = vector.shape_cast %61 : vector<8xf32> to vector<8x1xf32>
    %63 = vector.broadcast %62 : vector<8x1xf32> to vector<8x8xf32>
    %64 = arith.subf %60, %63 : vector<8x8xf32>
    %65 = math.exp %64 : vector<8x8xf32>
    %cst_37 = arith.constant dense<0.000000e+00> : vector<8xf32>
    %66 = vector.multi_reduction <add>, %65, %cst_37 [1] : vector<8x8xf32> to vector<8xf32>
    %67 = vector.shape_cast %66 : vector<8xf32> to vector<8x1xf32>
    %68 = tpu.reciprocal %67 {approx = true} : vector<8x1xf32> -> vector<8x1xf32>
    %69 = vector.broadcast %68 : vector<8x1xf32> to vector<8x8xf32>
    %70 = arith.mulf %65, %69 : vector<8x8xf32>
    %71 = vector.extract_strided_slice %33 {offsets = [0, 8], sizes = [8, 8], strides = [1, 1]} : vector<8x32xf32> to vector<8x8xf32>
    %cst_38 = arith.constant dense<0.000000e+00> : vector<8x8xf32>
    %72 = tpu.matmul %70, %71, %cst_38 {dimension_numbers = #tpu.dot_dimension_numbers<[1], [0], [0], [1], [0, 0, 1, 1], [], []>} : vector<8x8xf32>, vector<8x8xf32>, vector<8x8xf32> -> vector<8x8xf32>
    %73 = vector.extract_strided_slice %13 {offsets = [8, 0], sizes = [8, 32], strides = [1, 1]} : vector<32x32xf32> to vector<8x32xf32>
    %cst_39 = arith.constant dense<0.000000e+00> : vector<8x32xf32>
    %74 = tpu.matmul %72, %73, %cst_39 {dimension_numbers = #tpu.dot_dimension_numbers<[1], [0], [0], [1], [0, 0, 1, 1], [], []>} : vector<8x8xf32>, vector<8x32xf32>, vector<8x32xf32> -> vector<8x32xf32>
    %75 = arith.addf %55, %74 : vector<8x32xf32>
    %76 = vector.extract_strided_slice %31 {offsets = [0, 16], sizes = [8, 8], strides = [1, 1]} : vector<8x32xf32> to vector<8x8xf32>
    %77 = vector.extract_strided_slice %32 {offsets = [0, 16], sizes = [8, 8], strides = [1, 1]} : vector<8x32xf32> to vector<8x8xf32>
    %cst_40 = arith.constant dense<0.000000e+00> : vector<8x8xf32>
    %78 = tpu.matmul %76, %77, %cst_40 {dimension_numbers = #tpu.dot_dimension_numbers<[1], [1], [0], [0], [0, 0, 1, 0], [], []>} : vector<8x8xf32>, vector<8x8xf32>, vector<8x8xf32> -> vector<8x8xf32>
    %79 = vector.broadcast %34 : vector<1x8xf32> to vector<8x8xf32>
    %80 = arith.addf %78, %79 : vector<8x8xf32>
    %cst_41 = arith.constant dense<0xFF800000> : vector<8xf32>
    %81 = vector.multi_reduction <maximumf>, %80, %cst_41 [1] : vector<8x8xf32> to vector<8xf32>
    %82 = vector.shape_cast %81 : vector<8xf32> to vector<8x1xf32>
    %83 = vector.broadcast %82 : vector<8x1xf32> to vector<8x8xf32>
    %84 = arith.subf %80, %83 : vector<8x8xf32>
    %85 = math.exp %84 : vector<8x8xf32>
    %cst_42 = arith.constant dense<0.000000e+00> : vector<8xf32>
    %86 = vector.multi_reduction <add>, %85, %cst_42 [1] : vector<8x8xf32> to vector<8xf32>
    %87 = vector.shape_cast %86 : vector<8xf32> to vector<8x1xf32>
    %88 = tpu.reciprocal %87 {approx = true} : vector<8x1xf32> -> vector<8x1xf32>
    %89 = vector.broadcast %88 : vector<8x1xf32> to vector<8x8xf32>
    %90 = arith.mulf %85, %89 : vector<8x8xf32>
    %91 = vector.extract_strided_slice %33 {offsets = [0, 16], sizes = [8, 8], strides = [1, 1]} : vector<8x32xf32> to vector<8x8xf32>
    %cst_43 = arith.constant dense<0.000000e+00> : vector<8x8xf32>
    %92 = tpu.matmul %90, %91, %cst_43 {dimension_numbers = #tpu.dot_dimension_numbers<[1], [0], [0], [1], [0, 0, 1, 1], [], []>} : vector<8x8xf32>, vector<8x8xf32>, vector<8x8xf32> -> vector<8x8xf32>
    %93 = vector.extract_strided_slice %13 {offsets = [16, 0], sizes = [8, 32], strides = [1, 1]} : vector<32x32xf32> to vector<8x32xf32>
    %cst_44 = arith.constant dense<0.000000e+00> : vector<8x32xf32>
    %94 = tpu.matmul %92, %93, %cst_44 {dimension_numbers = #tpu.dot_dimension_numbers<[1], [0], [0], [1], [0, 0, 1, 1], [], []>} : vector<8x8xf32>, vector<8x32xf32>, vector<8x32xf32> -> vector<8x32xf32>
    %95 = arith.addf %75, %94 : vector<8x32xf32>
    %96 = vector.extract_strided_slice %31 {offsets = [0, 24], sizes = [8, 8], strides = [1, 1]} : vector<8x32xf32> to vector<8x8xf32>
    %97 = vector.extract_strided_slice %32 {offsets = [0, 24], sizes = [8, 8], strides = [1, 1]} : vector<8x32xf32> to vector<8x8xf32>
    %cst_45 = arith.constant dense<0.000000e+00> : vector<8x8xf32>
    %98 = tpu.matmul %96, %97, %cst_45 {dimension_numbers = #tpu.dot_dimension_numbers<[1], [1], [0], [0], [0, 0, 1, 0], [], []>} : vector<8x8xf32>, vector<8x8xf32>, vector<8x8xf32> -> vector<8x8xf32>
    %99 = vector.broadcast %34 : vector<1x8xf32> to vector<8x8xf32>
    %100 = arith.addf %98, %99 : vector<8x8xf32>
    %cst_46 = arith.constant dense<0xFF800000> : vector<8xf32>
    %101 = vector.multi_reduction <maximumf>, %100, %cst_46 [1] : vector<8x8xf32> to vector<8xf32>
    %102 = vector.shape_cast %101 : vector<8xf32> to vector<8x1xf32>
    %103 = vector.broadcast %102 : vector<8x1xf32> to vector<8x8xf32>
    %104 = arith.subf %100, %103 : vector<8x8xf32>
    %105 = math.exp %104 : vector<8x8xf32>
    %cst_47 = arith.constant dense<0.000000e+00> : vector<8xf32>
    %106 = vector.multi_reduction <add>, %105, %cst_47 [1] : vector<8x8xf32> to vector<8xf32>
    %107 = vector.shape_cast %106 : vector<8xf32> to vector<8x1xf32>
    %108 = tpu.reciprocal %107 {approx = true} : vector<8x1xf32> -> vector<8x1xf32>
    %109 = vector.broadcast %108 : vector<8x1xf32> to vector<8x8xf32>
    %110 = arith.mulf %105, %109 : vector<8x8xf32>
    %111 = vector.extract_strided_slice %33 {offsets = [0, 24], sizes = [8, 8], strides = [1, 1]} : vector<8x32xf32> to vector<8x8xf32>
    %cst_48 = arith.constant dense<0.000000e+00> : vector<8x8xf32>
    %112 = tpu.matmul %110, %111, %cst_48 {dimension_numbers = #tpu.dot_dimension_numbers<[1], [0], [0], [1], [0, 0, 1, 1], [], []>} : vector<8x8xf32>, vector<8x8xf32>, vector<8x8xf32> -> vector<8x8xf32>
    %113 = vector.extract_strided_slice %13 {offsets = [24, 0], sizes = [8, 32], strides = [1, 1]} : vector<32x32xf32> to vector<8x32xf32>
    %cst_49 = arith.constant dense<0.000000e+00> : vector<8x32xf32>
    %114 = tpu.matmul %112, %113, %cst_49 {dimension_numbers = #tpu.dot_dimension_numbers<[1], [0], [0], [1], [0, 0, 1, 1], [], []>} : vector<8x8xf32>, vector<8x32xf32>, vector<8x32xf32> -> vector<8x32xf32>
    %115 = arith.addf %95, %114 : vector<8x32xf32>
    %116 = vector.extract_strided_slice %18 {offsets = [8, 0], sizes = [8, 32], strides = [1, 1]} : vector<16x32xf32> to vector<8x32xf32>
    %cst_50 = arith.constant 0.353553385 : f32
    %117 = vector.broadcast %cst_50 : f32 to vector<8x32xf32>
    %118 = arith.mulf %116, %117 : vector<8x32xf32>
    %119 = vector.extract_strided_slice %23 {offsets = [8, 0], sizes = [8, 32], strides = [1, 1]} : vector<16x32xf32> to vector<8x32xf32>
    %120 = vector.extract_strided_slice %28 {offsets = [8, 0], sizes = [8, 32], strides = [1, 1]} : vector<16x32xf32> to vector<8x32xf32>
    %121 = vector.extract_strided_slice %5 {offsets = [1, 0], sizes = [1, 8], strides = [1, 1]} : vector<2x8xf32> to vector<1x8xf32>
    %cst_51 = arith.constant 0.000000e+00 : f32
    %122 = vector.broadcast %cst_51 : f32 to vector<8x32xf32>
    %123 = vector.extract_strided_slice %118 {offsets = [0, 0], sizes = [8, 8], strides = [1, 1]} : vector<8x32xf32> to vector<8x8xf32>
    %124 = vector.extract_strided_slice %119 {offsets = [0, 0], sizes = [8, 8], strides = [1, 1]} : vector<8x32xf32> to vector<8x8xf32>
    %cst_52 = arith.constant dense<0.000000e+00> : vector<8x8xf32>
    %125 = tpu.matmul %123, %124, %cst_52 {dimension_numbers = #tpu.dot_dimension_numbers<[1], [1], [0], [0], [0, 0, 1, 0], [], []>} : vector<8x8xf32>, vector<8x8xf32>, vector<8x8xf32> -> vector<8x8xf32>
    %126 = vector.broadcast %121 : vector<1x8xf32> to vector<8x8xf32>
    %127 = arith.addf %125, %126 : vector<8x8xf32>
    %cst_53 = arith.constant dense<0xFF800000> : vector<8xf32>
    %128 = vector.multi_reduction <maximumf>, %127, %cst_53 [1] : vector<8x8xf32> to vector<8xf32>
    %129 = vector.shape_cast %128 : vector<8xf32> to vector<8x1xf32>
    %130 = vector.broadcast %129 : vector<8x1xf32> to vector<8x8xf32>
    %131 = arith.subf %127, %130 : vector<8x8xf32>
    %132 = math.exp %131 : vector<8x8xf32>
    %cst_54 = arith.constant dense<0.000000e+00> : vector<8xf32>
    %133 = vector.multi_reduction <add>, %132, %cst_54 [1] : vector<8x8xf32> to vector<8xf32>
    %134 = vector.shape_cast %133 : vector<8xf32> to vector<8x1xf32>
    %135 = tpu.reciprocal %134 {approx = true} : vector<8x1xf32> -> vector<8x1xf32>
    %136 = vector.broadcast %135 : vector<8x1xf32> to vector<8x8xf32>
    %137 = arith.mulf %132, %136 : vector<8x8xf32>
    %138 = vector.extract_strided_slice %120 {offsets = [0, 0], sizes = [8, 8], strides = [1, 1]} : vector<8x32xf32> to vector<8x8xf32>
    %cst_55 = arith.constant dense<0.000000e+00> : vector<8x8xf32>
    %139 = tpu.matmul %137, %138, %cst_55 {dimension_numbers = #tpu.dot_dimension_numbers<[1], [0], [0], [1], [0, 0, 1, 1], [], []>} : vector<8x8xf32>, vector<8x8xf32>, vector<8x8xf32> -> vector<8x8xf32>
    %140 = vector.extract_strided_slice %13 {offsets = [0, 0], sizes = [8, 32], strides = [1, 1]} : vector<32x32xf32> to vector<8x32xf32>
    %cst_56 = arith.constant dense<0.000000e+00> : vector<8x32xf32>
    %141 = tpu.matmul %139, %140, %cst_56 {dimension_numbers = #tpu.dot_dimension_numbers<[1], [0], [0], [1], [0, 0, 1, 1], [], []>} : vector<8x8xf32>, vector<8x32xf32>, vector<8x32xf32> -> vector<8x32xf32>
    %142 = arith.addf %122, %141 : vector<8x32xf32>
    %143 = vector.extract_strided_slice %118 {offsets = [0, 8], sizes = [8, 8], strides = [1, 1]} : vector<8x32xf32> to vector<8x8xf32>
    %144 = vector.extract_strided_slice %119 {offsets = [0, 8], sizes = [8, 8], strides = [1, 1]} : vector<8x32xf32> to vector<8x8xf32>
    %cst_57 = arith.constant dense<0.000000e+00> : vector<8x8xf32>
    %145 = tpu.matmul %143, %144, %cst_57 {dimension_numbers = #tpu.dot_dimension_numbers<[1], [1], [0], [0], [0, 0, 1, 0], [], []>} : vector<8x8xf32>, vector<8x8xf32>, vector<8x8xf32> -> vector<8x8xf32>
    %146 = vector.broadcast %121 : vector<1x8xf32> to vector<8x8xf32>
    %147 = arith.addf %145, %146 : vector<8x8xf32>
    %cst_58 = arith.constant dense<0xFF800000> : vector<8xf32>
    %148 = vector.multi_reduction <maximumf>, %147, %cst_58 [1] : vector<8x8xf32> to vector<8xf32>
    %149 = vector.shape_cast %148 : vector<8xf32> to vector<8x1xf32>
    %150 = vector.broadcast %149 : vector<8x1xf32> to vector<8x8xf32>
    %151 = arith.subf %147, %150 : vector<8x8xf32>
    %152 = math.exp %151 : vector<8x8xf32>
    %cst_59 = arith.constant dense<0.000000e+00> : vector<8xf32>
    %153 = vector.multi_reduction <add>, %152, %cst_59 [1] : vector<8x8xf32> to vector<8xf32>
    %154 = vector.shape_cast %153 : vector<8xf32> to vector<8x1xf32>
    %155 = tpu.reciprocal %154 {approx = true} : vector<8x1xf32> -> vector<8x1xf32>
    %156 = vector.broadcast %155 : vector<8x1xf32> to vector<8x8xf32>
    %157 = arith.mulf %152, %156 : vector<8x8xf32>
    %158 = vector.extract_strided_slice %120 {offsets = [0, 8], sizes = [8, 8], strides = [1, 1]} : vector<8x32xf32> to vector<8x8xf32>
    %cst_60 = arith.constant dense<0.000000e+00> : vector<8x8xf32>
    %159 = tpu.matmul %157, %158, %cst_60 {dimension_numbers = #tpu.dot_dimension_numbers<[1], [0], [0], [1], [0, 0, 1, 1], [], []>} : vector<8x8xf32>, vector<8x8xf32>, vector<8x8xf32> -> vector<8x8xf32>
    %160 = vector.extract_strided_slice %13 {offsets = [8, 0], sizes = [8, 32], strides = [1, 1]} : vector<32x32xf32> to vector<8x32xf32>
    %cst_61 = arith.constant dense<0.000000e+00> : vector<8x32xf32>
    %161 = tpu.matmul %159, %160, %cst_61 {dimension_numbers = #tpu.dot_dimension_numbers<[1], [0], [0], [1], [0, 0, 1, 1], [], []>} : vector<8x8xf32>, vector<8x32xf32>, vector<8x32xf32> -> vector<8x32xf32>
    %162 = arith.addf %142, %161 : vector<8x32xf32>
    %163 = vector.extract_strided_slice %118 {offsets = [0, 16], sizes = [8, 8], strides = [1, 1]} : vector<8x32xf32> to vector<8x8xf32>
    %164 = vector.extract_strided_slice %119 {offsets = [0, 16], sizes = [8, 8], strides = [1, 1]} : vector<8x32xf32> to vector<8x8xf32>
    %cst_62 = arith.constant dense<0.000000e+00> : vector<8x8xf32>
    %165 = tpu.matmul %163, %164, %cst_62 {dimension_numbers = #tpu.dot_dimension_numbers<[1], [1], [0], [0], [0, 0, 1, 0], [], []>} : vector<8x8xf32>, vector<8x8xf32>, vector<8x8xf32> -> vector<8x8xf32>
    %166 = vector.broadcast %121 : vector<1x8xf32> to vector<8x8xf32>
    %167 = arith.addf %165, %166 : vector<8x8xf32>
    %cst_63 = arith.constant dense<0xFF800000> : vector<8xf32>
    %168 = vector.multi_reduction <maximumf>, %167, %cst_63 [1] : vector<8x8xf32> to vector<8xf32>
    %169 = vector.shape_cast %168 : vector<8xf32> to vector<8x1xf32>
    %170 = vector.broadcast %169 : vector<8x1xf32> to vector<8x8xf32>
    %171 = arith.subf %167, %170 : vector<8x8xf32>
    %172 = math.exp %171 : vector<8x8xf32>
    %cst_64 = arith.constant dense<0.000000e+00> : vector<8xf32>
    %173 = vector.multi_reduction <add>, %172, %cst_64 [1] : vector<8x8xf32> to vector<8xf32>
    %174 = vector.shape_cast %173 : vector<8xf32> to vector<8x1xf32>
    %175 = tpu.reciprocal %174 {approx = true} : vector<8x1xf32> -> vector<8x1xf32>
    %176 = vector.broadcast %175 : vector<8x1xf32> to vector<8x8xf32>
    %177 = arith.mulf %172, %176 : vector<8x8xf32>
    %178 = vector.extract_strided_slice %120 {offsets = [0, 16], sizes = [8, 8], strides = [1, 1]} : vector<8x32xf32> to vector<8x8xf32>
    %cst_65 = arith.constant dense<0.000000e+00> : vector<8x8xf32>
    %179 = tpu.matmul %177, %178, %cst_65 {dimension_numbers = #tpu.dot_dimension_numbers<[1], [0], [0], [1], [0, 0, 1, 1], [], []>} : vector<8x8xf32>, vector<8x8xf32>, vector<8x8xf32> -> vector<8x8xf32>
    %180 = vector.extract_strided_slice %13 {offsets = [16, 0], sizes = [8, 32], strides = [1, 1]} : vector<32x32xf32> to vector<8x32xf32>
    %cst_66 = arith.constant dense<0.000000e+00> : vector<8x32xf32>
    %181 = tpu.matmul %179, %180, %cst_66 {dimension_numbers = #tpu.dot_dimension_numbers<[1], [0], [0], [1], [0, 0, 1, 1], [], []>} : vector<8x8xf32>, vector<8x32xf32>, vector<8x32xf32> -> vector<8x32xf32>
    %182 = arith.addf %162, %181 : vector<8x32xf32>
    %183 = vector.extract_strided_slice %118 {offsets = [0, 24], sizes = [8, 8], strides = [1, 1]} : vector<8x32xf32> to vector<8x8xf32>
    %184 = vector.extract_strided_slice %119 {offsets = [0, 24], sizes = [8, 8], strides = [1, 1]} : vector<8x32xf32> to vector<8x8xf32>
    %cst_67 = arith.constant dense<0.000000e+00> : vector<8x8xf32>
    %185 = tpu.matmul %183, %184, %cst_67 {dimension_numbers = #tpu.dot_dimension_numbers<[1], [1], [0], [0], [0, 0, 1, 0], [], []>} : vector<8x8xf32>, vector<8x8xf32>, vector<8x8xf32> -> vector<8x8xf32>
    %186 = vector.broadcast %121 : vector<1x8xf32> to vector<8x8xf32>
    %187 = arith.addf %185, %186 : vector<8x8xf32>
    %cst_68 = arith.constant dense<0xFF800000> : vector<8xf32>
    %188 = vector.multi_reduction <maximumf>, %187, %cst_68 [1] : vector<8x8xf32> to vector<8xf32>
    %189 = vector.shape_cast %188 : vector<8xf32> to vector<8x1xf32>
    %190 = vector.broadcast %189 : vector<8x1xf32> to vector<8x8xf32>
    %191 = arith.subf %187, %190 : vector<8x8xf32>
    %192 = math.exp %191 : vector<8x8xf32>
    %cst_69 = arith.constant dense<0.000000e+00> : vector<8xf32>
    %193 = vector.multi_reduction <add>, %192, %cst_69 [1] : vector<8x8xf32> to vector<8xf32>
    %194 = vector.shape_cast %193 : vector<8xf32> to vector<8x1xf32>
    %195 = tpu.reciprocal %194 {approx = true} : vector<8x1xf32> -> vector<8x1xf32>
    %196 = vector.broadcast %195 : vector<8x1xf32> to vector<8x8xf32>
    %197 = arith.mulf %192, %196 : vector<8x8xf32>
    %198 = vector.extract_strided_slice %120 {offsets = [0, 24], sizes = [8, 8], strides = [1, 1]} : vector<8x32xf32> to vector<8x8xf32>
    %cst_70 = arith.constant dense<0.000000e+00> : vector<8x8xf32>
    %199 = tpu.matmul %197, %198, %cst_70 {dimension_numbers = #tpu.dot_dimension_numbers<[1], [0], [0], [1], [0, 0, 1, 1], [], []>} : vector<8x8xf32>, vector<8x8xf32>, vector<8x8xf32> -> vector<8x8xf32>
    %200 = vector.extract_strided_slice %13 {offsets = [24, 0], sizes = [8, 32], strides = [1, 1]} : vector<32x32xf32> to vector<8x32xf32>
    %cst_71 = arith.constant dense<0.000000e+00> : vector<8x32xf32>
    %201 = tpu.matmul %199, %200, %cst_71 {dimension_numbers = #tpu.dot_dimension_numbers<[1], [0], [0], [1], [0, 0, 1, 1], [], []>} : vector<8x8xf32>, vector<8x32xf32>, vector<8x32xf32> -> vector<8x32xf32>
    %202 = arith.addf %182, %201 : vector<8x32xf32>
    %203 = tpu.concatenate %115, %202 in 0 : vector<8x32xf32>, vector<8x32xf32> -> vector<16x32xf32>
    %c0_72 = arith.constant 0 : index
    %c0_73 = arith.constant 0 : index
    %c0_74 = arith.constant 0 : index
    %204 = vector.load %arg9[%c0_72, %c0_73, %c0_74] : memref<2x1x32xf32, #tpu.memory_space<vmem>>, vector<1x1x32xf32>
    %205 = vector.shape_cast %204 : vector<1x1x32xf32> to vector<1x32xf32>
    %206 = vector.broadcast %205 : vector<1x32xf32> to vector<16x32xf32>
    %207 = arith.addf %203, %206 : vector<16x32xf32>
    %208 = arith.addf %0, %207 : vector<16x32xf32>
    %c0_75 = arith.constant 0 : index
    %c0_76 = arith.constant 0 : index
    %c0_77 = arith.constant 0 : index
    %209 = vector.load %arg10[%c0_75, %c0_76, %c0_77] : memref<2x1x32xf32, #tpu.memory_space<vmem>>, vector<1x1x32xf32>
    %210 = vector.shape_cast %209 : vector<1x1x32xf32> to vector<1x32xf32>
    %c0_78 = arith.constant 0 : index
    %c0_79 = arith.constant 0 : index
    %c0_80 = arith.constant 0 : index
    %211 = vector.load %arg11[%c0_78, %c0_79, %c0_80] : memref<2x1x32xf32, #tpu.memory_space<vmem>>, vector<1x1x32xf32>
    %212 = vector.shape_cast %211 : vector<1x1x32xf32> to vector<1x32xf32>
    %cst_81 = arith.constant dense<0.000000e+00> : vector<16xf32>
    %213 = vector.multi_reduction <add>, %208, %cst_81 [1] : vector<16x32xf32> to vector<16xf32>
    %214 = vector.shape_cast %213 : vector<16xf32> to vector<16x1xf32>
    %cst_82 = arith.constant 3.200000e+01 : f32
    %215 = vector.broadcast %cst_82 : f32 to vector<16x1xf32>
    %216 = arith.divf %214, %215 : vector<16x1xf32>
    %217 = vector.broadcast %216 : vector<16x1xf32> to vector<16x32xf32>
    %218 = arith.subf %208, %217 : vector<16x32xf32>
    %219 = arith.mulf %218, %218 : vector<16x32xf32>
    %cst_83 = arith.constant dense<0.000000e+00> : vector<16xf32>
    %220 = vector.multi_reduction <add>, %219, %cst_83 [1] : vector<16x32xf32> to vector<16xf32>
    %221 = vector.shape_cast %220 : vector<16xf32> to vector<16x1xf32>
    %cst_84 = arith.constant 3.200000e+01 : f32
    %222 = vector.broadcast %cst_84 : f32 to vector<16x1xf32>
    %223 = arith.divf %221, %222 : vector<16x1xf32>
    %224 = vector.broadcast %216 : vector<16x1xf32> to vector<16x32xf32>
    %225 = arith.subf %208, %224 : vector<16x32xf32>
    %cst_85 = arith.constant 9.99999996E-13 : f32
    %226 = vector.broadcast %cst_85 : f32 to vector<16x1xf32>
    %227 = arith.addf %223, %226 : vector<16x1xf32>
    %228 = math.rsqrt %227 : vector<16x1xf32>
    %229 = vector.broadcast %228 : vector<16x1xf32> to vector<16x32xf32>
    %230 = arith.mulf %225, %229 : vector<16x32xf32>
    %231 = vector.broadcast %210 : vector<1x32xf32> to vector<16x32xf32>
    %232 = arith.mulf %230, %231 : vector<16x32xf32>
    %233 = vector.broadcast %212 : vector<1x32xf32> to vector<16x32xf32>
    %234 = arith.addf %232, %233 : vector<16x32xf32>
    %c0_86 = arith.constant 0 : index
    %c0_87 = arith.constant 0 : index
    %c0_88 = arith.constant 0 : index
    %235 = vector.load %arg12[%c0_86, %c0_87, %c0_88] : memref<2x32x64xf32, #tpu.memory_space<vmem>>, vector<1x32x64xf32>
    %236 = vector.shape_cast %235 : vector<1x32x64xf32> to vector<32x64xf32>
    %cst_89 = arith.constant dense<0.000000e+00> : vector<16x64xf32>
    %237 = tpu.matmul %234, %236, %cst_89 {dimension_numbers = #tpu.dot_dimension_numbers<[1], [0], [0], [1], [0, 0, 1, 1], [], []>} : vector<16x32xf32>, vector<32x64xf32>, vector<16x64xf32> -> vector<16x64xf32>
    %c0_90 = arith.constant 0 : index
    %c0_91 = arith.constant 0 : index
    %c0_92 = arith.constant 0 : index
    %238 = vector.load %arg13[%c0_90, %c0_91, %c0_92] : memref<2x1x64xf32, #tpu.memory_space<vmem>>, vector<1x1x64xf32>
    %239 = vector.shape_cast %238 : vector<1x1x64xf32> to vector<1x64xf32>
    %240 = vector.broadcast %239 : vector<1x64xf32> to vector<16x64xf32>
    %241 = arith.addf %237, %240 : vector<16x64xf32>
    %242 = arith.mulf %241, %241 : vector<16x64xf32>
    %243 = arith.mulf %241, %242 : vector<16x64xf32>
    %cst_93 = arith.constant 4.471500e-02 : f32
    %244 = vector.broadcast %cst_93 : f32 to vector<16x64xf32>
    %245 = arith.mulf %244, %243 : vector<16x64xf32>
    %246 = arith.addf %241, %245 : vector<16x64xf32>
    %cst_94 = arith.constant 0.797884583 : f32
    %247 = vector.broadcast %cst_94 : f32 to vector<16x64xf32>
    %248 = arith.mulf %247, %246 : vector<16x64xf32>
    %249 = math.tanh %248 : vector<16x64xf32>
    %cst_95 = arith.constant 1.000000e+00 : f32
    %250 = vector.broadcast %cst_95 : f32 to vector<16x64xf32>
    %251 = arith.addf %250, %249 : vector<16x64xf32>
    %cst_96 = arith.constant 5.000000e-01 : f32
    %252 = vector.broadcast %cst_96 : f32 to vector<16x64xf32>
    %253 = arith.mulf %252, %251 : vector<16x64xf32>
    %254 = arith.mulf %241, %253 : vector<16x64xf32>
    %c0_97 = arith.constant 0 : index
    %c0_98 = arith.constant 0 : index
    %c0_99 = arith.constant 0 : index
    %255 = vector.load %arg14[%c0_97, %c0_98, %c0_99] : memref<2x64x32xf32, #tpu.memory_space<vmem>>, vector<1x64x32xf32>
    %256 = vector.shape_cast %255 : vector<1x64x32xf32> to vector<64x32xf32>
    %cst_100 = arith.constant dense<0.000000e+00> : vector<16x32xf32>
    %257 = tpu.matmul %254, %256, %cst_100 {dimension_numbers = #tpu.dot_dimension_numbers<[1], [0], [0], [1], [0, 0, 1, 1], [], []>} : vector<16x64xf32>, vector<64x32xf32>, vector<16x32xf32> -> vector<16x32xf32>
    %c0_101 = arith.constant 0 : index
    %c0_102 = arith.constant 0 : index
    %c0_103 = arith.constant 0 : index
    %258 = vector.load %arg15[%c0_101, %c0_102, %c0_103] : memref<2x1x32xf32, #tpu.memory_space<vmem>>, vector<1x1x32xf32>
    %259 = vector.shape_cast %258 : vector<1x1x32xf32> to vector<1x32xf32>
    %260 = vector.broadcast %259 : vector<1x32xf32> to vector<16x32xf32>
    %261 = arith.addf %257, %260 : vector<16x32xf32>
    %262 = arith.addf %234, %261 : vector<16x32xf32>
    %c0_104 = arith.constant 0 : index
    %c0_105 = arith.constant 0 : index
    %c0_106 = arith.constant 0 : index
    %263 = vector.load %arg16[%c0_104, %c0_105, %c0_106] : memref<2x1x32xf32, #tpu.memory_space<vmem>>, vector<1x1x32xf32>
    %264 = vector.shape_cast %263 : vector<1x1x32xf32> to vector<1x32xf32>
    %c0_107 = arith.constant 0 : index
    %c0_108 = arith.constant 0 : index
    %c0_109 = arith.constant 0 : index
    %265 = vector.load %arg17[%c0_107, %c0_108, %c0_109] : memref<2x1x32xf32, #tpu.memory_space<vmem>>, vector<1x1x32xf32>
    %266 = vector.shape_cast %265 : vector<1x1x32xf32> to vector<1x32xf32>
    %cst_110 = arith.constant dense<0.000000e+00> : vector<16xf32>
    %267 = vector.multi_reduction <add>, %262, %cst_110 [1] : vector<16x32xf32> to vector<16xf32>
    %268 = vector.shape_cast %267 : vector<16xf32> to vector<16x1xf32>
    %cst_111 = arith.constant 3.200000e+01 : f32
    %269 = vector.broadcast %cst_111 : f32 to vector<16x1xf32>
    %270 = arith.divf %268, %269 : vector<16x1xf32>
    %271 = vector.broadcast %270 : vector<16x1xf32> to vector<16x32xf32>
    %272 = arith.subf %262, %271 : vector<16x32xf32>
    %273 = arith.mulf %272, %272 : vector<16x32xf32>
    %cst_112 = arith.constant dense<0.000000e+00> : vector<16xf32>
    %274 = vector.multi_reduction <add>, %273, %cst_112 [1] : vector<16x32xf32> to vector<16xf32>
    %275 = vector.shape_cast %274 : vector<16xf32> to vector<16x1xf32>
    %cst_113 = arith.constant 3.200000e+01 : f32
    %276 = vector.broadcast %cst_113 : f32 to vector<16x1xf32>
    %277 = arith.divf %275, %276 : vector<16x1xf32>
    %278 = vector.broadcast %270 : vector<16x1xf32> to vector<16x32xf32>
    %279 = arith.subf %262, %278 : vector<16x32xf32>
    %cst_114 = arith.constant 9.99999996E-13 : f32
    %280 = vector.broadcast %cst_114 : f32 to vector<16x1xf32>
    %281 = arith.addf %277, %280 : vector<16x1xf32>
    %282 = math.rsqrt %281 : vector<16x1xf32>
    %283 = vector.broadcast %282 : vector<16x1xf32> to vector<16x32xf32>
    %284 = arith.mulf %279, %283 : vector<16x32xf32>
    %285 = vector.broadcast %264 : vector<1x32xf32> to vector<16x32xf32>
    %286 = arith.mulf %284, %285 : vector<16x32xf32>
    %287 = vector.broadcast %266 : vector<1x32xf32> to vector<16x32xf32>
    %288 = arith.addf %286, %287 : vector<16x32xf32>
    %c1 = arith.constant 1 : index
    %c0_115 = arith.constant 0 : index
    %c0_116 = arith.constant 0 : index
    %289 = vector.load %arg2[%c1, %c0_115, %c0_116] : memref<2x32x32xf32, #tpu.memory_space<vmem>>, vector<1x32x32xf32>
    %290 = vector.shape_cast %289 : vector<1x32x32xf32> to vector<32x32xf32>
    %c1_117 = arith.constant 1 : index
    %c0_118 = arith.constant 0 : index
    %c0_119 = arith.constant 0 : index
    %291 = vector.load %arg4[%c1_117, %c0_118, %c0_119] : memref<2x32x32xf32, #tpu.memory_space<vmem>>, vector<1x32x32xf32>
    %292 = vector.shape_cast %291 : vector<1x32x32xf32> to vector<32x32xf32>
    %c1_120 = arith.constant 1 : index
    %c0_121 = arith.constant 0 : index
    %c0_122 = arith.constant 0 : index
    %293 = vector.load %arg6[%c1_120, %c0_121, %c0_122] : memref<2x32x32xf32, #tpu.memory_space<vmem>>, vector<1x32x32xf32>
    %294 = vector.shape_cast %293 : vector<1x32x32xf32> to vector<32x32xf32>
    %c1_123 = arith.constant 1 : index
    %c0_124 = arith.constant 0 : index
    %c0_125 = arith.constant 0 : index
    %295 = vector.load %arg8[%c1_123, %c0_124, %c0_125] : memref<2x32x32xf32, #tpu.memory_space<vmem>>, vector<1x32x32xf32>
    %296 = vector.shape_cast %295 : vector<1x32x32xf32> to vector<32x32xf32>
    %cst_126 = arith.constant dense<0.000000e+00> : vector<16x32xf32>
    %297 = tpu.matmul %288, %290, %cst_126 {dimension_numbers = #tpu.dot_dimension_numbers<[1], [0], [0], [1], [0, 0, 1, 1], [], []>} : vector<16x32xf32>, vector<32x32xf32>, vector<16x32xf32> -> vector<16x32xf32>
    %c1_127 = arith.constant 1 : index
    %c0_128 = arith.constant 0 : index
    %c0_129 = arith.constant 0 : index
    %298 = vector.load %arg3[%c1_127, %c0_128, %c0_129] : memref<2x1x32xf32, #tpu.memory_space<vmem>>, vector<1x1x32xf32>
    %299 = vector.shape_cast %298 : vector<1x1x32xf32> to vector<1x32xf32>
    %300 = vector.broadcast %299 : vector<1x32xf32> to vector<16x32xf32>
    %301 = arith.addf %297, %300 : vector<16x32xf32>
    %cst_130 = arith.constant dense<0.000000e+00> : vector<16x32xf32>
    %302 = tpu.matmul %288, %292, %cst_130 {dimension_numbers = #tpu.dot_dimension_numbers<[1], [0], [0], [1], [0, 0, 1, 1], [], []>} : vector<16x32xf32>, vector<32x32xf32>, vector<16x32xf32> -> vector<16x32xf32>
    %c1_131 = arith.constant 1 : index
    %c0_132 = arith.constant 0 : index
    %c0_133 = arith.constant 0 : index
    %303 = vector.load %arg5[%c1_131, %c0_132, %c0_133] : memref<2x1x32xf32, #tpu.memory_space<vmem>>, vector<1x1x32xf32>
    %304 = vector.shape_cast %303 : vector<1x1x32xf32> to vector<1x32xf32>
    %305 = vector.broadcast %304 : vector<1x32xf32> to vector<16x32xf32>
    %306 = arith.addf %302, %305 : vector<16x32xf32>
    %cst_134 = arith.constant dense<0.000000e+00> : vector<16x32xf32>
    %307 = tpu.matmul %288, %294, %cst_134 {dimension_numbers = #tpu.dot_dimension_numbers<[1], [0], [0], [1], [0, 0, 1, 1], [], []>} : vector<16x32xf32>, vector<32x32xf32>, vector<16x32xf32> -> vector<16x32xf32>
    %c1_135 = arith.constant 1 : index
    %c0_136 = arith.constant 0 : index
    %c0_137 = arith.constant 0 : index
    %308 = vector.load %arg7[%c1_135, %c0_136, %c0_137] : memref<2x1x32xf32, #tpu.memory_space<vmem>>, vector<1x1x32xf32>
    %309 = vector.shape_cast %308 : vector<1x1x32xf32> to vector<1x32xf32>
    %310 = vector.broadcast %309 : vector<1x32xf32> to vector<16x32xf32>
    %311 = arith.addf %307, %310 : vector<16x32xf32>
    %312 = vector.extract_strided_slice %301 {offsets = [0, 0], sizes = [8, 32], strides = [1, 1]} : vector<16x32xf32> to vector<8x32xf32>
    %cst_138 = arith.constant 0.353553385 : f32
    %313 = vector.broadcast %cst_138 : f32 to vector<8x32xf32>
    %314 = arith.mulf %312, %313 : vector<8x32xf32>
    %315 = vector.extract_strided_slice %306 {offsets = [0, 0], sizes = [8, 32], strides = [1, 1]} : vector<16x32xf32> to vector<8x32xf32>
    %316 = vector.extract_strided_slice %311 {offsets = [0, 0], sizes = [8, 32], strides = [1, 1]} : vector<16x32xf32> to vector<8x32xf32>
    %317 = vector.extract_strided_slice %5 {offsets = [0, 0], sizes = [1, 8], strides = [1, 1]} : vector<2x8xf32> to vector<1x8xf32>
    %cst_139 = arith.constant 0.000000e+00 : f32
    %318 = vector.broadcast %cst_139 : f32 to vector<8x32xf32>
    %319 = vector.extract_strided_slice %314 {offsets = [0, 0], sizes = [8, 8], strides = [1, 1]} : vector<8x32xf32> to vector<8x8xf32>
    %320 = vector.extract_strided_slice %315 {offsets = [0, 0], sizes = [8, 8], strides = [1, 1]} : vector<8x32xf32> to vector<8x8xf32>
    %cst_140 = arith.constant dense<0.000000e+00> : vector<8x8xf32>
    %321 = tpu.matmul %319, %320, %cst_140 {dimension_numbers = #tpu.dot_dimension_numbers<[1], [1], [0], [0], [0, 0, 1, 0], [], []>} : vector<8x8xf32>, vector<8x8xf32>, vector<8x8xf32> -> vector<8x8xf32>
    %322 = vector.broadcast %317 : vector<1x8xf32> to vector<8x8xf32>
    %323 = arith.addf %321, %322 : vector<8x8xf32>
    %cst_141 = arith.constant dense<0xFF800000> : vector<8xf32>
    %324 = vector.multi_reduction <maximumf>, %323, %cst_141 [1] : vector<8x8xf32> to vector<8xf32>
    %325 = vector.shape_cast %324 : vector<8xf32> to vector<8x1xf32>
    %326 = vector.broadcast %325 : vector<8x1xf32> to vector<8x8xf32>
    %327 = arith.subf %323, %326 : vector<8x8xf32>
    %328 = math.exp %327 : vector<8x8xf32>
    %cst_142 = arith.constant dense<0.000000e+00> : vector<8xf32>
    %329 = vector.multi_reduction <add>, %328, %cst_142 [1] : vector<8x8xf32> to vector<8xf32>
    %330 = vector.shape_cast %329 : vector<8xf32> to vector<8x1xf32>
    %331 = tpu.reciprocal %330 {approx = true} : vector<8x1xf32> -> vector<8x1xf32>
    %332 = vector.broadcast %331 : vector<8x1xf32> to vector<8x8xf32>
    %333 = arith.mulf %328, %332 : vector<8x8xf32>
    %334 = vector.extract_strided_slice %316 {offsets = [0, 0], sizes = [8, 8], strides = [1, 1]} : vector<8x32xf32> to vector<8x8xf32>
    %cst_143 = arith.constant dense<0.000000e+00> : vector<8x8xf32>
    %335 = tpu.matmul %333, %334, %cst_143 {dimension_numbers = #tpu.dot_dimension_numbers<[1], [0], [0], [1], [0, 0, 1, 1], [], []>} : vector<8x8xf32>, vector<8x8xf32>, vector<8x8xf32> -> vector<8x8xf32>
    %336 = vector.extract_strided_slice %296 {offsets = [0, 0], sizes = [8, 32], strides = [1, 1]} : vector<32x32xf32> to vector<8x32xf32>
    %cst_144 = arith.constant dense<0.000000e+00> : vector<8x32xf32>
    %337 = tpu.matmul %335, %336, %cst_144 {dimension_numbers = #tpu.dot_dimension_numbers<[1], [0], [0], [1], [0, 0, 1, 1], [], []>} : vector<8x8xf32>, vector<8x32xf32>, vector<8x32xf32> -> vector<8x32xf32>
    %338 = arith.addf %318, %337 : vector<8x32xf32>
    %339 = vector.extract_strided_slice %314 {offsets = [0, 8], sizes = [8, 8], strides = [1, 1]} : vector<8x32xf32> to vector<8x8xf32>
    %340 = vector.extract_strided_slice %315 {offsets = [0, 8], sizes = [8, 8], strides = [1, 1]} : vector<8x32xf32> to vector<8x8xf32>
    %cst_145 = arith.constant dense<0.000000e+00> : vector<8x8xf32>
    %341 = tpu.matmul %339, %340, %cst_145 {dimension_numbers = #tpu.dot_dimension_numbers<[1], [1], [0], [0], [0, 0, 1, 0], [], []>} : vector<8x8xf32>, vector<8x8xf32>, vector<8x8xf32> -> vector<8x8xf32>
    %342 = vector.broadcast %317 : vector<1x8xf32> to vector<8x8xf32>
    %343 = arith.addf %341, %342 : vector<8x8xf32>
    %cst_146 = arith.constant dense<0xFF800000> : vector<8xf32>
    %344 = vector.multi_reduction <maximumf>, %343, %cst_146 [1] : vector<8x8xf32> to vector<8xf32>
    %345 = vector.shape_cast %344 : vector<8xf32> to vector<8x1xf32>
    %346 = vector.broadcast %345 : vector<8x1xf32> to vector<8x8xf32>
    %347 = arith.subf %343, %346 : vector<8x8xf32>
    %348 = math.exp %347 : vector<8x8xf32>
    %cst_147 = arith.constant dense<0.000000e+00> : vector<8xf32>
    %349 = vector.multi_reduction <add>, %348, %cst_147 [1] : vector<8x8xf32> to vector<8xf32>
    %350 = vector.shape_cast %349 : vector<8xf32> to vector<8x1xf32>
    %351 = tpu.reciprocal %350 {approx = true} : vector<8x1xf32> -> vector<8x1xf32>
    %352 = vector.broadcast %351 : vector<8x1xf32> to vector<8x8xf32>
    %353 = arith.mulf %348, %352 : vector<8x8xf32>
    %354 = vector.extract_strided_slice %316 {offsets = [0, 8], sizes = [8, 8], strides = [1, 1]} : vector<8x32xf32> to vector<8x8xf32>
    %cst_148 = arith.constant dense<0.000000e+00> : vector<8x8xf32>
    %355 = tpu.matmul %353, %354, %cst_148 {dimension_numbers = #tpu.dot_dimension_numbers<[1], [0], [0], [1], [0, 0, 1, 1], [], []>} : vector<8x8xf32>, vector<8x8xf32>, vector<8x8xf32> -> vector<8x8xf32>
    %356 = vector.extract_strided_slice %296 {offsets = [8, 0], sizes = [8, 32], strides = [1, 1]} : vector<32x32xf32> to vector<8x32xf32>
    %cst_149 = arith.constant dense<0.000000e+00> : vector<8x32xf32>
    %357 = tpu.matmul %355, %356, %cst_149 {dimension_numbers = #tpu.dot_dimension_numbers<[1], [0], [0], [1], [0, 0, 1, 1], [], []>} : vector<8x8xf32>, vector<8x32xf32>, vector<8x32xf32> -> vector<8x32xf32>
    %358 = arith.addf %338, %357 : vector<8x32xf32>
    %359 = vector.extract_strided_slice %314 {offsets = [0, 16], sizes = [8, 8], strides = [1, 1]} : vector<8x32xf32> to vector<8x8xf32>
    %360 = vector.extract_strided_slice %315 {offsets = [0, 16], sizes = [8, 8], strides = [1, 1]} : vector<8x32xf32> to vector<8x8xf32>
    %cst_150 = arith.constant dense<0.000000e+00> : vector<8x8xf32>
    %361 = tpu.matmul %359, %360, %cst_150 {dimension_numbers = #tpu.dot_dimension_numbers<[1], [1], [0], [0], [0, 0, 1, 0], [], []>} : vector<8x8xf32>, vector<8x8xf32>, vector<8x8xf32> -> vector<8x8xf32>
    %362 = vector.broadcast %317 : vector<1x8xf32> to vector<8x8xf32>
    %363 = arith.addf %361, %362 : vector<8x8xf32>
    %cst_151 = arith.constant dense<0xFF800000> : vector<8xf32>
    %364 = vector.multi_reduction <maximumf>, %363, %cst_151 [1] : vector<8x8xf32> to vector<8xf32>
    %365 = vector.shape_cast %364 : vector<8xf32> to vector<8x1xf32>
    %366 = vector.broadcast %365 : vector<8x1xf32> to vector<8x8xf32>
    %367 = arith.subf %363, %366 : vector<8x8xf32>
    %368 = math.exp %367 : vector<8x8xf32>
    %cst_152 = arith.constant dense<0.000000e+00> : vector<8xf32>
    %369 = vector.multi_reduction <add>, %368, %cst_152 [1] : vector<8x8xf32> to vector<8xf32>
    %370 = vector.shape_cast %369 : vector<8xf32> to vector<8x1xf32>
    %371 = tpu.reciprocal %370 {approx = true} : vector<8x1xf32> -> vector<8x1xf32>
    %372 = vector.broadcast %371 : vector<8x1xf32> to vector<8x8xf32>
    %373 = arith.mulf %368, %372 : vector<8x8xf32>
    %374 = vector.extract_strided_slice %316 {offsets = [0, 16], sizes = [8, 8], strides = [1, 1]} : vector<8x32xf32> to vector<8x8xf32>
    %cst_153 = arith.constant dense<0.000000e+00> : vector<8x8xf32>
    %375 = tpu.matmul %373, %374, %cst_153 {dimension_numbers = #tpu.dot_dimension_numbers<[1], [0], [0], [1], [0, 0, 1, 1], [], []>} : vector<8x8xf32>, vector<8x8xf32>, vector<8x8xf32> -> vector<8x8xf32>
    %376 = vector.extract_strided_slice %296 {offsets = [16, 0], sizes = [8, 32], strides = [1, 1]} : vector<32x32xf32> to vector<8x32xf32>
    %cst_154 = arith.constant dense<0.000000e+00> : vector<8x32xf32>
    %377 = tpu.matmul %375, %376, %cst_154 {dimension_numbers = #tpu.dot_dimension_numbers<[1], [0], [0], [1], [0, 0, 1, 1], [], []>} : vector<8x8xf32>, vector<8x32xf32>, vector<8x32xf32> -> vector<8x32xf32>
    %378 = arith.addf %358, %377 : vector<8x32xf32>
    %379 = vector.extract_strided_slice %314 {offsets = [0, 24], sizes = [8, 8], strides = [1, 1]} : vector<8x32xf32> to vector<8x8xf32>
    %380 = vector.extract_strided_slice %315 {offsets = [0, 24], sizes = [8, 8], strides = [1, 1]} : vector<8x32xf32> to vector<8x8xf32>
    %cst_155 = arith.constant dense<0.000000e+00> : vector<8x8xf32>
    %381 = tpu.matmul %379, %380, %cst_155 {dimension_numbers = #tpu.dot_dimension_numbers<[1], [1], [0], [0], [0, 0, 1, 0], [], []>} : vector<8x8xf32>, vector<8x8xf32>, vector<8x8xf32> -> vector<8x8xf32>
    %382 = vector.broadcast %317 : vector<1x8xf32> to vector<8x8xf32>
    %383 = arith.addf %381, %382 : vector<8x8xf32>
    %cst_156 = arith.constant dense<0xFF800000> : vector<8xf32>
    %384 = vector.multi_reduction <maximumf>, %383, %cst_156 [1] : vector<8x8xf32> to vector<8xf32>
    %385 = vector.shape_cast %384 : vector<8xf32> to vector<8x1xf32>
    %386 = vector.broadcast %385 : vector<8x1xf32> to vector<8x8xf32>
    %387 = arith.subf %383, %386 : vector<8x8xf32>
    %388 = math.exp %387 : vector<8x8xf32>
    %cst_157 = arith.constant dense<0.000000e+00> : vector<8xf32>
    %389 = vector.multi_reduction <add>, %388, %cst_157 [1] : vector<8x8xf32> to vector<8xf32>
    %390 = vector.shape_cast %389 : vector<8xf32> to vector<8x1xf32>
    %391 = tpu.reciprocal %390 {approx = true} : vector<8x1xf32> -> vector<8x1xf32>
    %392 = vector.broadcast %391 : vector<8x1xf32> to vector<8x8xf32>
    %393 = arith.mulf %388, %392 : vector<8x8xf32>
    %394 = vector.extract_strided_slice %316 {offsets = [0, 24], sizes = [8, 8], strides = [1, 1]} : vector<8x32xf32> to vector<8x8xf32>
    %cst_158 = arith.constant dense<0.000000e+00> : vector<8x8xf32>
    %395 = tpu.matmul %393, %394, %cst_158 {dimension_numbers = #tpu.dot_dimension_numbers<[1], [0], [0], [1], [0, 0, 1, 1], [], []>} : vector<8x8xf32>, vector<8x8xf32>, vector<8x8xf32> -> vector<8x8xf32>
    %396 = vector.extract_strided_slice %296 {offsets = [24, 0], sizes = [8, 32], strides = [1, 1]} : vector<32x32xf32> to vector<8x32xf32>
    %cst_159 = arith.constant dense<0.000000e+00> : vector<8x32xf32>
    %397 = tpu.matmul %395, %396, %cst_159 {dimension_numbers = #tpu.dot_dimension_numbers<[1], [0], [0], [1], [0, 0, 1, 1], [], []>} : vector<8x8xf32>, vector<8x32xf32>, vector<8x32xf32> -> vector<8x32xf32>
    %398 = arith.addf %378, %397 : vector<8x32xf32>
    %399 = vector.extract_strided_slice %301 {offsets = [8, 0], sizes = [8, 32], strides = [1, 1]} : vector<16x32xf32> to vector<8x32xf32>
    %cst_160 = arith.constant 0.353553385 : f32
    %400 = vector.broadcast %cst_160 : f32 to vector<8x32xf32>
    %401 = arith.mulf %399, %400 : vector<8x32xf32>
    %402 = vector.extract_strided_slice %306 {offsets = [8, 0], sizes = [8, 32], strides = [1, 1]} : vector<16x32xf32> to vector<8x32xf32>
    %403 = vector.extract_strided_slice %311 {offsets = [8, 0], sizes = [8, 32], strides = [1, 1]} : vector<16x32xf32> to vector<8x32xf32>
    %404 = vector.extract_strided_slice %5 {offsets = [1, 0], sizes = [1, 8], strides = [1, 1]} : vector<2x8xf32> to vector<1x8xf32>
    %cst_161 = arith.constant 0.000000e+00 : f32
    %405 = vector.broadcast %cst_161 : f32 to vector<8x32xf32>
    %406 = vector.extract_strided_slice %401 {offsets = [0, 0], sizes = [8, 8], strides = [1, 1]} : vector<8x32xf32> to vector<8x8xf32>
    %407 = vector.extract_strided_slice %402 {offsets = [0, 0], sizes = [8, 8], strides = [1, 1]} : vector<8x32xf32> to vector<8x8xf32>
    %cst_162 = arith.constant dense<0.000000e+00> : vector<8x8xf32>
    %408 = tpu.matmul %406, %407, %cst_162 {dimension_numbers = #tpu.dot_dimension_numbers<[1], [1], [0], [0], [0, 0, 1, 0], [], []>} : vector<8x8xf32>, vector<8x8xf32>, vector<8x8xf32> -> vector<8x8xf32>
    %409 = vector.broadcast %404 : vector<1x8xf32> to vector<8x8xf32>
    %410 = arith.addf %408, %409 : vector<8x8xf32>
    %cst_163 = arith.constant dense<0xFF800000> : vector<8xf32>
    %411 = vector.multi_reduction <maximumf>, %410, %cst_163 [1] : vector<8x8xf32> to vector<8xf32>
    %412 = vector.shape_cast %411 : vector<8xf32> to vector<8x1xf32>
    %413 = vector.broadcast %412 : vector<8x1xf32> to vector<8x8xf32>
    %414 = arith.subf %410, %413 : vector<8x8xf32>
    %415 = math.exp %414 : vector<8x8xf32>
    %cst_164 = arith.constant dense<0.000000e+00> : vector<8xf32>
    %416 = vector.multi_reduction <add>, %415, %cst_164 [1] : vector<8x8xf32> to vector<8xf32>
    %417 = vector.shape_cast %416 : vector<8xf32> to vector<8x1xf32>
    %418 = tpu.reciprocal %417 {approx = true} : vector<8x1xf32> -> vector<8x1xf32>
    %419 = vector.broadcast %418 : vector<8x1xf32> to vector<8x8xf32>
    %420 = arith.mulf %415, %419 : vector<8x8xf32>
    %421 = vector.extract_strided_slice %403 {offsets = [0, 0], sizes = [8, 8], strides = [1, 1]} : vector<8x32xf32> to vector<8x8xf32>
    %cst_165 = arith.constant dense<0.000000e+00> : vector<8x8xf32>
    %422 = tpu.matmul %420, %421, %cst_165 {dimension_numbers = #tpu.dot_dimension_numbers<[1], [0], [0], [1], [0, 0, 1, 1], [], []>} : vector<8x8xf32>, vector<8x8xf32>, vector<8x8xf32> -> vector<8x8xf32>
    %423 = vector.extract_strided_slice %296 {offsets = [0, 0], sizes = [8, 32], strides = [1, 1]} : vector<32x32xf32> to vector<8x32xf32>
    %cst_166 = arith.constant dense<0.000000e+00> : vector<8x32xf32>
    %424 = tpu.matmul %422, %423, %cst_166 {dimension_numbers = #tpu.dot_dimension_numbers<[1], [0], [0], [1], [0, 0, 1, 1], [], []>} : vector<8x8xf32>, vector<8x32xf32>, vector<8x32xf32> -> vector<8x32xf32>
    %425 = arith.addf %405, %424 : vector<8x32xf32>
    %426 = vector.extract_strided_slice %401 {offsets = [0, 8], sizes = [8, 8], strides = [1, 1]} : vector<8x32xf32> to vector<8x8xf32>
    %427 = vector.extract_strided_slice %402 {offsets = [0, 8], sizes = [8, 8], strides = [1, 1]} : vector<8x32xf32> to vector<8x8xf32>
    %cst_167 = arith.constant dense<0.000000e+00> : vector<8x8xf32>
    %428 = tpu.matmul %426, %427, %cst_167 {dimension_numbers = #tpu.dot_dimension_numbers<[1], [1], [0], [0], [0, 0, 1, 0], [], []>} : vector<8x8xf32>, vector<8x8xf32>, vector<8x8xf32> -> vector<8x8xf32>
    %429 = vector.broadcast %404 : vector<1x8xf32> to vector<8x8xf32>
    %430 = arith.addf %428, %429 : vector<8x8xf32>
    %cst_168 = arith.constant dense<0xFF800000> : vector<8xf32>
    %431 = vector.multi_reduction <maximumf>, %430, %cst_168 [1] : vector<8x8xf32> to vector<8xf32>
    %432 = vector.shape_cast %431 : vector<8xf32> to vector<8x1xf32>
    %433 = vector.broadcast %432 : vector<8x1xf32> to vector<8x8xf32>
    %434 = arith.subf %430, %433 : vector<8x8xf32>
    %435 = math.exp %434 : vector<8x8xf32>
    %cst_169 = arith.constant dense<0.000000e+00> : vector<8xf32>
    %436 = vector.multi_reduction <add>, %435, %cst_169 [1] : vector<8x8xf32> to vector<8xf32>
    %437 = vector.shape_cast %436 : vector<8xf32> to vector<8x1xf32>
    %438 = tpu.reciprocal %437 {approx = true} : vector<8x1xf32> -> vector<8x1xf32>
    %439 = vector.broadcast %438 : vector<8x1xf32> to vector<8x8xf32>
    %440 = arith.mulf %435, %439 : vector<8x8xf32>
    %441 = vector.extract_strided_slice %403 {offsets = [0, 8], sizes = [8, 8], strides = [1, 1]} : vector<8x32xf32> to vector<8x8xf32>
    %cst_170 = arith.constant dense<0.000000e+00> : vector<8x8xf32>
    %442 = tpu.matmul %440, %441, %cst_170 {dimension_numbers = #tpu.dot_dimension_numbers<[1], [0], [0], [1], [0, 0, 1, 1], [], []>} : vector<8x8xf32>, vector<8x8xf32>, vector<8x8xf32> -> vector<8x8xf32>
    %443 = vector.extract_strided_slice %296 {offsets = [8, 0], sizes = [8, 32], strides = [1, 1]} : vector<32x32xf32> to vector<8x32xf32>
    %cst_171 = arith.constant dense<0.000000e+00> : vector<8x32xf32>
    %444 = tpu.matmul %442, %443, %cst_171 {dimension_numbers = #tpu.dot_dimension_numbers<[1], [0], [0], [1], [0, 0, 1, 1], [], []>} : vector<8x8xf32>, vector<8x32xf32>, vector<8x32xf32> -> vector<8x32xf32>
    %445 = arith.addf %425, %444 : vector<8x32xf32>
    %446 = vector.extract_strided_slice %401 {offsets = [0, 16], sizes = [8, 8], strides = [1, 1]} : vector<8x32xf32> to vector<8x8xf32>
    %447 = vector.extract_strided_slice %402 {offsets = [0, 16], sizes = [8, 8], strides = [1, 1]} : vector<8x32xf32> to vector<8x8xf32>
    %cst_172 = arith.constant dense<0.000000e+00> : vector<8x8xf32>
    %448 = tpu.matmul %446, %447, %cst_172 {dimension_numbers = #tpu.dot_dimension_numbers<[1], [1], [0], [0], [0, 0, 1, 0], [], []>} : vector<8x8xf32>, vector<8x8xf32>, vector<8x8xf32> -> vector<8x8xf32>
    %449 = vector.broadcast %404 : vector<1x8xf32> to vector<8x8xf32>
    %450 = arith.addf %448, %449 : vector<8x8xf32>
    %cst_173 = arith.constant dense<0xFF800000> : vector<8xf32>
    %451 = vector.multi_reduction <maximumf>, %450, %cst_173 [1] : vector<8x8xf32> to vector<8xf32>
    %452 = vector.shape_cast %451 : vector<8xf32> to vector<8x1xf32>
    %453 = vector.broadcast %452 : vector<8x1xf32> to vector<8x8xf32>
    %454 = arith.subf %450, %453 : vector<8x8xf32>
    %455 = math.exp %454 : vector<8x8xf32>
    %cst_174 = arith.constant dense<0.000000e+00> : vector<8xf32>
    %456 = vector.multi_reduction <add>, %455, %cst_174 [1] : vector<8x8xf32> to vector<8xf32>
    %457 = vector.shape_cast %456 : vector<8xf32> to vector<8x1xf32>
    %458 = tpu.reciprocal %457 {approx = true} : vector<8x1xf32> -> vector<8x1xf32>
    %459 = vector.broadcast %458 : vector<8x1xf32> to vector<8x8xf32>
    %460 = arith.mulf %455, %459 : vector<8x8xf32>
    %461 = vector.extract_strided_slice %403 {offsets = [0, 16], sizes = [8, 8], strides = [1, 1]} : vector<8x32xf32> to vector<8x8xf32>
    %cst_175 = arith.constant dense<0.000000e+00> : vector<8x8xf32>
    %462 = tpu.matmul %460, %461, %cst_175 {dimension_numbers = #tpu.dot_dimension_numbers<[1], [0], [0], [1], [0, 0, 1, 1], [], []>} : vector<8x8xf32>, vector<8x8xf32>, vector<8x8xf32> -> vector<8x8xf32>
    %463 = vector.extract_strided_slice %296 {offsets = [16, 0], sizes = [8, 32], strides = [1, 1]} : vector<32x32xf32> to vector<8x32xf32>
    %cst_176 = arith.constant dense<0.000000e+00> : vector<8x32xf32>
    %464 = tpu.matmul %462, %463, %cst_176 {dimension_numbers = #tpu.dot_dimension_numbers<[1], [0], [0], [1], [0, 0, 1, 1], [], []>} : vector<8x8xf32>, vector<8x32xf32>, vector<8x32xf32> -> vector<8x32xf32>
    %465 = arith.addf %445, %464 : vector<8x32xf32>
    %466 = vector.extract_strided_slice %401 {offsets = [0, 24], sizes = [8, 8], strides = [1, 1]} : vector<8x32xf32> to vector<8x8xf32>
    %467 = vector.extract_strided_slice %402 {offsets = [0, 24], sizes = [8, 8], strides = [1, 1]} : vector<8x32xf32> to vector<8x8xf32>
    %cst_177 = arith.constant dense<0.000000e+00> : vector<8x8xf32>
    %468 = tpu.matmul %466, %467, %cst_177 {dimension_numbers = #tpu.dot_dimension_numbers<[1], [1], [0], [0], [0, 0, 1, 0], [], []>} : vector<8x8xf32>, vector<8x8xf32>, vector<8x8xf32> -> vector<8x8xf32>
    %469 = vector.broadcast %404 : vector<1x8xf32> to vector<8x8xf32>
    %470 = arith.addf %468, %469 : vector<8x8xf32>
    %cst_178 = arith.constant dense<0xFF800000> : vector<8xf32>
    %471 = vector.multi_reduction <maximumf>, %470, %cst_178 [1] : vector<8x8xf32> to vector<8xf32>
    %472 = vector.shape_cast %471 : vector<8xf32> to vector<8x1xf32>
    %473 = vector.broadcast %472 : vector<8x1xf32> to vector<8x8xf32>
    %474 = arith.subf %470, %473 : vector<8x8xf32>
    %475 = math.exp %474 : vector<8x8xf32>
    %cst_179 = arith.constant dense<0.000000e+00> : vector<8xf32>
    %476 = vector.multi_reduction <add>, %475, %cst_179 [1] : vector<8x8xf32> to vector<8xf32>
    %477 = vector.shape_cast %476 : vector<8xf32> to vector<8x1xf32>
    %478 = tpu.reciprocal %477 {approx = true} : vector<8x1xf32> -> vector<8x1xf32>
    %479 = vector.broadcast %478 : vector<8x1xf32> to vector<8x8xf32>
    %480 = arith.mulf %475, %479 : vector<8x8xf32>
    %481 = vector.extract_strided_slice %403 {offsets = [0, 24], sizes = [8, 8], strides = [1, 1]} : vector<8x32xf32> to vector<8x8xf32>
    %cst_180 = arith.constant dense<0.000000e+00> : vector<8x8xf32>
    %482 = tpu.matmul %480, %481, %cst_180 {dimension_numbers = #tpu.dot_dimension_numbers<[1], [0], [0], [1], [0, 0, 1, 1], [], []>} : vector<8x8xf32>, vector<8x8xf32>, vector<8x8xf32> -> vector<8x8xf32>
    %483 = vector.extract_strided_slice %296 {offsets = [24, 0], sizes = [8, 32], strides = [1, 1]} : vector<32x32xf32> to vector<8x32xf32>
    %cst_181 = arith.constant dense<0.000000e+00> : vector<8x32xf32>
    %484 = tpu.matmul %482, %483, %cst_181 {dimension_numbers = #tpu.dot_dimension_numbers<[1], [0], [0], [1], [0, 0, 1, 1], [], []>} : vector<8x8xf32>, vector<8x32xf32>, vector<8x32xf32> -> vector<8x32xf32>
    %485 = arith.addf %465, %484 : vector<8x32xf32>
    %486 = tpu.concatenate %398, %485 in 0 : vector<8x32xf32>, vector<8x32xf32> -> vector<16x32xf32>
    %c1_182 = arith.constant 1 : index
    %c0_183 = arith.constant 0 : index
    %c0_184 = arith.constant 0 : index
    %487 = vector.load %arg9[%c1_182, %c0_183, %c0_184] : memref<2x1x32xf32, #tpu.memory_space<vmem>>, vector<1x1x32xf32>
    %488 = vector.shape_cast %487 : vector<1x1x32xf32> to vector<1x32xf32>
    %489 = vector.broadcast %488 : vector<1x32xf32> to vector<16x32xf32>
    %490 = arith.addf %486, %489 : vector<16x32xf32>
    %491 = arith.addf %288, %490 : vector<16x32xf32>
    %c1_185 = arith.constant 1 : index
    %c0_186 = arith.constant 0 : index
    %c0_187 = arith.constant 0 : index
    %492 = vector.load %arg10[%c1_185, %c0_186, %c0_187] : memref<2x1x32xf32, #tpu.memory_space<vmem>>, vector<1x1x32xf32>
    %493 = vector.shape_cast %492 : vector<1x1x32xf32> to vector<1x32xf32>
    %c1_188 = arith.constant 1 : index
    %c0_189 = arith.constant 0 : index
    %c0_190 = arith.constant 0 : index
    %494 = vector.load %arg11[%c1_188, %c0_189, %c0_190] : memref<2x1x32xf32, #tpu.memory_space<vmem>>, vector<1x1x32xf32>
    %495 = vector.shape_cast %494 : vector<1x1x32xf32> to vector<1x32xf32>
    %cst_191 = arith.constant dense<0.000000e+00> : vector<16xf32>
    %496 = vector.multi_reduction <add>, %491, %cst_191 [1] : vector<16x32xf32> to vector<16xf32>
    %497 = vector.shape_cast %496 : vector<16xf32> to vector<16x1xf32>
    %cst_192 = arith.constant 3.200000e+01 : f32
    %498 = vector.broadcast %cst_192 : f32 to vector<16x1xf32>
    %499 = arith.divf %497, %498 : vector<16x1xf32>
    %500 = vector.broadcast %499 : vector<16x1xf32> to vector<16x32xf32>
    %501 = arith.subf %491, %500 : vector<16x32xf32>
    %502 = arith.mulf %501, %501 : vector<16x32xf32>
    %cst_193 = arith.constant dense<0.000000e+00> : vector<16xf32>
    %503 = vector.multi_reduction <add>, %502, %cst_193 [1] : vector<16x32xf32> to vector<16xf32>
    %504 = vector.shape_cast %503 : vector<16xf32> to vector<16x1xf32>
    %cst_194 = arith.constant 3.200000e+01 : f32
    %505 = vector.broadcast %cst_194 : f32 to vector<16x1xf32>
    %506 = arith.divf %504, %505 : vector<16x1xf32>
    %507 = vector.broadcast %499 : vector<16x1xf32> to vector<16x32xf32>
    %508 = arith.subf %491, %507 : vector<16x32xf32>
    %cst_195 = arith.constant 9.99999996E-13 : f32
    %509 = vector.broadcast %cst_195 : f32 to vector<16x1xf32>
    %510 = arith.addf %506, %509 : vector<16x1xf32>
    %511 = math.rsqrt %510 : vector<16x1xf32>
    %512 = vector.broadcast %511 : vector<16x1xf32> to vector<16x32xf32>
    %513 = arith.mulf %508, %512 : vector<16x32xf32>
    %514 = vector.broadcast %493 : vector<1x32xf32> to vector<16x32xf32>
    %515 = arith.mulf %513, %514 : vector<16x32xf32>
    %516 = vector.broadcast %495 : vector<1x32xf32> to vector<16x32xf32>
    %517 = arith.addf %515, %516 : vector<16x32xf32>
    %c1_196 = arith.constant 1 : index
    %c0_197 = arith.constant 0 : index
    %c0_198 = arith.constant 0 : index
    %518 = vector.load %arg12[%c1_196, %c0_197, %c0_198] : memref<2x32x64xf32, #tpu.memory_space<vmem>>, vector<1x32x64xf32>
    %519 = vector.shape_cast %518 : vector<1x32x64xf32> to vector<32x64xf32>
    %cst_199 = arith.constant dense<0.000000e+00> : vector<16x64xf32>
    %520 = tpu.matmul %517, %519, %cst_199 {dimension_numbers = #tpu.dot_dimension_numbers<[1], [0], [0], [1], [0, 0, 1, 1], [], []>} : vector<16x32xf32>, vector<32x64xf32>, vector<16x64xf32> -> vector<16x64xf32>
    %c1_200 = arith.constant 1 : index
    %c0_201 = arith.constant 0 : index
    %c0_202 = arith.constant 0 : index
    %521 = vector.load %arg13[%c1_200, %c0_201, %c0_202] : memref<2x1x64xf32, #tpu.memory_space<vmem>>, vector<1x1x64xf32>
    %522 = vector.shape_cast %521 : vector<1x1x64xf32> to vector<1x64xf32>
    %523 = vector.broadcast %522 : vector<1x64xf32> to vector<16x64xf32>
    %524 = arith.addf %520, %523 : vector<16x64xf32>
    %525 = arith.mulf %524, %524 : vector<16x64xf32>
    %526 = arith.mulf %524, %525 : vector<16x64xf32>
    %cst_203 = arith.constant 4.471500e-02 : f32
    %527 = vector.broadcast %cst_203 : f32 to vector<16x64xf32>
    %528 = arith.mulf %527, %526 : vector<16x64xf32>
    %529 = arith.addf %524, %528 : vector<16x64xf32>
    %cst_204 = arith.constant 0.797884583 : f32
    %530 = vector.broadcast %cst_204 : f32 to vector<16x64xf32>
    %531 = arith.mulf %530, %529 : vector<16x64xf32>
    %532 = math.tanh %531 : vector<16x64xf32>
    %cst_205 = arith.constant 1.000000e+00 : f32
    %533 = vector.broadcast %cst_205 : f32 to vector<16x64xf32>
    %534 = arith.addf %533, %532 : vector<16x64xf32>
    %cst_206 = arith.constant 5.000000e-01 : f32
    %535 = vector.broadcast %cst_206 : f32 to vector<16x64xf32>
    %536 = arith.mulf %535, %534 : vector<16x64xf32>
    %537 = arith.mulf %524, %536 : vector<16x64xf32>
    %c1_207 = arith.constant 1 : index
    %c0_208 = arith.constant 0 : index
    %c0_209 = arith.constant 0 : index
    %538 = vector.load %arg14[%c1_207, %c0_208, %c0_209] : memref<2x64x32xf32, #tpu.memory_space<vmem>>, vector<1x64x32xf32>
    %539 = vector.shape_cast %538 : vector<1x64x32xf32> to vector<64x32xf32>
    %cst_210 = arith.constant dense<0.000000e+00> : vector<16x32xf32>
    %540 = tpu.matmul %537, %539, %cst_210 {dimension_numbers = #tpu.dot_dimension_numbers<[1], [0], [0], [1], [0, 0, 1, 1], [], []>} : vector<16x64xf32>, vector<64x32xf32>, vector<16x32xf32> -> vector<16x32xf32>
    %c1_211 = arith.constant 1 : index
    %c0_212 = arith.constant 0 : index
    %c0_213 = arith.constant 0 : index
    %541 = vector.load %arg15[%c1_211, %c0_212, %c0_213] : memref<2x1x32xf32, #tpu.memory_space<vmem>>, vector<1x1x32xf32>
    %542 = vector.shape_cast %541 : vector<1x1x32xf32> to vector<1x32xf32>
    %543 = vector.broadcast %542 : vector<1x32xf32> to vector<16x32xf32>
    %544 = arith.addf %540, %543 : vector<16x32xf32>
    %545 = arith.addf %517, %544 : vector<16x32xf32>
    %c1_214 = arith.constant 1 : index
    %c0_215 = arith.constant 0 : index
    %c0_216 = arith.constant 0 : index
    %546 = vector.load %arg16[%c1_214, %c0_215, %c0_216] : memref<2x1x32xf32, #tpu.memory_space<vmem>>, vector<1x1x32xf32>
    %547 = vector.shape_cast %546 : vector<1x1x32xf32> to vector<1x32xf32>
    %c1_217 = arith.constant 1 : index
    %c0_218 = arith.constant 0 : index
    %c0_219 = arith.constant 0 : index
    %548 = vector.load %arg17[%c1_217, %c0_218, %c0_219] : memref<2x1x32xf32, #tpu.memory_space<vmem>>, vector<1x1x32xf32>
    %549 = vector.shape_cast %548 : vector<1x1x32xf32> to vector<1x32xf32>
    %cst_220 = arith.constant dense<0.000000e+00> : vector<16xf32>
    %550 = vector.multi_reduction <add>, %545, %cst_220 [1] : vector<16x32xf32> to vector<16xf32>
    %551 = vector.shape_cast %550 : vector<16xf32> to vector<16x1xf32>
    %cst_221 = arith.constant 3.200000e+01 : f32
    %552 = vector.broadcast %cst_221 : f32 to vector<16x1xf32>
    %553 = arith.divf %551, %552 : vector<16x1xf32>
    %554 = vector.broadcast %553 : vector<16x1xf32> to vector<16x32xf32>
    %555 = arith.subf %545, %554 : vector<16x32xf32>
    %556 = arith.mulf %555, %555 : vector<16x32xf32>
    %cst_222 = arith.constant dense<0.000000e+00> : vector<16xf32>
    %557 = vector.multi_reduction <add>, %556, %cst_222 [1] : vector<16x32xf32> to vector<16xf32>
    %558 = vector.shape_cast %557 : vector<16xf32> to vector<16x1xf32>
    %cst_223 = arith.constant 3.200000e+01 : f32
    %559 = vector.broadcast %cst_223 : f32 to vector<16x1xf32>
    %560 = arith.divf %558, %559 : vector<16x1xf32>
    %561 = vector.broadcast %553 : vector<16x1xf32> to vector<16x32xf32>
    %562 = arith.subf %545, %561 : vector<16x32xf32>
    %cst_224 = arith.constant 9.99999996E-13 : f32
    %563 = vector.broadcast %cst_224 : f32 to vector<16x1xf32>
    %564 = arith.addf %560, %563 : vector<16x1xf32>
    %565 = math.rsqrt %564 : vector<16x1xf32>
    %566 = vector.broadcast %565 : vector<16x1xf32> to vector<16x32xf32>
    %567 = arith.mulf %562, %566 : vector<16x32xf32>
    %568 = vector.broadcast %547 : vector<1x32xf32> to vector<16x32xf32>
    %569 = arith.mulf %567, %568 : vector<16x32xf32>
    %570 = vector.broadcast %549 : vector<1x32xf32> to vector<16x32xf32>
    %571 = arith.addf %569, %570 : vector<16x32xf32>
    %c0_225 = arith.constant 0 : index
    %c0_226 = arith.constant 0 : index
    %572 = vector.load %arg18[%c0_225, %c0_226] : memref<32x32xf32, #tpu.memory_space<vmem>>, vector<32x32xf32>
    %cst_227 = arith.constant dense<0.000000e+00> : vector<16x32xf32>
    %573 = tpu.matmul %571, %572, %cst_227 {dimension_numbers = #tpu.dot_dimension_numbers<[1], [0], [0], [1], [0, 0, 1, 1], [], []>} : vector<16x32xf32>, vector<32x32xf32>, vector<16x32xf32> -> vector<16x32xf32>
    %c0_228 = arith.constant 0 : index
    %c0_229 = arith.constant 0 : index
    %574 = vector.load %arg19[%c0_228, %c0_229] : memref<1x32xf32, #tpu.memory_space<vmem>>, vector<1x32xf32>
    %575 = vector.broadcast %574 : vector<1x32xf32> to vector<16x32xf32>
    %576 = arith.addf %573, %575 : vector<16x32xf32>
    %577 = math.tanh %576 : vector<16x32xf32>
    %c0_230 = arith.constant 0 : index
    %c0_231 = arith.constant 0 : index
    %578 = vector.load %arg20[%c0_230, %c0_231] : memref<32x128xf32, #tpu.memory_space<vmem>>, vector<32x128xf32>
    %cst_232 = arith.constant dense<0.000000e+00> : vector<16x128xf32>
    %579 = tpu.matmul %577, %578, %cst_232 {dimension_numbers = #tpu.dot_dimension_numbers<[1], [0], [0], [1], [0, 0, 1, 1], [], []>} : vector<16x32xf32>, vector<32x128xf32>, vector<16x128xf32> -> vector<16x128xf32>
    %c0_233 = arith.constant 0 : index
    %c0_234 = arith.constant 0 : index
    %580 = vector.load %arg21[%c0_233, %c0_234] : memref<1x128xf32, #tpu.memory_space<vmem>>, vector<1x128xf32>
    %581 = vector.broadcast %580 : vector<1x128xf32> to vector<16x128xf32>
    %582 = arith.addf %579, %581 : vector<16x128xf32>
    %c0_235 = arith.constant 0 : index
    %c0_236 = arith.constant 0 : index
    %583 = vector.load %arg22[%c0_235, %c0_236] : memref<16x128xf32, #tpu.memory_space<vmem>>, vector<16x128xf32>
    tpu.vector_store %arg22[%c0_235, %c0_236], %582 {strides = array<i32>} : memref<16x128xf32, #tpu.memory_space<vmem>>, vector<16x128xf32>,
    return
  }
}

</mosaic_0001>

<bundles_post_ra>
// kernel: forward.1
= control target key start
LH: loop header
LB: loop body
LE: loop exit
PB: predicated region body
PF: predicated region fallthrough
CT: control target
= control target key end

     0   :  { %vm99_vm0 = vcmask 261120   ;;  %v6059_v10 = vmov 0.0   ;;  %vm6060_vm1 = vmmov 0   ;;  %vm350_vm2 = vcmask 64512   ;;  %s6061_s27 = smov 120   ;;  %s6978_s23 = smov 104   ;;  %s6948_s2 = inlined_call_operand.vmem [shape: f32[2,32,32], index: 2, kind: input, shape index: {}]   ;;  %s6949_s4 = inlined_call_operand.vmem [shape: f32[2,32,32], index: 4, kind: input, shape index: {}]   ;;  %s6950_s0 = inlined_call_operand.vmem [shape: f32[16,32], index: 0, kind: input, shape index: {}]   ;;  %s6951_s3 = inlined_call_operand.vmem [shape: f32[2,1,32], index: 3, kind: input, shape index: {}]   ;;  %s6952_s5 = inlined_call_operand.vmem [shape: f32[2,1,32], index: 5, kind: input, shape index: {}]   ;;  %s6953_s6 = inlined_call_operand.vmem [shape: f32[2,32,32], index: 6, kind: input, shape index: {}]   ;;  %s6954_s1 = inlined_call_operand.vmem [shape: f32[2,8], index: 1, kind: input, shape index: {}]   ;;  %s6955_s7 = inlined_call_operand.vmem [shape: f32[2,1,32], index: 7, kind: input, shape index: {}]   ;;  %s6956_s8 = inlined_call_operand.vmem [shape: f32[2,32,32], index: 8, kind: input, shape index: {}]   ;;  %s6957_s9 = inlined_call_operand.vmem [shape: f32[2,1,32], index: 9, kind: input, shape index: {}]   ;;  %s6958_s10 = inlined_call_operand.vmem [shape: f32[2,1,32], index: 10, kind: input, shape index: {}]   ;;  %s6959_s11 = inlined_call_operand.vmem [shape: f32[2,1,32], index: 11, kind: input, shape index: {}]   ;;  %s6960_s12 = inlined_call_operand.vmem [shape: f32[2,32,64], index: 12, kind: input, shape index: {}]   ;;  %s6961_s14 = inlined_call_operand.vmem [shape: f32[2,64,32], index: 14, kind: input, shape index: {}]   ;;  %s6962_s13 = inlined_call_operand.vmem [shape: f32[2,1,64], index: 13, kind: input, shape index: {}]   ;;  %s6963_s15 = inlined_call_operand.vmem [shape: f32[2,1,32], index: 15, kind: input, shape index: {}]   ;;  %s6964_s16 = inlined_call_operand.vmem [shape: f32[2,1,32], index: 16, kind: input, shape index: {}]   ;;  %s6965_s17 = inlined_call_operand.vmem [shape: f32[2,1,32], index: 17, kind: input, shape index: {}]   ;;  %s6966_s18 = inlined_call_operand.vmem [shape: f32[32,32], index: 18, kind: input, shape index: {}]   ;;  %s6967_s20 = inlined_call_operand.vmem [shape: f32[32,128], index: 20, kind: input, shape index: {}]   ;;  %s6968_s19 = inlined_call_operand.vmem [shape: f32[1,32], index: 19, kind: input, shape index: {}]   ;;  %s6969_s21 = inlined_call_operand.vmem [shape: f32[1,128], index: 21, kind: input, shape index: {}]   ;;  %s6970_s22 = inlined_call_operand.vmem [shape: f32[16,128], index: 22, kind: output, shape index: {}]  }
   0x1   :  { %6982 = sst [smem:[#allocation2_spill]] %s6948_s2  ;;  %v346_v26 = vlaneseq  ;;  %v5256_v43 = vld [vmem:[%s6955_s7] ss:$0 sm:$0xff]  ;;  %vm2437_vm3 = vcmask 523264  }
   0x2   :  { %6983 = sst [smem:[#allocation3_spill]] %s6949_s4 }
   0x3   :  { %6984 = sst [smem:[#allocation4_spill]] %s6950_s0  ;;  %v6271_v29 = vshrl.u32 %v346_v26, 7 }
   0x4   :  { %6985 = sst [smem:[#allocation5_spill]] %s6951_s3 }
   0x5   :  { %6986 = sst [smem:[#allocation6_spill]] %s6952_s5  ;;  %v348_v31 = vsub.s32 0, %v6271_v29 }
   0x6   :  { %6987 = sst [smem:[#allocation7_spill]] %s6953_s6 }
   0x7   :  { %6988 = sst [smem:[#allocation8_spill]] %s6954_s1 }
   0x8   :  { %6989 = sst [smem:[#allocation9_spill]] %s6965_s17 }
   0x9   :  { %s6990_s29 = sld [smem:[#allocation2_spill]] }
   0xa   :  { %s6991_s17 = sld [smem:[#allocation3_spill]] }
   0xb   :  { %s6992_s2 = sld [smem:[#allocation4_spill]] }
   0xc   :  { %s6993_s1 = sld [smem:[#allocation5_spill]] }
   0xd   :  { %s6994_s0 = sld [smem:[#allocation6_spill]] }
   0xe   :  { %s6995_s30 = sld [smem:[#allocation7_spill]] }
   0xf   :  { %v79_v0 = vld [vmem:[%s6990_s29 + $0x18] sm:$0xff]  ;;  %v78_v2 = vld [vmem:[%s6990_s29 + $0x10] sm:$0xff]  ;;  %v77_v4 = vld [vmem:[%s6990_s29 + $0x8] sm:$0xff]  ;;  %s6996_s3 = sld [smem:[#allocation8_spill]] }
  0x10   :  { %v83_v1 = vld [vmem:[%s6991_s17 + $0x18] sm:$0xff]  ;;  %5574 = vmatprep.subr.mxu0 %v79_v0  ;;  %v82_v3 = vld [vmem:[%s6991_s17 + $0x10] sm:$0xff]  ;;  %v81_v5 = vld [vmem:[%s6991_s17 + $0x8] sm:$0xff]  ;;  %s6997_s24 = sld [smem:[#allocation9_spill]] }
  0x11   :  { %5585 = vmatprep.subr.mxu1 %v83_v1  ;;  %5575 = vmatpush3.msra.mxu0 %v79_v0  ;;  %v76_v6 = vld [vmem:[%s6990_s29] sm:$0xff]  ;;  %v6211_v9 = vld [vmem:[%s6992_s2 + $0x8] sm:$0xff] }
  0x12   :  { %5586 = vmatpush3.msra.mxu1 %v83_v1  ;;  %5576 = vmatprep.subr.mxu0 %v78_v2  ;;  %v80_v7 = vld [vmem:[%s6991_s17] sm:$0xff]  ;;  %v6316_v0 = vld [vmem:[%s6956_s8 + $0x8] sm:$0xff] }
  0x13   :  { %5587 = vmatprep.subr.mxu1 %v82_v3  ;;  %5577 = vmatpush3.msra.mxu0 %v78_v2  ;;  %v6206_v8 = vld [vmem:[%s6992_s2] sm:$0xff]  ;;  %s6980_s2 = smov 112  }
  0x14   :  { %5588 = vmatpush3.msra.mxu1 %v82_v3  ;;  %5578 = vmatprep.subr.mxu0 %v77_v4  ;;  %v5250_v11 = vld [vmem:[%s6993_s1] ss:$0 sm:$0xff]  ;;  %v87_v22 = vld [vmem:[%s6995_s30 + $0x18] sm:$0xff]  ;;  %v86_v23 = vld [vmem:[%s6995_s30 + $0x10] sm:$0xff] }
  0x15   :  { %5589 = vmatprep.subr.mxu1 %v81_v5  ;;  %5579 = vmatpush3.msra.mxu0 %v77_v4  ;;  %v5253_v12 = vld [vmem:[%s6994_s0] ss:$0 sm:$0xff]  ;;  %v85_v24 = vld [vmem:[%s6995_s30 + $0x8] sm:$0xff] }
  0x16   :  { %5590 = vmatpush3.msra.mxu1 %v81_v5  ;;  %5580 = vmatprep.subr.mxu0 %v76_v6  ;;  %v84_v25 = vld [vmem:[%s6995_s30] sm:$0xff] }
  0x17   :  { %5591 = vmatprep.subr.mxu1 %v80_v7  ;;  %5581 = vmatpush3.msra.mxu0 %v76_v6  ;;  %v73_v27 = vld [vmem:[%s6996_s3] sm:$0x3]  ;;  %s6999_s3 = smov 104  }
  0x18   :  { %5582 = vmatprep.mubr.msk.f32.mxu0 %vm99_vm0, %v6206_v8  ;;  %5592 = vmatpush3.msra.mxu1 %v80_v7  ;;  %v74_v28 = vsub.f32 1.0, %v73_v27  ;;  %v6323_v4 = vld [vmem:[%s6956_s8] sm:$0xff] }
  0x19   :  { %5593 = vmatprep.mubr.msk.f32.mxu1 %vm99_vm0, %v6206_v8  ;;  %5583 = vmatmul.mubr.msk.f32.vlgmr.msra.gmra.mxu0 %vm99_vm0, %v6211_v9 }
  0x1a   :  { %5594 = vmatmul.mubr.msk.f32.vlgmr.msra.gmra.mxu1 %vm99_vm0, %v6211_v9  ;;  %5604 = vmatprep.mubr.msk.f32.mxu0 %vm99_vm0, %v6206_v8  ;;  %v6273_v30 = vmul.f32 -1e+09, %v74_v28 }
  0x1b   :  { %5607 = vmatprep.subr.mxu1 %v6059_v10  ;;  %5609 = vmatprep.mubr.msk.f32.mxu1 %vm6060_vm1, %v6059_v10 }
  0x1c   :  { %5596 = vmatprep.subr.mxu0 %v87_v22  ;;  %v6277_v32 = vrot.slane %v6273_v30, %v348_v31 }
  0x1d   :  { %5597 = vmatpush3.msra.mxu0 %v87_v22 }
  0x1e   :  { %5598 = vmatprep.subr.mxu0 %v86_v23 }
  0x1f   :  { %5599 = vmatpush3.msra.mxu0 %v86_v23 }
  0x20   :  { %5600 = vmatprep.subr.mxu0 %v85_v24 }
  0x21   :  { %5601 = vmatpush3.msra.mxu0 %v85_v24 }
  0x22   :  { %5602 = vmatprep.subr.mxu0 %v84_v25 }
  0x23   :  { %5603 = vmatpush3.msra.mxu0 %v84_v25 }
  0x24   :  { %5605 = vmatmul.mubr.msk.f32.vlgmr.msra.gmra.mxu0 %vm99_vm0, %v6211_v9  ;;  %5627 = vmatprep.subr.mxu0 %v6059_v10 }
  0x25   :  { %5629 = vmatprep.mubr.msk.f32.mxu0 %vm6060_vm1, %v6059_v10  ;;  %5628 = vmatpush3.msra.mxu0 %v6316_v0 }
  0x26   :  { %5637 = vmatprep.subr.mxu0 %v6059_v10 }
  0xd9   :  { %v5584_v13 = vpop.f32.mrf.mxu0 }
  0xda   :  { %v5595_v14 = vpop.f32.mrf.mxu1  ;;  %v6232_v15 = vadd.f32 %v5584_v13, %v5250_v11 }
  0xdb   :  { %v6234_v16 = vadd.f32 %v5595_v14, %v5253_v12  ;;  %v172_v17 = vpop.f32.mrf.mxu0 }
  0xdc   :  { %v254_v18 = vpop.f32.mrf.mxu1  ;;  %v173_v19 = vadd.f32 %v5250_v11, %v172_v17 }
  0xdd   :  { %v6236_v20 = vadd.f32 %v5253_v12, %v254_v18 }
  0xde   :  { %v6238_v21 = vmul.f32 0.35355338, %v173_v19 }
  0xdf   :  { %513 = vrot.lane.b32.xlu1 %v6236_v20, %s6061_s27  ;;  %5608 = vmatpush3.xpose.msk.msra.mxu1 %vm350_vm2, %v6236_v20 }
  0xe0   :  { %5612 = vmatprep.subr.mxu1 %v6059_v10 }
  0xe2   :  { %5610 = vmatmul.mubr.msk.f32.vlgmr.msra.gmra.mxu1 %vm350_vm2, %v6238_v21 }
  0xe3   :  { %511 = vrot.lane.b32.xlu1 %v6238_v21, %s6061_s27  ;;  %5614 = vmatprep.mubr.msk.f32.mxu1 %vm6060_vm1, %v6059_v10 }
  0xe4   :  { %v5606_v42 = vpop.f32.mrf.mxu0 }
  0xe5   :  { %v6285_v44 = vadd.f32 %v5606_v42, %v5256_v43 }
  0xe6   :  { %v336_v45 = vpop.f32.mrf.mxu0 }
  0xe7   :  { %v6287_v46 = vadd.f32 %v5256_v43, %v336_v45  ;;  %v6372_v43 = vmul.f32 0.35355338, %v6232_v15 }
  0xe9   :  { %5613 = vmatpush3.msra.mxu1 %v6287_v46 }
  0xea   :  { %5617 = vmatprep.subr.mxu1 %v6059_v10 }
 0x151   :  { %v514_v49 = vpop.permute.xlu1 %513 }
 0x155   :  { %v512_v51 = vpop.permute.xlu1 %511 }
 0x1a2   :  { %v423_v33 = vpop.f32.mrf.mxu1 }
 0x1a3   :  { %v424_v34 = vadd.f32 %v423_v33, %v6277_v32 }
 0x1a4   :  { %v5611_v35 = vpop.f32.mrf.mxu1 }
 0x1a5   :  { %v427_v36 = vsel %vm350_vm2, %v424_v34, -inf }
 0x1a6   :  { %428 = vmax.xlane.f32.xlu0 %v427_v36 }
 0x22f   :  { %v429_v37 = vpop.xlane.xlu0 %428 }
 0x230   :  { %v430_v38 = vsub.f32 %v424_v34, %v429_v37 }
 0x232   :  { %v431_v39 = vmul.f32 1.442695, %v430_v38 }
 0x234   :  { %5967 = vpow2.f32 %v431_v39 }
 0x241   :  { %v5968_v40 = vpop.eup %5967 }
 0x242   :  { %v433_v41 = vsel %vm350_vm2, %v5968_v40, 0.0 }
 0x243   :  { %434 = vadd.xlane.f32.xlu0 %v433_v41 }
 0x2cc   :  { %v435_v47 = vpop.xlane.xlu0 %434 }
 0x2cd   :  { %5969 = vrcp.f32 %v435_v47 }
 0x2da   :  { %v5970_v48 = vpop.eup %5969 }
 0x2db   :  { %v437_v50 = vmul.f32 %v5970_v48, %v5968_v40 }
 0x2dd   :  { %5615 = vmatmul.mubr.msk.f32.vlgmr.msra.gmra.mxu1 %vm350_vm2, %v437_v50 }
 0x2de   :  { %5618 = vmatpush3.xpose.msk.msra.mxu1 %vm350_vm2, %v514_v49  ;;  %5619 = vmatprep.mubr.msk.f32.mxu1 %vm6060_vm1, %v6059_v10 }
 0x2df   :  { %5622 = vmatprep.subr.mxu1 %v6059_v10 }
 0x2e1   :  { %5620 = vmatmul.mubr.msk.f32.vlgmr.msra.gmra.mxu1 %vm350_vm2, %v512_v51 }
 0x2e2   :  { %5624 = vmatprep.mubr.msk.f32.mxu1 %vm6060_vm1, %v6059_v10 }
 0x39d   :  { %v507_v52 = vpop.f32.mrf.mxu1 }
 0x39f   :  { %v5616_v53 = vpop.f32.mrf.mxu1 }
 0x3a1   :  { %v585_v54 = vpop.f32.mrf.mxu1 }
 0x3a2   :  { %v586_v55 = vadd.f32 %v585_v54, %v6277_v32  ;;  %v6381_v54 = vld [vmem:[%s6956_s8 + $0x18] sm:$0xff] }
 0x3a3   :  { %v5621_v56 = vpop.f32.mrf.mxu1 }
 0x3a4   :  { %v589_v57 = vsel %vm350_vm2, %v586_v55, -inf }
 0x3a5   :  { %590 = vmax.xlane.f32.xlu0 %v589_v57 }
 0x3bb   :  { %601 = vrot.lane.b32.xlu0 %v6287_v46, %s6061_s27 }
 0x3bf   :  { %825 = vrot.lane.b32.xlu0 %v6236_v20, %s6980_s2 }
 0x3c3   :  { %823 = vrot.lane.b32.xlu0 %v6238_v21, %s6980_s2 }
 0x42e   :  { %v591_v58 = vpop.xlane.xlu0 %590 }
 0x42f   :  { %v592_v59 = vsub.f32 %v586_v55, %v591_v58 }
 0x431   :  { %v593_v60 = vmul.f32 1.442695, %v592_v59 }
 0x432   :  { %v602_v61 = vpop.permute.xlu0 %601 }
 0x433   :  { %5971 = vpow2.f32 %v593_v60  ;;  %5623 = vmatpush3.msra.mxu1 %v602_v61  ;;  %v1304_v60 = vsub.s32 1, %v6271_v29 }
 0x434   :  { %5632 = vmatprep.subr.mxu1 %v6059_v10 }
 0x436   :  { %v826_v6 = vpop.permute.xlu0 %825 }
 0x43a   :  { %v824_v12 = vpop.permute.xlu0 %823 }
 0x440   :  { %v5972_v62 = vpop.eup %5971 }
 0x441   :  { %v595_v63 = vsel %vm350_vm2, %v5972_v62, 0.0 }
 0x442   :  { %596 = vadd.xlane.f32.xlu1 %v595_v63 }
 0x453   :  { %912 = vrot.lane.b32.xlu1 %v6287_v46, %s6980_s2 }
 0x457   :  { %1064 = vrot.lane.b32.xlu1 %v6236_v20, %s6978_s23 }
 0x4cb   :  { %v597_v1 = vpop.xlane.xlu1 %596 }
 0x4cc   :  { %5973 = vrcp.f32 %v597_v1 }
 0x4cf   :  { %v913_v5 = vpop.permute.xlu1 %912 }
 0x4d3   :  { %v1065_v31 = vpop.permute.xlu1 %1064 }
 0x4d9   :  { %v5974_v2 = vpop.eup %5973 }
 0x4da   :  { %v599_v3 = vmul.f32 %v5974_v2, %v5972_v62  ;;  %v6405_v62 = vrot.slane %v6273_v30, %v1304_v60 }
 0x4dc   :  { %5625 = vmatmul.mubr.msk.f32.vlgmr.msra.gmra.mxu1 %vm350_vm2, %v599_v3 }
 0x4dd   :  { %5633 = vmatpush3.msra.mxu1 %v6323_v4  ;;  %5634 = vmatprep.mubr.msk.f32.mxu1 %vm6060_vm1, %v6059_v10 }
 0x4de   :  { %5642 = vmatprep.subr.mxu1 %v6059_v10 }
 0x4e0   :  { %5635 = vmatmul.mubr.msk.f32.vlgmr.msra.gmra.mxu1 %vm350_vm2, %v507_v52 }
 0x4e1   :  { %5643 = vmatpush3.msra.mxu1 %v913_v5  ;;  %5644 = vmatprep.mubr.msk.f32.mxu1 %vm6060_vm1, %v6059_v10 }
 0x4e2   :  { %5652 = vmatprep.subr.mxu1 %v6059_v10 }
 0x59c   :  { %v673_v7 = vpop.f32.mrf.mxu1 }
 0x59d   :  { %5630 = vmatmul.mubr.msk.f32.vlgmr.msra.gmra.mxu0 %vm350_vm2, %v673_v7 }
 0x59e   :  { %5638 = vmatpush3.xpose.msk.msra.mxu0 %vm350_vm2, %v826_v6  ;;  %v5626_v11 = vpop.f32.mrf.mxu1  ;;  %5639 = vmatprep.mubr.msk.f32.mxu0 %vm6060_vm1, %v6059_v10 }
 0x59f   :  { %5647 = vmatprep.subr.mxu0 %v6059_v10 }
 0x5a0   :  { %v819_v13 = vpop.f32.mrf.mxu1 }
 0x5a1   :  { %5640 = vmatmul.mubr.msk.f32.vlgmr.msra.gmra.mxu0 %vm350_vm2, %v824_v12 }
 0x5a2   :  { %v5636_v14 = vpop.f32.mrf.mxu1  ;;  %5649 = vmatprep.mubr.msk.f32.mxu0 %vm6060_vm1, %v6059_v10 }
 0x65d   :  { %v746_v17 = vpop.f32.mrf.mxu0 }
 0x65e   :  { %v820_v51 = vadd.f32 %v819_v13, %v746_v17 }
 0x65f   :  { %v5631_v18 = vpop.f32.mrf.mxu0 }
 0x661   :  { %v897_v19 = vpop.f32.mrf.mxu0 }
 0x662   :  { %v898_v20 = vadd.f32 %v897_v19, %v6277_v32 }
 0x663   :  { %v5641_v22 = vpop.f32.mrf.mxu0 }
 0x664   :  { %v901_v23 = vsel %vm350_vm2, %v898_v20, -inf }
 0x665   :  { %902 = vmax.xlane.f32.xlu0 %v901_v23 }
 0x6ee   :  { %v903_v24 = vpop.xlane.xlu0 %902 }
 0x6ef   :  { %v904_v25 = vsub.f32 %v898_v20, %v903_v24 }
 0x6f1   :  { %v905_v26 = vmul.f32 1.442695, %v904_v25 }
 0x6f3   :  { %5975 = vpow2.f32 %v905_v26 }
 0x700   :  { %v5976_v27 = vpop.eup %5975 }
 0x701   :  { %v907_v28 = vsel %vm350_vm2, %v5976_v27, 0.0 }
 0x702   :  { %908 = vadd.xlane.f32.xlu1 %v907_v28 }
 0x713   :  { %1062 = vrot.lane.b32.xlu1 %v6238_v21, %s6978_s23  ;;  %v6358_v21 = vld [vmem:[%s6956_s8 + $0x10] sm:$0xff] }
 0x714   :  { %5648 = vmatpush3.msra.mxu0 %v6358_v21 }
 0x715   :  { %5657 = vmatprep.subr.mxu0 %v6059_v10 }
 0x78b   :  { %v909_v33 = vpop.xlane.xlu1 %908 }
 0x78c   :  { %5977 = vrcp.f32 %v909_v33 }
 0x78f   :  { %v1063_v36 = vpop.permute.xlu1 %1062 }
 0x799   :  { %v5978_v34 = vpop.eup %5977 }
 0x79a   :  { %v911_v35 = vmul.f32 %v5978_v34, %v5976_v27 }
 0x79c   :  { %5645 = vmatmul.mubr.msk.f32.vlgmr.msra.gmra.mxu1 %vm350_vm2, %v911_v35 }
 0x79d   :  { %5653 = vmatpush3.xpose.msk.msra.mxu1 %vm350_vm2, %v1065_v31  ;;  %5654 = vmatprep.mubr.msk.f32.mxu1 %vm6060_vm1, %v6059_v10 }
 0x79e   :  { %5662 = vmatprep.subr.mxu1 %v6059_v10 }
 0x7a0   :  { %5655 = vmatmul.mubr.msk.f32.vlgmr.msra.gmra.mxu1 %vm350_vm2, %v1063_v36 }
 0x7a1   :  { %5664 = vmatprep.mubr.msk.f32.mxu1 %vm6060_vm1, %v6059_v10  ;;  %5663 = vmatpush3.msra.mxu1 %v6381_v54 }
 0x7a2   :  { %5672 = vmatprep.subr.mxu1 %v6059_v10 }
 0x85c   :  { %v984_v37 = vpop.f32.mrf.mxu1 }
 0x85d   :  { %5650 = vmatmul.mubr.msk.f32.vlgmr.msra.gmra.mxu0 %vm350_vm2, %v984_v37 }
 0x85e   :  { %v5646_v38 = vpop.f32.mrf.mxu1  ;;  %5659 = vmatprep.mubr.msk.f32.mxu0 %vm6060_vm1, %v6059_v10 }
 0x860   :  { %v1136_v39 = vpop.f32.mrf.mxu1 }
 0x861   :  { %v1137_v40 = vadd.f32 %v1136_v39, %v6277_v32 }
 0x862   :  { %v5656_v41 = vpop.f32.mrf.mxu1 }
 0x863   :  { %v1140_v42 = vsel %vm350_vm2, %v1137_v40, -inf }
 0x864   :  { %1141 = vmax.xlane.f32.xlu0 %v1140_v42 }
 0x87a   :  { %1151 = vrot.lane.b32.xlu0 %v6287_v46, %s6978_s23 }
 0x87e   :  { %1468 = vrot.lane.b32.xlu0 %v6234_v16, %s6061_s27 }
 0x882   :  { %1466 = vrot.lane.b32.xlu0 %v6372_v43, %s6061_s27 }
 0x8ed   :  { %v1142_v45 = vpop.xlane.xlu0 %1141 }
 0x8ee   :  { %v1143_v47 = vsub.f32 %v1137_v40, %v1142_v45 }
 0x8f0   :  { %v1144_v48 = vmul.f32 1.442695, %v1143_v47 }
 0x8f1   :  { %v1152_v49 = vpop.permute.xlu0 %1151 }
 0x8f2   :  { %5979 = vpow2.f32 %v1144_v48  ;;  %5658 = vmatpush3.msra.mxu0 %v1152_v49 }
 0x8f3   :  { %5667 = vmatprep.subr.mxu0 %v6059_v10 }
 0x8f5   :  { %v1469_v58 = vpop.permute.xlu0 %1468 }
 0x8f9   :  { %v1467_v59 = vpop.permute.xlu0 %1466 }
 0x8ff   :  { %v5980_v50 = vpop.eup %5979 }
 0x900   :  { %v1146_v46 = vsel %vm350_vm2, %v5980_v50, 0.0 }
 0x901   :  { %1147 = vadd.xlane.f32.xlu1 %v1146_v46 }
 0x91d   :  { %v1057_v52 = vpop.f32.mrf.mxu0 }
 0x91e   :  { %v1061_v53 = vadd.f32 %v1057_v52, %v820_v51 }
 0x91f   :  { %v5651_v15 = vpop.f32.mrf.mxu0 }
 0x98a   :  { %v1148_v55 = vpop.xlane.xlu1 %1147 }
 0x98b   :  { %5981 = vrcp.f32 %v1148_v55 }
 0x998   :  { %v5982_v56 = vpop.eup %5981 }
 0x999   :  { %v1150_v57 = vmul.f32 %v5982_v56, %v5980_v50 }
 0x99b   :  { %5660 = vmatmul.mubr.msk.f32.vlgmr.msra.gmra.mxu0 %vm350_vm2, %v1150_v57 }
 0x99c   :  { %5668 = vmatpush3.xpose.msk.msra.mxu0 %vm350_vm2, %v6234_v16  ;;  %5669 = vmatprep.mubr.msk.f32.mxu0 %vm6060_vm1, %v6059_v10 }
 0x99d   :  { %5677 = vmatprep.subr.mxu0 %v6059_v10 }
 0x99f   :  { %5670 = vmatmul.mubr.msk.f32.vlgmr.msra.gmra.mxu0 %vm350_vm2, %v6372_v43 }
 0x9a0   :  { %5678 = vmatpush3.xpose.msk.msra.mxu0 %vm350_vm2, %v1469_v58  ;;  %5679 = vmatprep.mubr.msk.f32.mxu0 %vm6060_vm1, %v6059_v10 }
 0x9a1   :  { %5687 = vmatprep.subr.mxu0 %v6059_v10 }
 0x9a3   :  { %5680 = vmatmul.mubr.msk.f32.vlgmr.msra.gmra.mxu0 %vm350_vm2, %v1467_v59 }
 0x9a4   :  { %5688 = vmatpush3.msra.mxu0 %v6316_v0  ;;  %5689 = vmatprep.mubr.msk.f32.mxu0 %vm6060_vm1, %v6059_v10 }
 0x9a5   :  { %5697 = vmatprep.subr.mxu0 %v6059_v10 }
 0xa5b   :  { %v1223_v61 = vpop.f32.mrf.mxu0 }
 0xa5c   :  { %5665 = vmatmul.mubr.msk.f32.vlgmr.msra.gmra.mxu1 %vm350_vm2, %v1223_v61 }
 0xa5d   :  { %5673 = vmatpush3.msra.mxu1 %v6285_v44  ;;  %v5661_v63 = vpop.f32.mrf.mxu0  ;;  %5674 = vmatprep.mubr.msk.f32.mxu1 %vm6060_vm1, %v6059_v10 }
 0xa5e   :  { %5682 = vmatprep.subr.mxu1 %v6059_v10 }
 0xa5f   :  { %v1378_v0 = vpop.f32.mrf.mxu0 }
 0xa60   :  { %v1379_v1 = vadd.f32 %v1378_v0, %v6405_v62 }
 0xa61   :  { %v5671_v2 = vpop.f32.mrf.mxu0 }
 0xa62   :  { %v1382_v29 = vsel %vm350_vm2, %v1379_v1, -inf }
 0xa63   :  { %1383 = vmax.xlane.f32.xlu0 %v1382_v29  ;;  %v1540_v3 = vpop.f32.mrf.mxu0 }
 0xa64   :  { %v1541_v5 = vadd.f32 %v1540_v3, %v6405_v62 }
 0xa65   :  { %v5681_v30 = vpop.f32.mrf.mxu0 }
 0xa66   :  { %v1544_v6 = vsel %vm350_vm2, %v1541_v5, -inf  ;;  %v5291_v30 = vld [vmem:[%s6957_s9] ss:$0 sm:$0xff] }
 0xa67   :  { %1545 = vmax.xlane.f32.xlu1 %v1544_v6 }
 0xa79   :  { %1780 = vrot.lane.b32.xlu0 %v6234_v16, %s6980_s2 }
 0xaec   :  { %v1384_v7 = vpop.xlane.xlu0 %1383 }
 0xaed   :  { %v1385_v11 = vsub.f32 %v1379_v1, %v1384_v7 }
 0xaef   :  { %v1386_v12 = vmul.f32 1.442695, %v1385_v11 }
 0xaf0   :  { %v1546_v13 = vpop.xlane.xlu1 %1545  ;;  %v1781_v39 = vpop.permute.xlu0 %1780 }
 0xaf1   :  { %5983 = vpow2.f32 %v1386_v12  ;;  %v1547_v14 = vsub.f32 %v1541_v5, %v1546_v13 }
 0xaf3   :  { %v1548_v17 = vmul.f32 1.442695, %v1547_v14 }
 0xaf5   :  { %5985 = vpow2.f32 %v1548_v17 }
 0xafe   :  { %v5984_v18 = vpop.eup %5983 }
 0xaff   :  { %v1388_v19 = vsel %vm350_vm2, %v5984_v18, 0.0 }
 0xb00   :  { %1389 = vadd.xlane.f32.xlu1 %v1388_v19 }
 0xb02   :  { %v5986_v20 = vpop.eup %5985 }
 0xb03   :  { %v1550_v22 = vsel %vm350_vm2, %v5986_v20, 0.0 }
 0xb04   :  { %1551 = vadd.xlane.f32.xlu1 %v1550_v22 }
 0xb15   :  { %1556 = vrot.lane.b32.xlu1 %v6285_v44, %s6061_s27 }
 0xb19   :  { %1778 = vrot.lane.b32.xlu1 %v6372_v43, %s6980_s2 }
 0xb1c   :  { %v1296_v23 = vpop.f32.mrf.mxu1 }
 0xb1d   :  { %v6423_v24 = vadd.f32 %v1296_v23, %v1061_v53 }
 0xb1e   :  { %v5666_v25 = vpop.f32.mrf.mxu1 }
 0xb1f   :  { %v2263_v6 = vadd.f32 %v5291_v30, %v6423_v24 }
 0xb21   :  { %v2265_v12 = vadd.f32 %v2263_v6, %v6206_v8 }
 0xb89   :  { %v1390_v26 = vpop.xlane.xlu1 %1389 }
 0xb8a   :  { %5987 = vrcp.f32 %v1390_v26 }
 0xb8d   :  { %v1552_v27 = vpop.xlane.xlu1 %1551 }
 0xb8e   :  { %5989 = vrcp.f32 %v1552_v27 }
 0xb91   :  { %v1557_v33 = vpop.permute.xlu1 %1556 }
 0xb97   :  { %v5988_v28 = vpop.eup %5987 }
 0xb98   :  { %v1392_v31 = vmul.f32 %v5988_v28, %v5984_v18 }
 0xb9a   :  { %5675 = vmatmul.mubr.msk.f32.vlgmr.msra.gmra.mxu1 %vm350_vm2, %v1392_v31 }
 0xb9b   :  { %v5990_v34 = vpop.eup %5989  ;;  %5683 = vmatpush3.msra.mxu1 %v1557_v33  ;;  %5684 = vmatprep.mubr.msk.f32.mxu1 %vm6060_vm1, %v6059_v10 }
 0xb9c   :  { %v1554_v35 = vmul.f32 %v5990_v34, %v5986_v20  ;;  %5692 = vmatprep.subr.mxu1 %v6059_v10 }
 0xb9e   :  { %5685 = vmatmul.mubr.msk.f32.vlgmr.msra.gmra.mxu1 %vm350_vm2, %v1554_v35 }
 0xb9f   :  { %5693 = vmatpush3.msra.mxu1 %v6323_v4  ;;  %5694 = vmatprep.mubr.msk.f32.mxu1 %vm6060_vm1, %v6059_v10  ;;  %v1779_v4 = vpop.permute.xlu1 %1778 }
 0xba0   :  { %5702 = vmatprep.subr.mxu1 %v6059_v10 }
 0xc5a   :  { %v1462_v36 = vpop.f32.mrf.mxu1 }
 0xc5b   :  { %5695 = vmatmul.mubr.msk.f32.vlgmr.msra.gmra.mxu1 %vm350_vm2, %v1462_v36 }
 0xc5c   :  { %v5676_v37 = vpop.f32.mrf.mxu1  ;;  %5704 = vmatprep.mubr.msk.f32.mxu1 %vm6060_vm1, %v6059_v10 }
 0xc5e   :  { %v1628_v38 = vpop.f32.mrf.mxu1 }
 0xc5f   :  { %5690 = vmatmul.mubr.msk.f32.vlgmr.msra.gmra.mxu0 %vm350_vm2, %v1628_v38 }
 0xc60   :  { %5698 = vmatpush3.xpose.msk.msra.mxu0 %vm350_vm2, %v1781_v39  ;;  %v5686_v40 = vpop.f32.mrf.mxu1  ;;  %5699 = vmatprep.mubr.msk.f32.mxu0 %vm6060_vm1, %v6059_v10 }
 0xc61   :  { %5707 = vmatprep.subr.mxu0 %v6059_v10 }
 0xc63   :  { %5700 = vmatmul.mubr.msk.f32.vlgmr.msra.gmra.mxu0 %vm350_vm2, %v1779_v4 }
 0xc64   :  { %5708 = vmatpush3.msra.mxu0 %v6358_v21  ;;  %5709 = vmatprep.mubr.msk.f32.mxu0 %vm6060_vm1, %v6059_v10 }
 0xc65   :  { %5717 = vmatprep.subr.mxu0 %v6059_v10 }
 0xd1b   :  { %v1774_v41 = vpop.f32.mrf.mxu1 }
 0xd1d   :  { %v5696_v42 = vpop.f32.mrf.mxu1 }
 0xd1f   :  { %v1701_v45 = vpop.f32.mrf.mxu0 }
 0xd20   :  { %v1775_v47 = vadd.f32 %v1774_v41, %v1701_v45 }
 0xd21   :  { %v5691_v48 = vpop.f32.mrf.mxu0 }
 0xd23   :  { %v1852_v49 = vpop.f32.mrf.mxu0 }
 0xd24   :  { %v1853_v50 = vadd.f32 %v1852_v49, %v6405_v62  ;;  %v5293_v49 = vld [vmem:[%s6959_s11] ss:$0 sm:$0xff] }
 0xd25   :  { %v5701_v46 = vpop.f32.mrf.mxu0 }
 0xd26   :  { %v1856_v51 = vsel %vm350_vm2, %v1853_v50, -inf }
 0xd27   :  { %1857 = vmax.xlane.f32.xlu1 %v1856_v51  ;;  %v2315_v51 = vld [vmem:[%s6960_s12 + $0x18] sm:$0xff] }
 0xd38   :  { %1867 = vrot.lane.b32.xlu1 %v6285_v44, %s6980_s2 }
 0xd3c   :  { %2017 = vrot.lane.b32.xlu1 %v6372_v43, %s6978_s23 }
 0xdb0   :  { %v1858_v21 = vpop.xlane.xlu1 %1857 }
 0xdb1   :  { %v1859_v52 = vsub.f32 %v1853_v50, %v1858_v21  ;;  %v2314_v21 = vld [vmem:[%s6960_s12 + $0x10] sm:$0xff] }
 0xdb3   :  { %v1860_v53 = vmul.f32 1.442695, %v1859_v52  ;;  %v2313_v52 = vld [vmem:[%s6960_s12 + $0x8] sm:$0xff] }
 0xdb4   :  { %v1868_v15 = vpop.permute.xlu1 %1867 }
 0xdb5   :  { %5991 = vpow2.f32 %v1860_v53  ;;  %5703 = vmatpush3.msra.mxu1 %v1868_v15  ;;  %v2312_v53 = vld [vmem:[%s6960_s12] sm:$0xff] }
 0xdb6   :  { %5712 = vmatprep.subr.mxu1 %v6059_v10 }
 0xdb8   :  { %v2018_v60 = vpop.permute.xlu1 %2017 }
 0xdc2   :  { %v5992_v55 = vpop.eup %5991 }
 0xdc3   :  { %v1862_v56 = vsel %vm350_vm2, %v5992_v55, 0.0 }
 0xdc4   :  { %1863 = vadd.xlane.f32.xlu0 %v1862_v56 }
 0xdda   :  { %2019 = vrot.lane.b32.xlu0 %v6234_v16, %s6978_s23 }
 0xe4d   :  { %v1864_v57 = vpop.xlane.xlu0 %1863 }
 0xe4e   :  { %5993 = vrcp.f32 %v1864_v57 }
 0xe51   :  { %v2020_v43 = vpop.permute.xlu0 %2019 }
 0xe5b   :  { %v5994_v58 = vpop.eup %5993 }
 0xe5c   :  { %v1866_v59 = vmul.f32 %v5994_v58, %v5992_v55 }
 0xe5e   :  { %5705 = vmatmul.mubr.msk.f32.vlgmr.msra.gmra.mxu1 %vm350_vm2, %v1866_v59 }
 0xe5f   :  { %5713 = vmatpush3.xpose.msk.msra.mxu1 %vm350_vm2, %v2020_v43  ;;  %5714 = vmatprep.mubr.msk.f32.mxu1 %vm6060_vm1, %v6059_v10 }
 0xe60   :  { %5722 = vmatprep.subr.mxu1 %v6059_v10 }
 0xe62   :  { %5715 = vmatmul.mubr.msk.f32.vlgmr.msra.gmra.mxu1 %vm350_vm2, %v2018_v60  ;;  %v2429_v60 = vld [vmem:[%s6961_s14 + $0x38] sm:$0xff] }
 0xe63   :  { %5723 = vmatpush3.msra.mxu1 %v6381_v54  ;;  %5724 = vmatprep.mubr.msk.f32.mxu1 %vm6060_vm1, %v6059_v10 }
 0xe64   :  { %5738 = vmatprep.subr.mxu1 %v2429_v60 }
 0xf1e   :  { %v1939_v16 = vpop.f32.mrf.mxu1 }
 0xf1f   :  { %5710 = vmatmul.mubr.msk.f32.vlgmr.msra.gmra.mxu0 %vm350_vm2, %v1939_v16  ;;  %v2428_v16 = vld [vmem:[%s6961_s14 + $0x30] sm:$0xff] }
 0xf20   :  { %v5706_v61 = vpop.f32.mrf.mxu1  ;;  %5719 = vmatprep.mubr.msk.f32.mxu0 %vm6060_vm1, %v6059_v10 }
 0xf21   :  { %v2427_v61 = vld [vmem:[%s6961_s14 + $0x28] sm:$0xff] }
 0xf22   :  { %v2091_v63 = vpop.f32.mrf.mxu1 }
 0xf23   :  { %v2092_v0 = vadd.f32 %v2091_v63, %v6405_v62  ;;  %v2426_v63 = vld [vmem:[%s6961_s14 + $0x20] sm:$0xff] }
 0xf24   :  { %v5716_v1 = vpop.f32.mrf.mxu1 }
 0xf25   :  { %v2095_v2 = vsel %vm350_vm2, %v2092_v0, -inf  ;;  %v2424_v1 = vld [vmem:[%s6961_s14 + $0x10] sm:$0xff] }
 0xf26   :  { %2096 = vmax.xlane.f32.xlu1 %v2095_v2  ;;  %v2423_v2 = vld [vmem:[%s6961_s14 + $0x8] sm:$0xff] }
 0xf37   :  { %2106 = vrot.lane.b32.xlu1 %v6285_v44, %s6978_s23  ;;  %v2269_v44 = vsel %vm99_vm0, %v2265_v12, 0.0 }
 0xfaf   :  { %v2097_v54 = vpop.xlane.xlu1 %2096 }
 0xfb0   :  { %v2098_v29 = vsub.f32 %v2092_v0, %v2097_v54  ;;  %v2425_v0 = vld [vmem:[%s6961_s14 + $0x18] sm:$0xff]  ;;  %v2422_v54 = vld [vmem:[%s6961_s14] sm:$0xff] }
 0xfb2   :  { %v2099_v3 = vmul.f32 1.442695, %v2098_v29  ;;  %v5294_v29 = vld [vmem:[%s6962_s13] ss:$0 sm:$0xff] }
 0xfb3   :  { %v2107_v5 = vpop.permute.xlu1 %2106 }
 0xfb4   :  { %5995 = vpow2.f32 %v2099_v3  ;;  %5718 = vmatpush3.msra.mxu0 %v2107_v5 }
 0xfb5   :  { %5727 = vmatprep.subr.mxu0 %v2315_v51 }
 0xfc1   :  { %v5996_v7 = vpop.eup %5995 }
 0xfc2   :  { %v2101_v11 = vsel %vm350_vm2, %v5996_v7, 0.0 }
 0xfc3   :  { %2102 = vadd.xlane.f32.xlu0 %v2101_v11 }
 0xfc7   :  { %2270 = vadd.xlane.f32.xlu0 %v2269_v44 }
 0xfdf   :  { %v2012_v13 = vpop.f32.mrf.mxu0 }
 0xfe0   :  { %v2016_v14 = vadd.f32 %v2012_v13, %v1775_v47 }
 0xfe1   :  { %v5711_v17 = vpop.f32.mrf.mxu0 }
0x104c   :  { %v2103_v18 = vpop.xlane.xlu0 %2102 }
0x104d   :  { %5997 = vrcp.f32 %v2103_v18 }
0x1050   :  { %v2271_v24 = vpop.xlane.xlu0 %2270 }
0x1051   :  { %v2276_v25 = vmul.f32 0.03125, %v2271_v24 }
0x1053   :  { %v2278_v28 = vsub.f32 %v2265_v12, %v2276_v25 }
0x1055   :  { %v2280_v35 = vmul.f32 %v2278_v28, %v2278_v28 }
0x1057   :  { %v2282_v36 = vsel %vm99_vm0, %v2280_v35, 0.0 }
0x105a   :  { %v5998_v19 = vpop.eup %5997 }
0x105b   :  { %v2105_v20 = vmul.f32 %v5998_v19, %v5996_v7 }
0x105d   :  { %5720 = vmatmul.mubr.msk.f32.vlgmr.msra.gmra.mxu0 %vm350_vm2, %v2105_v20 }
0x105e   :  { %5728 = vmatpush3.msra.mxu0 %v2315_v51  ;;  %v5305_v51 = vld [vmem:[%s6990_s29 + $0x38] sm:$0xff] }
0x105f   :  { %5729 = vmatprep.subr.mxu0 %v2314_v21 }
0x1060   :  { %5730 = vmatpush3.msra.mxu0 %v2314_v21  ;;  %v5313_v21 = vld [vmem:[%s6995_s30 + $0x38] sm:$0xff] }
0x1061   :  { %5731 = vmatprep.subr.mxu0 %v2313_v52 }
0x1062   :  { %5732 = vmatpush3.msra.mxu0 %v2313_v52  ;;  %v5304_v52 = vld [vmem:[%s6990_s29 + $0x30] sm:$0xff] }
0x1063   :  { %5733 = vmatprep.subr.mxu0 %v2312_v53 }
0x1064   :  { %5734 = vmatpush3.msra.mxu0 %v2312_v53  ;;  %v5312_v53 = vld [vmem:[%s6995_s30 + $0x30] sm:$0xff] }
0x1065   :  { %5757 = vmatprep.subr.mxu0 %v5305_v51 }
0x111d   :  { %v2178_v22 = vpop.f32.mrf.mxu0 }
0x111e   :  { %5725 = vmatmul.mubr.msk.f32.vlgmr.msra.gmra.mxu1 %vm350_vm2, %v2178_v22 }
0x111f   :  { %v5721_v23 = vpop.f32.mrf.mxu0  ;;  %5739 = vmatpush3.msra.mxu1 %v2429_v60 }
0x1120   :  { %5740 = vmatprep.subr.mxu1 %v2428_v16 }
0x1121   :  { %5741 = vmatpush3.msra.mxu1 %v2428_v16 }
0x1122   :  { %5742 = vmatprep.subr.mxu1 %v2427_v61 }
0x1123   :  { %5743 = vmatpush3.msra.mxu1 %v2427_v61 }
0x1124   :  { %5744 = vmatprep.subr.mxu1 %v2426_v63 }
0x1125   :  { %5745 = vmatpush3.msra.mxu1 %v2426_v63 }
0x1126   :  { %5746 = vmatprep.subr.mxu1 %v2425_v0 }
0x1127   :  { %5747 = vmatpush3.msra.mxu1 %v2425_v0 }
0x1128   :  { %5748 = vmatprep.subr.mxu1 %v2424_v1 }
0x1129   :  { %5749 = vmatpush3.msra.mxu1 %v2424_v1  ;;  %v5300_v1 = vld [vmem:[%s6964_s16] ss:$0 sm:$0xff] }
0x112a   :  { %5750 = vmatprep.subr.mxu1 %v2423_v2 }
0x112b   :  { %5751 = vmatpush3.msra.mxu1 %v2423_v2 }
0x112c   :  { %5752 = vmatprep.subr.mxu1 %v2422_v54 }
0x112d   :  { %5753 = vmatpush3.msra.mxu1 %v2422_v54  ;;  %v5301_v54 = vld [vmem:[%s6997_s24] ss:$0 sm:$0xff] }
0x112e   :  { %5779 = vmatprep.subr.mxu1 %v5313_v21 }
0x11de   :  { %v2251_v8 = vpop.f32.mrf.mxu1 }
0x11df   :  { %v2255_v26 = vadd.f32 %v2251_v8, %v2016_v14 }
0x11e0   :  { %v5726_v27 = vpop.f32.mrf.mxu1 }
0x11e1   :  { %v2264_v31 = vadd.f32 %v5291_v30, %v2255_v26 }
0x11e3   :  { %v2266_v33 = vadd.f32 %v2264_v31, %v6211_v9  ;;  %v5292_v9 = vld [vmem:[%s6958_s10] ss:$0 sm:$0xff] }
0x11e5   :  { %v2272_v34 = vsel %vm99_vm0, %v2266_v33, 0.0 }
0x11e6   :  { %2273 = vadd.xlane.f32.xlu0 %v2272_v34 }
0x11ea   :  { %2283 = vadd.xlane.f32.xlu0 %v2282_v36 }
0x126f   :  { %v2274_v37 = vpop.xlane.xlu0 %2273 }
0x1270   :  { %v2277_v38 = vmul.f32 0.03125, %v2274_v37 }
0x1272   :  { %v2279_v39 = vsub.f32 %v2266_v33, %v2277_v38  ;;  %v5297_v33 = vld [vmem:[%s6963_s15] ss:$0 sm:$0xff] }
0x1273   :  { %v2284_v40 = vpop.xlane.xlu0 %2283 }
0x1274   :  { %v2288_v4 = vmul.f32 0.03125, %v2284_v40  ;;  %v2281_v41 = vmul.f32 %v2279_v39, %v2279_v39 }
0x1276   :  { %v2290_v42 = vadd.f32 1e-12, %v2288_v4  ;;  %v2285_v45 = vsel %vm99_vm0, %v2281_v41, 0.0 }
0x1277   :  { %2286 = vadd.xlane.f32.xlu1 %v2285_v45 }
0x1278   :  { %5999 = vrsqrt.f32 %v2290_v42 }
0x1285   :  { %v6000_v47 = vpop.eup %5999 }
0x1286   :  { %v2294_v48 = vmul.f32 %v6000_v47, %v2278_v28 }
0x1288   :  { %v2302_v50 = vmul.f32 %v5292_v9, %v2294_v48 }
0x128a   :  { %v6492_v46 = vadd.f32 %v5293_v49, %v2302_v50 }
0x128c   :  { %5735 = vmatprep.mubr.msk.f32.mxu0 %vm99_vm0, %v6492_v46 }
0x1300   :  { %v2287_v15 = vpop.xlane.xlu1 %2286 }
0x1301   :  { %v2289_v55 = vmul.f32 0.03125, %v2287_v15  ;;  %v5303_v15 = vld [vmem:[%s6990_s29 + $0x28] sm:$0xff] }
0x1303   :  { %v2291_v56 = vadd.f32 1e-12, %v2289_v55  ;;  %v5311_v55 = vld [vmem:[%s6995_s30 + $0x28] sm:$0xff] }
0x1305   :  { %6001 = vrsqrt.f32 %v2291_v56  ;;  %v5302_v56 = vld [vmem:[%s6990_s29 + $0x20] sm:$0xff] }
0x1312   :  { %v6002_v57 = vpop.eup %6001 }
0x1313   :  { %v2295_v58 = vmul.f32 %v6002_v57, %v2279_v39  ;;  %v5310_v57 = vld [vmem:[%s6995_s30 + $0x20] sm:$0xff] }
0x1315   :  { %v2303_v59 = vmul.f32 %v5292_v9, %v2295_v58  ;;  %v5309_v58 = vld [vmem:[%s6991_s17 + $0x38] sm:$0xff] }
0x1317   :  { %v6508_v43 = vadd.f32 %v5293_v49, %v2303_v59 }
0x1319   :  { %5736 = vmatmul.mubr.msk.f32.vlgmr.msra.gmra.mxu0 %vm99_vm0, %v6508_v43 }
0x131a   :  { %5758 = vmatpush3.msra.mxu0 %v5305_v51 }
0x131b   :  { %5759 = vmatprep.subr.mxu0 %v5304_v52 }
0x131c   :  { %5760 = vmatpush3.msra.mxu0 %v5304_v52 }
0x131d   :  { %5761 = vmatprep.subr.mxu0 %v5303_v15 }
0x131e   :  { %5762 = vmatpush3.msra.mxu0 %v5303_v15 }
0x131f   :  { %5763 = vmatprep.subr.mxu0 %v5302_v56 }
0x1320   :  { %5764 = vmatpush3.msra.mxu0 %v5302_v56  ;;  %v6671_v56 = vld [vmem:[%s6956_s8 + $0x28] sm:$0xff] }
0x1321   :  { %5768 = vmatprep.subr.mxu0 %v5309_v58 }
0x13d9   :  { %v5737_v3 = vpop.f32.mrf.mxu0 }
0x13da   :  { %v2401_v5 = vadd.f32 %v5737_v3, %v5294_v29 }
0x13db   :  { %v2395_v30 = vpop.f32.mrf.mxu0 }
0x13dc   :  { %v2405_v6 = vmul.f32 %v2401_v5, %v2401_v5  ;;  %v2396_v7 = vadd.f32 %v5294_v29, %v2395_v30 }
0x13de   :  { %v2407_v11 = vmul.f32 %v2405_v6, %v2401_v5  ;;  %v2404_v12 = vmul.f32 %v2396_v7, %v2396_v7 }
0x13e0   :  { %v2409_v44 = vmul.f32 0.044715, %v2407_v11  ;;  %v2406_v13 = vmul.f32 %v2404_v12, %v2396_v7  ;;  %v5308_v11 = vld [vmem:[%s6991_s17 + $0x30] sm:$0xff]  ;;  %v5307_v12 = vld [vmem:[%s6991_s17 + $0x28] sm:$0xff] }
0x13e2   :  { %v2411_v14 = vadd.f32 %v2409_v44, %v2401_v5  ;;  %v2408_v17 = vmul.f32 0.044715, %v2406_v13  ;;  %v5306_v44 = vld [vmem:[%s6991_s17 + $0x20] sm:$0xff] }
0x13e3   :  { %v5319_v13 = vld [vmem:[%s6993_s1 + $0x1] ss:$0 sm:$0xff] }
0x13e4   :  { %v2413_v18 = vmul.f32 0.7978846, %v2411_v14  ;;  %v2410_v19 = vadd.f32 %v2408_v17, %v2396_v7  ;;  %v5327_v14 = vld [vmem:[%s6955_s7 + $0x1] ss:$0 sm:$0xff]  ;;  %s6998_s7 = smov 112  }
0x13e6   :  { %6003 = vtanh.f32 %v2413_v18  ;;  %v2412_v20 = vmul.f32 0.7978846, %v2410_v19 }
0x13e8   :  { %6005 = vtanh.f32 %v2412_v20 }
0x13f3   :  { %v6004_v22 = vpop.eup %6003 }
0x13f4   :  { %v2417_v23 = vadd.f32 1.0, %v6004_v22 }
0x13f5   :  { %v6006_v24 = vpop.eup %6005 }
0x13f6   :  { %v2416_v25 = vadd.f32 1.0, %v6006_v24  ;;  %v2419_v8 = vmul.f32 0.5, %v2417_v23 }
0x13f8   :  { %v2418_v26 = vmul.f32 0.5, %v2416_v25  ;;  %v2421_v28 = vmul.f32 %v2419_v8, %v2401_v5 }
0x13fa   :  { %v2420_v27 = vmul.f32 %v2418_v26, %v2396_v7  ;;  %v5323_v26 = vld [vmem:[%s6994_s0 + $0x1] ss:$0 sm:$0xff] }
0x13fc   :  { %5754 = vmatprep.mubr.msk.f32.mxu1 %vm2437_vm3, %v2420_v27 }
0x13fd   :  { %5755 = vmatmul.mubr.msk.f32.vlgmr.msra.gmra.mxu1 %vm2437_vm3, %v2421_v28 }
0x13fe   :  { %5780 = vmatpush3.msra.mxu1 %v5313_v21 }
0x13ff   :  { %5781 = vmatprep.subr.mxu1 %v5312_v53 }
0x1400   :  { %5782 = vmatpush3.msra.mxu1 %v5312_v53 }
0x1401   :  { %5783 = vmatprep.subr.mxu1 %v5311_v55 }
0x1402   :  { %5784 = vmatpush3.msra.mxu1 %v5311_v55 }
0x1403   :  { %5785 = vmatprep.subr.mxu1 %v5310_v57 }
0x1404   :  { %5786 = vmatpush3.msra.mxu1 %v5310_v57 }
0x1405   :  { %5795 = vmatprep.subr.mxu1 %v6059_v10 }
0x14bd   :  { %v5756_v31 = vpop.f32.mrf.mxu1 }
0x14be   :  { %v2516_v35 = vadd.f32 %v5756_v31, %v5297_v33 }
0x14bf   :  { %v2510_v34 = vpop.f32.mrf.mxu1 }
0x14c0   :  { %v2511_v36 = vadd.f32 %v5297_v33, %v2510_v34  ;;  %v2520_v39 = vadd.f32 %v2516_v35, %v6508_v43 }
0x14c2   :  { %v2519_v37 = vadd.f32 %v2511_v36, %v6492_v46  ;;  %v2526_v40 = vsel %vm99_vm0, %v2520_v39, 0.0 }
0x14c4   :  { %v2523_v38 = vsel %vm99_vm0, %v2519_v37, 0.0 }
0x14c5   :  { %2524 = vadd.xlane.f32.xlu0 %v2523_v38 }
0x14c9   :  { %2527 = vadd.xlane.f32.xlu0 %v2526_v40 }
0x154e   :  { %v2525_v4 = vpop.xlane.xlu0 %2524 }
0x154f   :  { %v2529_v41 = vmul.f32 0.03125, %v2525_v4 }
0x1551   :  { %v2531_v42 = vsub.f32 %v2519_v37, %v2529_v41 }
0x1552   :  { %v2528_v45 = vpop.xlane.xlu0 %2527 }
0x1553   :  { %v2530_v47 = vmul.f32 0.03125, %v2528_v45  ;;  %v2533_v9 = vmul.f32 %v2531_v42, %v2531_v42 }
0x1555   :  { %v2532_v48 = vsub.f32 %v2520_v39, %v2530_v47  ;;  %v2535_v49 = vsel %vm99_vm0, %v2533_v9, 0.0 }
0x1556   :  { %2536 = vadd.xlane.f32.xlu0 %v2535_v49 }
0x1557   :  { %v2534_v50 = vmul.f32 %v2532_v48, %v2532_v48 }
0x1559   :  { %v2538_v46 = vsel %vm99_vm0, %v2534_v50, 0.0 }
0x155a   :  { %2539 = vadd.xlane.f32.xlu0 %v2538_v46 }
0x15df   :  { %v2537_v59 = vpop.xlane.xlu0 %2536 }
0x15e0   :  { %v2541_v43 = vmul.f32 0.03125, %v2537_v59 }
0x15e2   :  { %v2543_v60 = vadd.f32 1e-12, %v2541_v43 }
0x15e3   :  { %v2540_v16 = vpop.xlane.xlu0 %2539 }
0x15e4   :  { %6007 = vrsqrt.f32 %v2543_v60  ;;  %v2542_v61 = vmul.f32 0.03125, %v2540_v16  ;;  %v6679_v60 = vld [vmem:[%s6956_s8 + $0x20] sm:$0xff] }
0x15e6   :  { %v2544_v63 = vadd.f32 1e-12, %v2542_v61 }
0x15e8   :  { %6009 = vrsqrt.f32 %v2544_v63 }
0x15f1   :  { %v6008_v0 = vpop.eup %6007 }
0x15f2   :  { %v2547_v2 = vmul.f32 %v6008_v0, %v2531_v42 }
0x15f4   :  { %v2555_v29 = vmul.f32 %v5300_v1, %v2547_v2 }
0x15f5   :  { %v6010_v3 = vpop.eup %6009 }
0x15f6   :  { %v2548_v5 = vmul.f32 %v6010_v3, %v2532_v48  ;;  %v6584_v30 = vadd.f32 %v5301_v54, %v2555_v29 }
0x15f8   :  { %v2556_v6 = vmul.f32 %v5300_v1, %v2548_v5  ;;  %5765 = vmatprep.mubr.msk.f32.mxu0 %vm99_vm0, %v6584_v30  ;;  %5787 = vmatprep.mubr.msk.f32.mxu1 %vm99_vm0, %v6584_v30 }
0x15fa   :  { %v6590_v7 = vadd.f32 %v5301_v54, %v2556_v6 }
0x15fc   :  { %5766 = vmatmul.mubr.msk.f32.vlgmr.msra.gmra.mxu0 %vm99_vm0, %v6590_v7  ;;  %5788 = vmatmul.mubr.msk.f32.vlgmr.msra.gmra.mxu1 %vm99_vm0, %v6590_v7 }
0x15fd   :  { %5769 = vmatpush3.msra.mxu0 %v5309_v58  ;;  %5776 = vmatprep.mubr.msk.f32.mxu0 %vm99_vm0, %v6584_v30 }
0x15fe   :  { %5770 = vmatprep.subr.mxu0 %v5308_v11  ;;  %5797 = vmatprep.mubr.msk.f32.mxu1 %vm6060_vm1, %v6059_v10 }
0x15ff   :  { %5771 = vmatpush3.msra.mxu0 %v5308_v11 }
0x1600   :  { %5772 = vmatprep.subr.mxu0 %v5307_v12 }
0x1601   :  { %5773 = vmatpush3.msra.mxu0 %v5307_v12 }
0x1602   :  { %5774 = vmatprep.subr.mxu0 %v5306_v44 }
0x1603   :  { %5775 = vmatpush3.msra.mxu0 %v5306_v44 }
0x1604   :  { %5777 = vmatmul.mubr.msk.f32.vlgmr.msra.gmra.mxu0 %vm99_vm0, %v6590_v7  ;;  %5790 = vmatprep.subr.mxu0 %v6059_v10 }
0x1605   :  { %5792 = vmatprep.mubr.msk.f32.mxu0 %vm6060_vm1, %v6059_v10 }
0x16bc   :  { %v5767_v17 = vpop.f32.mrf.mxu0  ;;  %v5789_v18 = vpop.f32.mrf.mxu1 }
0x16bd   :  { %v6620_v19 = vadd.f32 %v5767_v17, %v5319_v13  ;;  %v6622_v20 = vadd.f32 %v5789_v18, %v5327_v14 }
0x16be   :  { %v2665_v22 = vpop.f32.mrf.mxu0  ;;  %v2831_v23 = vpop.f32.mrf.mxu1 }
0x16bf   :  { %v2666_v24 = vadd.f32 %v5319_v13, %v2665_v22  ;;  %v6624_v25 = vadd.f32 %v5327_v14, %v2831_v23 }
0x16c1   :  { %v6626_v8 = vmul.f32 0.35355338, %v2666_v24  ;;  %5796 = vmatpush3.msra.mxu1 %v6624_v25 }
0x16c2   :  { %5805 = vmatprep.subr.mxu1 %v6059_v10 }
0x16c3   :  { %3001 = vrot.lane.b32.xlu1 %v6626_v8, %s6061_s27 }
0x16c4   :  { %v5778_v27 = vpop.f32.mrf.mxu0 }
0x16c5   :  { %v6635_v28 = vadd.f32 %v5778_v27, %v5323_v26 }
0x16c6   :  { %v2748_v31 = vpop.f32.mrf.mxu0 }
0x16c7   :  { %v6637_v33 = vadd.f32 %v5323_v26, %v2748_v31 }
0x16c9   :  { %3003 = vrot.lane.b32.xlu0 %v6637_v33, %s6061_s27  ;;  %5791 = vmatpush3.xpose.msk.msra.mxu0 %vm350_vm2, %v6637_v33 }
0x16ca   :  { %5800 = vmatprep.subr.mxu0 %v6059_v10 }
0x16cc   :  { %5793 = vmatmul.mubr.msk.f32.vlgmr.msra.gmra.mxu0 %vm350_vm2, %v6626_v8 }
0x16cd   :  { %5802 = vmatprep.mubr.msk.f32.mxu0 %vm6060_vm1, %v6059_v10 }
0x1735   :  { %v3002_v35 = vpop.permute.xlu1 %3001 }
0x173b   :  { %v3004_v34 = vpop.permute.xlu0 %3003 }
0x173c   :  { %5801 = vmatpush3.xpose.msk.msra.mxu0 %vm350_vm2, %v3004_v34 }
0x173d   :  { %5810 = vmatprep.subr.mxu0 %v6059_v10 }
0x173f   :  { %5803 = vmatmul.mubr.msk.f32.vlgmr.msra.gmra.mxu0 %vm350_vm2, %v3002_v35 }
0x1740   :  { %5812 = vmatprep.mubr.msk.f32.mxu0 %vm6060_vm1, %v6059_v10  ;;  %5811 = vmatpush3.msra.mxu0 %v6671_v56 }
0x1741   :  { %5820 = vmatprep.subr.mxu0 %v6059_v10 }
0x178c   :  { %v2913_v36 = vpop.f32.mrf.mxu0 }
0x178d   :  { %v2914_v37 = vadd.f32 %v2913_v36, %v6277_v32 }
0x178e   :  { %v5794_v38 = vpop.f32.mrf.mxu0 }
0x178f   :  { %v2917_v39 = vsel %vm350_vm2, %v2914_v37, -inf }
0x1790   :  { %2918 = vmax.xlane.f32.xlu0 %v2917_v39 }
0x17ff   :  { %v3075_v40 = vpop.f32.mrf.mxu0 }
0x1800   :  { %v3076_v4 = vadd.f32 %v3075_v40, %v6277_v32  ;;  %v6730_v40 = vmul.f32 0.35355338, %v6620_v19 }
0x1801   :  { %v5804_v41 = vpop.f32.mrf.mxu0 }
0x1802   :  { %v3079_v42 = vsel %vm350_vm2, %v3076_v4, -inf }
0x1803   :  { %3080 = vmax.xlane.f32.xlu1 %v3079_v42 }
0x1814   :  { %3315 = vrot.lane.b32.xlu1 %v6637_v33, %s6998_s7 }
0x1819   :  { %v2919_v45 = vpop.xlane.xlu0 %2918 }
0x181a   :  { %v2920_v47 = vsub.f32 %v2914_v37, %v2919_v45 }
0x181c   :  { %v2921_v9 = vmul.f32 1.442695, %v2920_v47 }
0x181e   :  { %6011 = vpow2.f32 %v2921_v9 }
0x182b   :  { %v6012_v48 = vpop.eup %6011 }
0x182c   :  { %v2923_v49 = vsel %vm350_vm2, %v6012_v48, 0.0 }
0x182d   :  { %2924 = vadd.xlane.f32.xlu0 %v2923_v49  ;;  %v6741_v49 = vld [vmem:[%s6956_s8 + $0x38] sm:$0xff] }
0x188c   :  { %v3081_v50 = vpop.xlane.xlu1 %3080 }
0x188d   :  { %v3082_v46 = vsub.f32 %v3076_v4, %v3081_v50 }
0x188f   :  { %v3083_v51 = vmul.f32 1.442695, %v3082_v46 }
0x1890   :  { %v3316_v0 = vpop.permute.xlu1 %3315 }
0x1891   :  { %6013 = vpow2.f32 %v3083_v51 }
0x189e   :  { %v6014_v21 = vpop.eup %6013 }
0x189f   :  { %v3085_v52 = vsel %vm350_vm2, %v6014_v21, 0.0 }
0x18a0   :  { %3086 = vadd.xlane.f32.xlu0 %v3085_v52 }
0x18b6   :  { %v2925_v53 = vpop.xlane.xlu0 %2924  ;;  %3091 = vrot.lane.b32.xlu0 %v6624_v25, %s6061_s27 }
0x18b7   :  { %6015 = vrcp.f32 %v2925_v53 }
0x18ba   :  { %3313 = vrot.lane.b32.xlu0 %v6626_v8, %s6998_s7 }
0x18c4   :  { %v6016_v15 = vpop.eup %6015 }
0x18c5   :  { %v2927_v55 = vmul.f32 %v6016_v15, %v6012_v48 }
0x18c7   :  { %5798 = vmatmul.mubr.msk.f32.vlgmr.msra.gmra.mxu1 %vm350_vm2, %v2927_v55 }
0x18c8   :  { %5807 = vmatprep.mubr.msk.f32.mxu1 %vm6060_vm1, %v6059_v10 }
0x1929   :  { %v3087_v57 = vpop.xlane.xlu0 %3086 }
0x192a   :  { %6017 = vrcp.f32 %v3087_v57 }
0x192d   :  { %v3092_v58 = vpop.permute.xlu0 %3091 }
0x192e   :  { %5806 = vmatpush3.msra.mxu1 %v3092_v58 }
0x192f   :  { %5815 = vmatprep.subr.mxu1 %v6059_v10 }
0x1931   :  { %v3314_v2 = vpop.permute.xlu0 %3313 }
0x1937   :  { %v6018_v59 = vpop.eup %6017 }
0x1938   :  { %v3089_v43 = vmul.f32 %v6018_v59, %v6014_v21 }
0x193a   :  { %5808 = vmatmul.mubr.msk.f32.vlgmr.msra.gmra.mxu1 %vm350_vm2, %v3089_v43 }
0x193b   :  { %5816 = vmatpush3.msra.mxu1 %v6679_v60  ;;  %5817 = vmatprep.mubr.msk.f32.mxu1 %vm6060_vm1, %v6059_v10 }
0x193c   :  { %5825 = vmatprep.subr.mxu1 %v6059_v10 }
0x1987   :  { %v2997_v16 = vpop.f32.mrf.mxu1 }
0x1988   :  { %5818 = vmatmul.mubr.msk.f32.vlgmr.msra.gmra.mxu1 %vm350_vm2, %v2997_v16 }
0x1989   :  { %v5799_v61 = vpop.f32.mrf.mxu1  ;;  %5827 = vmatprep.mubr.msk.f32.mxu1 %vm6060_vm1, %v6059_v10 }
0x19fa   :  { %v3163_v63 = vpop.f32.mrf.mxu1 }
0x19fb   :  { %5813 = vmatmul.mubr.msk.f32.vlgmr.msra.gmra.mxu0 %vm350_vm2, %v3163_v63 }
0x19fc   :  { %5821 = vmatpush3.xpose.msk.msra.mxu0 %vm350_vm2, %v3316_v0  ;;  %v5809_v1 = vpop.f32.mrf.mxu1  ;;  %5822 = vmatprep.mubr.msk.f32.mxu0 %vm6060_vm1, %v6059_v10 }
0x19fd   :  { %5830 = vmatprep.subr.mxu0 %v6059_v10 }
0x19ff   :  { %5823 = vmatmul.mubr.msk.f32.vlgmr.msra.gmra.mxu0 %vm350_vm2, %v3314_v2 }
0x1a00   :  { %5832 = vmatprep.mubr.msk.f32.mxu0 %vm6060_vm1, %v6059_v10 }
0x1a48   :  { %v3309_v54 = vpop.f32.mrf.mxu1 }
0x1a4a   :  { %v5819_v29 = vpop.f32.mrf.mxu1 }
0x1abb   :  { %v3236_v3 = vpop.f32.mrf.mxu0 }
0x1abc   :  { %v3310_v19 = vadd.f32 %v3309_v54, %v3236_v3 }
0x1abd   :  { %v5814_v5 = vpop.f32.mrf.mxu0 }
0x1abf   :  { %v3387_v6 = vpop.f32.mrf.mxu0 }
0x1ac0   :  { %v3388_v11 = vadd.f32 %v3387_v6, %v6277_v32 }
0x1ac1   :  { %v5824_v12 = vpop.f32.mrf.mxu0 }
0x1ac2   :  { %v3391_v44 = vsel %vm350_vm2, %v3388_v11, -inf }
0x1ac3   :  { %3392 = vmax.xlane.f32.xlu1 %v3391_v44 }
0x1ad4   :  { %3554 = vrot.lane.b32.xlu1 %v6637_v33, %s6999_s3  ;;  %v6718_v33 = vld [vmem:[%s6956_s8 + $0x30] sm:$0xff] }
0x1ad5   :  { %5831 = vmatpush3.msra.mxu0 %v6718_v33 }
0x1ad6   :  { %5840 = vmatprep.subr.mxu0 %v6059_v10 }
0x1ad8   :  { %3552 = vrot.lane.b32.xlu1 %v6626_v8, %s6999_s3 }
0x1b4c   :  { %v3393_v13 = vpop.xlane.xlu1 %3392 }
0x1b4d   :  { %v3394_v14 = vsub.f32 %v3388_v11, %v3393_v13 }
0x1b4f   :  { %v3395_v17 = vmul.f32 1.442695, %v3394_v14 }
0x1b50   :  { %v3555_v27 = vpop.permute.xlu1 %3554 }
0x1b51   :  { %6019 = vpow2.f32 %v3395_v17 }
0x1b54   :  { %v3553_v31 = vpop.permute.xlu1 %3552 }
0x1b5e   :  { %v6020_v18 = vpop.eup %6019 }
0x1b5f   :  { %v3397_v22 = vsel %vm350_vm2, %v6020_v18, 0.0 }
0x1b60   :  { %3398 = vadd.xlane.f32.xlu0 %v3397_v22 }
0x1b76   :  { %3402 = vrot.lane.b32.xlu0 %v6624_v25, %s6998_s7 }
0x1be9   :  { %v3399_v23 = vpop.xlane.xlu0 %3398 }
0x1bea   :  { %6021 = vrcp.f32 %v3399_v23 }
0x1bed   :  { %v3403_v24 = vpop.permute.xlu0 %3402 }
0x1bee   :  { %5826 = vmatpush3.msra.mxu1 %v3403_v24 }
0x1bef   :  { %5835 = vmatprep.subr.mxu1 %v6059_v10 }
0x1bf7   :  { %v6022_v26 = vpop.eup %6021 }
0x1bf8   :  { %v3401_v8 = vmul.f32 %v6022_v26, %v6020_v18 }
0x1bfa   :  { %5828 = vmatmul.mubr.msk.f32.vlgmr.msra.gmra.mxu1 %vm350_vm2, %v3401_v8 }
0x1bfb   :  { %5836 = vmatpush3.xpose.msk.msra.mxu1 %vm350_vm2, %v3555_v27  ;;  %5837 = vmatprep.mubr.msk.f32.mxu1 %vm6060_vm1, %v6059_v10 }
0x1bfc   :  { %5845 = vmatprep.subr.mxu1 %v6059_v10 }
0x1bfe   :  { %5838 = vmatmul.mubr.msk.f32.vlgmr.msra.gmra.mxu1 %vm350_vm2, %v3553_v31 }
0x1bff   :  { %5847 = vmatprep.mubr.msk.f32.mxu1 %vm6060_vm1, %v6059_v10  ;;  %5846 = vmatpush3.msra.mxu1 %v6741_v49 }
0x1c00   :  { %5855 = vmatprep.subr.mxu1 %v6059_v10 }
0x1cba   :  { %v3474_v34 = vpop.f32.mrf.mxu1 }
0x1cbb   :  { %5833 = vmatmul.mubr.msk.f32.vlgmr.msra.gmra.mxu0 %vm350_vm2, %v3474_v34 }
0x1cbc   :  { %v5829_v35 = vpop.f32.mrf.mxu1  ;;  %5842 = vmatprep.mubr.msk.f32.mxu0 %vm6060_vm1, %v6059_v10 }
0x1cbe   :  { %v3626_v36 = vpop.f32.mrf.mxu1 }
0x1cbf   :  { %v3627_v37 = vadd.f32 %v3626_v36, %v6277_v32 }
0x1cc0   :  { %v5839_v38 = vpop.f32.mrf.mxu1 }
0x1cc1   :  { %v3630_v39 = vsel %vm350_vm2, %v3627_v37, -inf }
0x1cc2   :  { %3631 = vmax.xlane.f32.xlu0 %v3630_v39 }
0x1cd8   :  { %3641 = vrot.lane.b32.xlu0 %v6624_v25, %s6999_s3 }
0x1cdc   :  { %3952 = vrot.lane.b32.xlu0 %v6730_v40, %s6061_s27 }
0x1d4b   :  { %v3632_v4 = vpop.xlane.xlu0 %3631 }
0x1d4c   :  { %v3633_v41 = vsub.f32 %v3627_v37, %v3632_v4 }
0x1d4e   :  { %v3634_v42 = vmul.f32 1.442695, %v3633_v41 }
0x1d4f   :  { %v3642_v45 = vpop.permute.xlu0 %3641 }
0x1d50   :  { %6023 = vpow2.f32 %v3634_v42  ;;  %5841 = vmatpush3.msra.mxu0 %v3642_v45 }
0x1d51   :  { %5850 = vmatprep.subr.mxu0 %v6059_v10 }
0x1d53   :  { %v3953_v52 = vpop.permute.xlu0 %3952 }
0x1d5d   :  { %v6024_v32 = vpop.eup %6023 }
0x1d5e   :  { %v3636_v47 = vsel %vm350_vm2, %v6024_v32, 0.0 }
0x1d5f   :  { %3637 = vadd.xlane.f32.xlu1 %v3636_v47 }
0x1d70   :  { %3954 = vrot.lane.b32.xlu1 %v6635_v28, %s6061_s27 }
0x1d7b   :  { %v3547_v25 = vpop.f32.mrf.mxu0 }
0x1d7c   :  { %v3551_v9 = vadd.f32 %v3547_v25, %v3310_v19 }
0x1d7d   :  { %v5834_v48 = vpop.f32.mrf.mxu0 }
0x1de8   :  { %v3638_v50 = vpop.xlane.xlu1 %3637 }
0x1de9   :  { %6025 = vrcp.f32 %v3638_v50 }
0x1dec   :  { %v3955_v21 = vpop.permute.xlu1 %3954 }
0x1df6   :  { %v6026_v46 = vpop.eup %6025 }
0x1df7   :  { %v3640_v51 = vmul.f32 %v6026_v46, %v6024_v32 }
0x1df9   :  { %5843 = vmatmul.mubr.msk.f32.vlgmr.msra.gmra.mxu0 %vm350_vm2, %v3640_v51 }
0x1dfa   :  { %5851 = vmatpush3.xpose.msk.msra.mxu0 %vm350_vm2, %v6635_v28  ;;  %5852 = vmatprep.mubr.msk.f32.mxu0 %vm6060_vm1, %v6059_v10 }
0x1dfb   :  { %5860 = vmatprep.subr.mxu0 %v6059_v10 }
0x1dfd   :  { %5853 = vmatmul.mubr.msk.f32.vlgmr.msra.gmra.mxu0 %vm350_vm2, %v6730_v40 }
0x1dfe   :  { %5861 = vmatpush3.xpose.msk.msra.mxu0 %vm350_vm2, %v3955_v21  ;;  %5862 = vmatprep.mubr.msk.f32.mxu0 %vm6060_vm1, %v6059_v10  ;;  %v5363_v21 = vld [vmem:[%s6957_s9 + $0x1] ss:$0 sm:$0xff] }
0x1dff   :  { %5870 = vmatprep.subr.mxu0 %v6059_v10 }
0x1e01   :  { %5863 = vmatmul.mubr.msk.f32.vlgmr.msra.gmra.mxu0 %vm350_vm2, %v3953_v52 }
0x1e02   :  { %5871 = vmatpush3.msra.mxu0 %v6671_v56  ;;  %5872 = vmatprep.mubr.msk.f32.mxu0 %vm6060_vm1, %v6059_v10 }
0x1e03   :  { %5880 = vmatprep.subr.mxu0 %v6059_v10 }
0x1eb9   :  { %v3713_v53 = vpop.f32.mrf.mxu0 }
0x1eba   :  { %5848 = vmatmul.mubr.msk.f32.vlgmr.msra.gmra.mxu1 %vm350_vm2, %v3713_v53 }
0x1ebb   :  { %5856 = vmatpush3.msra.mxu1 %v6622_v20  ;;  %v5844_v15 = vpop.f32.mrf.mxu0  ;;  %5857 = vmatprep.mubr.msk.f32.mxu1 %vm6060_vm1, %v6059_v10 }
0x1ebc   :  { %5865 = vmatprep.subr.mxu1 %v6059_v10 }
0x1ebd   :  { %v3864_v55 = vpop.f32.mrf.mxu0 }
0x1ebe   :  { %v3865_v57 = vadd.f32 %v3864_v55, %v6405_v62 }
0x1ebf   :  { %v5854_v56 = vpop.f32.mrf.mxu0 }
0x1ec0   :  { %v3868_v58 = vsel %vm350_vm2, %v3865_v57, -inf }
0x1ec1   :  { %3869 = vmax.xlane.f32.xlu1 %v3868_v58  ;;  %v4026_v59 = vpop.f32.mrf.mxu0 }
0x1ec2   :  { %v4027_v43 = vadd.f32 %v4026_v59, %v6405_v62 }
0x1ec3   :  { %v5864_v16 = vpop.f32.mrf.mxu0 }
0x1ec4   :  { %v4030_v61 = vsel %vm350_vm2, %v4027_v43, -inf }
0x1ec5   :  { %4031 = vmax.xlane.f32.xlu0 %v4030_v61 }
0x1ed2   :  { %4042 = vrot.lane.b32.xlu1 %v6622_v20, %s6061_s27 }
0x1ed6   :  { %4264 = vrot.lane.b32.xlu1 %v6730_v40, %s6998_s7 }
0x1f4a   :  { %v3870_v63 = vpop.xlane.xlu1 %3869 }
0x1f4b   :  { %v3871_v0 = vsub.f32 %v3865_v57, %v3870_v63 }
0x1f4d   :  { %v3872_v1 = vmul.f32 1.442695, %v3871_v0 }
0x1f4e   :  { %v4032_v2 = vpop.xlane.xlu0 %4031  ;;  %v4043_v23 = vpop.permute.xlu1 %4042 }
0x1f4f   :  { %6027 = vpow2.f32 %v3872_v1  ;;  %v4033_v54 = vsub.f32 %v4027_v43, %v4032_v2 }
0x1f51   :  { %v4034_v29 = vmul.f32 1.442695, %v4033_v54 }
0x1f53   :  { %6029 = vpow2.f32 %v4034_v29 }
0x1f5c   :  { %v6028_v3 = vpop.eup %6027 }
0x1f5d   :  { %v3874_v5 = vsel %vm350_vm2, %v6028_v3, 0.0 }
0x1f5e   :  { %3875 = vadd.xlane.f32.xlu0 %v3874_v5 }
0x1f60   :  { %v6030_v6 = vpop.eup %6029 }
0x1f61   :  { %v4036_v11 = vsel %vm350_vm2, %v6030_v6, 0.0 }
0x1f62   :  { %4037 = vadd.xlane.f32.xlu0 %v4036_v11 }
0x1f78   :  { %4266 = vrot.lane.b32.xlu0 %v6635_v28, %s6998_s7 }
0x1f7a   :  { %v3786_v12 = vpop.f32.mrf.mxu1 }
0x1f7b   :  { %v6779_v44 = vadd.f32 %v3786_v12, %v3551_v9 }
0x1f7c   :  { %v5849_v13 = vpop.f32.mrf.mxu1 }
0x1f7d   :  { %v4750_v15 = vadd.f32 %v5363_v21, %v6779_v44 }
0x1f7f   :  { %v4752_v58 = vadd.f32 %v4750_v15, %v6584_v30  ;;  %v5376_v15 = vld [vmem:[%s6961_s14 + $0x40] sm:$0xff] }
0x1f81   :  { %v4758_v59 = vsel %vm99_vm0, %v4752_v58, 0.0 }
0x1fe7   :  { %v3876_v14 = vpop.xlane.xlu0 %3875 }
0x1fe8   :  { %6031 = vrcp.f32 %v3876_v14 }
0x1feb   :  { %v4038_v17 = vpop.xlane.xlu0 %4037 }
0x1fec   :  { %6033 = vrcp.f32 %v4038_v17 }
0x1fef   :  { %v4267_v34 = vpop.permute.xlu0 %4266 }
0x1ff5   :  { %v6032_v18 = vpop.eup %6031 }
0x1ff6   :  { %v3878_v22 = vmul.f32 %v6032_v18, %v6028_v3 }
0x1ff8   :  { %5858 = vmatmul.mubr.msk.f32.vlgmr.msra.gmra.mxu1 %vm350_vm2, %v3878_v22 }
0x1ff9   :  { %v6034_v24 = vpop.eup %6033  ;;  %5866 = vmatpush3.msra.mxu1 %v4043_v23  ;;  %5867 = vmatprep.mubr.msk.f32.mxu1 %vm6060_vm1, %v6059_v10 }
0x1ffa   :  { %v4040_v26 = vmul.f32 %v6034_v24, %v6030_v6  ;;  %5875 = vmatprep.subr.mxu1 %v6059_v10 }
0x1ffc   :  { %5868 = vmatmul.mubr.msk.f32.vlgmr.msra.gmra.mxu1 %vm350_vm2, %v4040_v26 }
0x1ffd   :  { %5876 = vmatpush3.msra.mxu1 %v6679_v60  ;;  %5877 = vmatprep.mubr.msk.f32.mxu1 %vm6060_vm1, %v6059_v10  ;;  %v4265_v60 = vpop.permute.xlu1 %4264 }
0x1ffe   :  { %5885 = vmatprep.subr.mxu1 %v6059_v10 }
0x20b8   :  { %v3948_v27 = vpop.f32.mrf.mxu1 }
0x20b9   :  { %5878 = vmatmul.mubr.msk.f32.vlgmr.msra.gmra.mxu1 %vm350_vm2, %v3948_v27 }
0x20ba   :  { %v5859_v8 = vpop.f32.mrf.mxu1  ;;  %5887 = vmatprep.mubr.msk.f32.mxu1 %vm6060_vm1, %v6059_v10 }
0x20bc   :  { %v4114_v31 = vpop.f32.mrf.mxu1 }
0x20bd   :  { %5873 = vmatmul.mubr.msk.f32.vlgmr.msra.gmra.mxu0 %vm350_vm2, %v4114_v31 }
0x20be   :  { %5881 = vmatpush3.xpose.msk.msra.mxu0 %vm350_vm2, %v4267_v34  ;;  %v5869_v35 = vpop.f32.mrf.mxu1  ;;  %5882 = vmatprep.mubr.msk.f32.mxu0 %vm6060_vm1, %v6059_v10 }
0x20bf   :  { %5890 = vmatprep.subr.mxu0 %v6059_v10 }
0x20c1   :  { %5883 = vmatmul.mubr.msk.f32.vlgmr.msra.gmra.mxu0 %vm350_vm2, %v4265_v60 }
0x20c2   :  { %5891 = vmatpush3.msra.mxu0 %v6718_v33  ;;  %5892 = vmatprep.mubr.msk.f32.mxu0 %vm6060_vm1, %v6059_v10 }
0x20c3   :  { %5900 = vmatprep.subr.mxu0 %v6059_v10 }
0x2179   :  { %v4260_v36 = vpop.f32.mrf.mxu1 }
0x217b   :  { %v5879_v37 = vpop.f32.mrf.mxu1 }
0x217d   :  { %v4187_v38 = vpop.f32.mrf.mxu0 }
0x217e   :  { %v4261_v39 = vadd.f32 %v4260_v36, %v4187_v38  ;;  %v5367_v38 = vld [vmem:[%s6959_s11 + $0x1] ss:$0 sm:$0xff] }
0x217f   :  { %v5874_v4 = vpop.f32.mrf.mxu0 }
0x2181   :  { %v4338_v41 = vpop.f32.mrf.mxu0 }
0x2182   :  { %v4339_v42 = vadd.f32 %v4338_v41, %v6405_v62  ;;  %v5371_v41 = vld [vmem:[%s6960_s12 + $0x38] sm:$0xff] }
0x2183   :  { %v5884_v45 = vpop.f32.mrf.mxu0 }
0x2184   :  { %v4342_v32 = vsel %vm350_vm2, %v4339_v42, -inf  ;;  %v5369_v45 = vld [vmem:[%s6960_s12 + $0x28] sm:$0xff] }
0x2185   :  { %4343 = vmax.xlane.f32.xlu1 %v4342_v32  ;;  %v5368_v32 = vld [vmem:[%s6960_s12 + $0x20] sm:$0xff] }
0x2196   :  { %4505 = vrot.lane.b32.xlu1 %v6635_v28, %s6999_s3 }
0x219a   :  { %4503 = vrot.lane.b32.xlu1 %v6730_v40, %s6999_s3 }
0x220e   :  { %v4344_v33 = vpop.xlane.xlu1 %4343 }
0x220f   :  { %v4345_v47 = vsub.f32 %v4339_v42, %v4344_v33  ;;  %v5370_v42 = vld [vmem:[%s6960_s12 + $0x30] sm:$0xff] }
0x2211   :  { %v4346_v19 = vmul.f32 1.442695, %v4345_v47 }
0x2212   :  { %v4506_v46 = vpop.permute.xlu1 %4505 }
0x2213   :  { %6035 = vpow2.f32 %v4346_v19 }
0x2216   :  { %v4504_v51 = vpop.permute.xlu1 %4503 }
0x2220   :  { %v6036_v25 = vpop.eup %6035 }
0x2221   :  { %v4348_v9 = vsel %vm350_vm2, %v6036_v25, 0.0 }
0x2222   :  { %4349 = vadd.xlane.f32.xlu0 %v4348_v9 }
0x2238   :  { %4353 = vrot.lane.b32.xlu0 %v6622_v20, %s6998_s7 }
0x22ab   :  { %v4350_v48 = vpop.xlane.xlu0 %4349 }
0x22ac   :  { %6037 = vrcp.f32 %v4350_v48 }
0x22af   :  { %v4354_v50 = vpop.permute.xlu0 %4353 }
0x22b0   :  { %5886 = vmatpush3.msra.mxu1 %v4354_v50 }
0x22b1   :  { %5895 = vmatprep.subr.mxu1 %v6059_v10 }
0x22b9   :  { %v6038_v28 = vpop.eup %6037 }
0x22ba   :  { %v4352_v40 = vmul.f32 %v6038_v28, %v6036_v25  ;;  %v5383_v28 = vld [vmem:[%s6961_s14 + $0x78] sm:$0xff] }
0x22bc   :  { %5888 = vmatmul.mubr.msk.f32.vlgmr.msra.gmra.mxu1 %vm350_vm2, %v4352_v40  ;;  %v5381_v40 = vld [vmem:[%s6961_s14 + $0x68] sm:$0xff] }
0x22bd   :  { %5896 = vmatpush3.xpose.msk.msra.mxu1 %vm350_vm2, %v4506_v46  ;;  %5897 = vmatprep.mubr.msk.f32.mxu1 %vm6060_vm1, %v6059_v10  ;;  %v5382_v46 = vld [vmem:[%s6961_s14 + $0x70] sm:$0xff] }
0x22be   :  { %5905 = vmatprep.subr.mxu1 %v6059_v10 }
0x22c0   :  { %5898 = vmatmul.mubr.msk.f32.vlgmr.msra.gmra.mxu1 %vm350_vm2, %v4504_v51  ;;  %v5380_v51 = vld [vmem:[%s6961_s14 + $0x60] sm:$0xff] }
0x22c1   :  { %5906 = vmatpush3.msra.mxu1 %v6741_v49  ;;  %5907 = vmatprep.mubr.msk.f32.mxu1 %vm6060_vm1, %v6059_v10 }
0x22c2   :  { %5921 = vmatprep.subr.mxu1 %v5383_v28 }
0x237c   :  { %v4425_v52 = vpop.f32.mrf.mxu1 }
0x237d   :  { %5893 = vmatmul.mubr.msk.f32.vlgmr.msra.gmra.mxu0 %vm350_vm2, %v4425_v52  ;;  %v5378_v52 = vld [vmem:[%s6961_s14 + $0x50] sm:$0xff] }
0x237e   :  { %v5889_v53 = vpop.f32.mrf.mxu1  ;;  %5902 = vmatprep.mubr.msk.f32.mxu0 %vm6060_vm1, %v6059_v10 }
0x237f   :  { %v5377_v53 = vld [vmem:[%s6961_s14 + $0x48] sm:$0xff] }
0x2380   :  { %v4577_v55 = vpop.f32.mrf.mxu1 }
0x2381   :  { %v4578_v57 = vadd.f32 %v4577_v55, %v6405_v62  ;;  %v5373_v55 = vld [vmem:[%s6962_s13 + $0x1] ss:$0 sm:$0xff] }
0x2382   :  { %v5899_v49 = vpop.f32.mrf.mxu1 }
0x2383   :  { %v4581_v56 = vsel %vm350_vm2, %v4578_v57, -inf }
0x2384   :  { %4582 = vmax.xlane.f32.xlu1 %v4581_v56 }
0x2388   :  { %4759 = vadd.xlane.f32.xlu1 %v4758_v59 }
0x240d   :  { %v4583_v43 = vpop.xlane.xlu1 %4582 }
0x240e   :  { %v4584_v16 = vsub.f32 %v4578_v57, %v4583_v43 }
0x2410   :  { %v4585_v61 = vmul.f32 1.442695, %v4584_v16 }
0x2411   :  { %v4760_v6 = vpop.xlane.xlu1 %4759 }
0x2412   :  { %6039 = vpow2.f32 %v4585_v61  ;;  %v4764_v11 = vmul.f32 0.03125, %v4760_v6 }
0x2414   :  { %v4766_v13 = vsub.f32 %v4752_v58, %v4764_v11 }
0x2416   :  { %v4768_v22 = vmul.f32 %v4766_v13, %v4766_v13 }
0x2418   :  { %v4770_v23 = vsel %vm99_vm0, %v4768_v22, 0.0 }
0x241f   :  { %v6040_v63 = vpop.eup %6039 }
0x2420   :  { %v4587_v10 = vsel %vm350_vm2, %v6040_v63, 0.0 }
0x2421   :  { %4588 = vadd.xlane.f32.xlu0 %v4587_v10 }
0x2437   :  { %4592 = vrot.lane.b32.xlu0 %v6622_v20, %s6999_s3 }
0x243d   :  { %v4498_v62 = vpop.f32.mrf.mxu0 }
0x243e   :  { %v4502_v0 = vadd.f32 %v4498_v62, %v4261_v39 }
0x243f   :  { %v5894_v1 = vpop.f32.mrf.mxu0 }
0x24aa   :  { %v4589_v2 = vpop.xlane.xlu0 %4588 }
0x24ab   :  { %6041 = vrcp.f32 %v4589_v2 }
0x24ae   :  { %v4593_v30 = vpop.permute.xlu0 %4592 }
0x24af   :  { %5901 = vmatpush3.msra.mxu0 %v4593_v30 }
0x24b0   :  { %5910 = vmatprep.subr.mxu0 %v5371_v41 }
0x24b8   :  { %v6042_v54 = vpop.eup %6041 }
0x24b9   :  { %v4591_v29 = vmul.f32 %v6042_v54, %v6040_v63 }
0x24bb   :  { %5903 = vmatmul.mubr.msk.f32.vlgmr.msra.gmra.mxu0 %vm350_vm2, %v4591_v29 }
0x24bc   :  { %5911 = vmatpush3.msra.mxu0 %v5371_v41  ;;  %v5058_v41 = vld [vmem:[%s6966_s18] sm:$0xff] }
0x24bd   :  { %5912 = vmatprep.subr.mxu0 %v5370_v42 }
0x24be   :  { %5913 = vmatpush3.msra.mxu0 %v5370_v42 }
0x24bf   :  { %5914 = vmatprep.subr.mxu0 %v5369_v45 }
0x24c0   :  { %5915 = vmatpush3.msra.mxu0 %v5369_v45 }
0x24c1   :  { %5916 = vmatprep.subr.mxu0 %v5368_v32 }
0x24c2   :  { %5917 = vmatpush3.msra.mxu0 %v5368_v32 }
0x257b   :  { %v4664_v3 = vpop.f32.mrf.mxu0 }
0x257c   :  { %5908 = vmatmul.mubr.msk.f32.vlgmr.msra.gmra.mxu1 %vm350_vm2, %v4664_v3 }
0x257d   :  { %v5904_v5 = vpop.f32.mrf.mxu0  ;;  %5922 = vmatpush3.msra.mxu1 %v5383_v28 }
0x257e   :  { %5923 = vmatprep.subr.mxu1 %v5382_v46 }
0x257f   :  { %5924 = vmatpush3.msra.mxu1 %v5382_v46 }
0x2580   :  { %5925 = vmatprep.subr.mxu1 %v5381_v40 }
0x2581   :  { %5926 = vmatpush3.msra.mxu1 %v5381_v40 }
0x2582   :  { %5927 = vmatprep.subr.mxu1 %v5380_v51 }
0x2583   :  { %5928 = vmatpush3.msra.mxu1 %v5380_v51 }
0x263c   :  { %v4737_v12 = vpop.f32.mrf.mxu1 }
0x263d   :  { %v4741_v44 = vadd.f32 %v4737_v12, %v4502_v0 }
0x263e   :  { %v5909_v20 = vpop.f32.mrf.mxu1 }
0x263f   :  { %v4751_v14 = vadd.f32 %v5363_v21, %v4741_v44  ;;  %v5379_v21 = vld [vmem:[%s6961_s14 + $0x58] sm:$0xff]  ;;  %v5385_v44 = vld [vmem:[%s6963_s15 + $0x1] ss:$0 sm:$0xff] }
0x2640   :  { %5929 = vmatprep.subr.mxu1 %v5379_v21 }
0x2641   :  { %v4753_v17 = vadd.f32 %v4751_v14, %v6590_v7  ;;  %v5366_v7 = vld [vmem:[%s6958_s10 + $0x1] ss:$0 sm:$0xff]  ;;  %5930 = vmatpush3.msra.mxu1 %v5379_v21 }
0x2642   :  { %5931 = vmatprep.subr.mxu1 %v5378_v52 }
0x2643   :  { %v4761_v18 = vsel %vm99_vm0, %v4753_v17, 0.0  ;;  %5932 = vmatpush3.msra.mxu1 %v5378_v52 }
0x2644   :  { %4762 = vadd.xlane.f32.xlu1 %v4761_v18  ;;  %5933 = vmatprep.subr.mxu1 %v5377_v53 }
0x2645   :  { %5934 = vmatpush3.msra.mxu1 %v5377_v53  ;;  %v5155_v53 = vld [vmem:[%s6967_s20 + $0x18] sm:$0xff] }
0x2646   :  { %5935 = vmatprep.subr.mxu1 %v5376_v15 }
0x2647   :  { %5936 = vmatpush3.msra.mxu1 %v5376_v15  ;;  %v5154_v15 = vld [vmem:[%s6967_s20 + $0x10] sm:$0xff] }
0x2648   :  { %4771 = vadd.xlane.f32.xlu1 %v4770_v23 }
0x26cd   :  { %v4763_v24 = vpop.xlane.xlu1 %4762 }
0x26ce   :  { %v4765_v26 = vmul.f32 0.03125, %v4763_v24 }
0x26d0   :  { %v4767_v27 = vsub.f32 %v4753_v17, %v4765_v26 }
0x26d1   :  { %v4772_v8 = vpop.xlane.xlu1 %4771 }
0x26d2   :  { %v4776_v31 = vmul.f32 0.03125, %v4772_v8  ;;  %v4769_v34 = vmul.f32 %v4767_v27, %v4767_v27 }
0x26d4   :  { %v4778_v35 = vadd.f32 1e-12, %v4776_v31  ;;  %v4773_v60 = vsel %vm99_vm0, %v4769_v34, 0.0 }
0x26d5   :  { %4774 = vadd.xlane.f32.xlu1 %v4773_v60 }
0x26d6   :  { %6043 = vrsqrt.f32 %v4778_v35 }
0x26e3   :  { %v6044_v36 = vpop.eup %6043 }
0x26e4   :  { %v4782_v37 = vmul.f32 %v6044_v36, %v4766_v13 }
0x26e6   :  { %v4790_v39 = vmul.f32 %v5366_v7, %v4782_v37 }
0x26e8   :  { %v6848_v4 = vadd.f32 %v5367_v38, %v4790_v39  ;;  %v5060_v39 = vld [vmem:[%s6966_s18 + $0x10] sm:$0xff] }
0x26ea   :  { %5918 = vmatprep.mubr.msk.f32.mxu0 %vm99_vm0, %v6848_v4 }
0x275e   :  { %v4775_v33 = vpop.xlane.xlu1 %4774 }
0x275f   :  { %v4777_v47 = vmul.f32 0.03125, %v4775_v33 }
0x2761   :  { %v4779_v19 = vadd.f32 1e-12, %v4777_v47 }
0x2763   :  { %6045 = vrsqrt.f32 %v4779_v19 }
0x2770   :  { %v6046_v25 = vpop.eup %6045 }
0x2771   :  { %v4783_v9 = vmul.f32 %v6046_v25, %v4767_v27 }
0x2773   :  { %v4791_v48 = vmul.f32 %v5366_v7, %v4783_v9  ;;  %v5390_v9 = vld [vmem:[%s6964_s16 + $0x1] ss:$0 sm:$0xff] }
0x2775   :  { %v4799_v50 = vadd.f32 %v5367_v38, %v4791_v48  ;;  %v5061_v38 = vld [vmem:[%s6966_s18 + $0x18] sm:$0xff] }
0x2776   :  { %5940 = vmatprep.subr.mxu0 %v5061_v38 }
0x2777   :  { %5919 = vmatmul.mubr.msk.f32.vlgmr.msra.gmra.mxu0 %vm99_vm0, %v4799_v50 }
0x2778   :  { %5941 = vmatpush3.msra.mxu0 %v5061_v38 }
0x2779   :  { %5942 = vmatprep.subr.mxu0 %v5060_v39 }
0x277a   :  { %5943 = vmatpush3.msra.mxu0 %v5060_v39 }
0x2837   :  { %v5920_v57 = vpop.f32.mrf.mxu0 }
0x2838   :  { %v4891_v49 = vadd.f32 %v5920_v57, %v5373_v55  ;;  %v5152_v57 = vld [vmem:[%s6967_s20] sm:$0xff] }
0x2839   :  { %v4885_v56 = vpop.f32.mrf.mxu0 }
0x283a   :  { %v4895_v58 = vmul.f32 %v4891_v49, %v4891_v49  ;;  %v4886_v59 = vadd.f32 %v5373_v55, %v4885_v56  ;;  %v5153_v55 = vld [vmem:[%s6967_s20 + $0x8] sm:$0xff] }
0x283c   :  { %v4897_v43 = vmul.f32 %v4895_v58, %v4891_v49  ;;  %v4894_v16 = vmul.f32 %v4886_v59, %v4886_v59 }
0x283e   :  { %v4899_v61 = vmul.f32 0.044715, %v4897_v43  ;;  %v4896_v63 = vmul.f32 %v4894_v16, %v4886_v59 }
0x2840   :  { %v4901_v10 = vadd.f32 %v4899_v61, %v4891_v49  ;;  %v4898_v62 = vmul.f32 0.044715, %v4896_v63  ;;  %v5395_v63 = vld [vmem:[%s6969_s21] ss:$0 sm:$0xff] }
0x2842   :  { %v4903_v0 = vmul.f32 0.7978846, %v4901_v10  ;;  %v4900_v1 = vadd.f32 %v4898_v62, %v4886_v59 }
0x2844   :  { %6047 = vtanh.f32 %v4903_v0  ;;  %v4902_v2 = vmul.f32 0.7978846, %v4900_v1 }
0x2846   :  { %6049 = vtanh.f32 %v4902_v2 }
0x2851   :  { %v6048_v30 = vpop.eup %6047 }
0x2852   :  { %v4907_v54 = vadd.f32 1.0, %v6048_v30 }
0x2853   :  { %v6050_v29 = vpop.eup %6049 }
0x2854   :  { %v4906_v3 = vadd.f32 1.0, %v6050_v29  ;;  %v4909_v5 = vmul.f32 0.5, %v4907_v54 }
0x2856   :  { %v4908_v6 = vmul.f32 0.5, %v4906_v3  ;;  %v4911_v12 = vmul.f32 %v4909_v5, %v4891_v49  ;;  %v5392_v49 = vld [vmem:[%s6968_s19] ss:$0 sm:$0xff] }
0x2858   :  { %v4910_v11 = vmul.f32 %v4908_v6, %v4886_v59 }
0x285a   :  { %5937 = vmatprep.mubr.msk.f32.mxu1 %vm2437_vm3, %v4910_v11 }
0x285b   :  { %5938 = vmatmul.mubr.msk.f32.vlgmr.msra.gmra.mxu1 %vm2437_vm3, %v4911_v12 }
0x291b   :  { %v5939_v20 = vpop.f32.mrf.mxu1 }
0x291c   :  { %v5007_v13 = vadd.f32 %v5939_v20, %v5385_v44 }
0x291d   :  { %v5001_v14 = vpop.f32.mrf.mxu1 }
0x291e   :  { %v5002_v17 = vadd.f32 %v5385_v44, %v5001_v14  ;;  %v5011_v18 = vadd.f32 %v5007_v13, %v4799_v50  ;;  %v5391_v50 = vld [vmem:[%s6997_s24 + $0x1] ss:$0 sm:$0xff] }
0x2920   :  { %v5019_v22 = vsel %vm99_vm0, %v5011_v18, 0.0  ;;  %v5010_v23 = vadd.f32 %v5002_v17, %v6848_v4  ;;  %v5059_v4 = vld [vmem:[%s6966_s18 + $0x8] sm:$0xff] }
0x2921   :  { %5020 = vadd.xlane.f32.xlu0 %v5019_v22  ;;  %5944 = vmatprep.subr.mxu0 %v5059_v4 }
0x2922   :  { %v5016_v24 = vsel %vm99_vm0, %v5010_v23, 0.0  ;;  %5945 = vmatpush3.msra.mxu0 %v5059_v4 }
0x2923   :  { %5017 = vadd.xlane.f32.xlu1 %v5016_v24  ;;  %5946 = vmatprep.subr.mxu0 %v5058_v41 }
0x2924   :  { %5947 = vmatpush3.msra.mxu0 %v5058_v41 }
0x2925   :  { %5951 = vmatprep.subr.mxu0 %v5155_v53 }
0x29aa   :  { %v5021_v26 = vpop.xlane.xlu0 %5020 }
0x29ab   :  { %v5023_v27 = vmul.f32 0.03125, %v5021_v26 }
0x29ac   :  { %v5018_v8 = vpop.xlane.xlu1 %5017 }
0x29ad   :  { %v5022_v31 = vmul.f32 0.03125, %v5018_v8  ;;  %v5025_v34 = vsub.f32 %v5011_v18, %v5023_v27 }
0x29af   :  { %v5024_v35 = vsub.f32 %v5010_v23, %v5022_v31  ;;  %v5027_v7 = vmul.f32 %v5025_v34, %v5025_v34 }
0x29b1   :  { %v5026_v60 = vmul.f32 %v5024_v35, %v5024_v35  ;;  %v5031_v37 = vsel %vm99_vm0, %v5027_v7, 0.0 }
0x29b3   :  { %v5028_v36 = vsel %vm99_vm0, %v5026_v60, 0.0 }
0x29b4   :  { %5029 = vadd.xlane.f32.xlu1 %v5028_v36 }
0x29b8   :  { %5032 = vadd.xlane.f32.xlu1 %v5031_v37 }
0x2a3d   :  { %v5030_v42 = vpop.xlane.xlu1 %5029 }
0x2a3e   :  { %v5034_v45 = vmul.f32 0.03125, %v5030_v42 }
0x2a40   :  { %v5036_v32 = vadd.f32 1e-12, %v5034_v45 }
0x2a41   :  { %v5033_v33 = vpop.xlane.xlu1 %5032 }
0x2a42   :  { %6051 = vrsqrt.f32 %v5036_v32  ;;  %v5035_v47 = vmul.f32 0.03125, %v5033_v33 }
0x2a44   :  { %v5037_v19 = vadd.f32 1e-12, %v5035_v47 }
0x2a46   :  { %6053 = vrsqrt.f32 %v5037_v19 }
0x2a4f   :  { %v6052_v25 = vpop.eup %6051 }
0x2a50   :  { %v5040_v48 = vmul.f32 %v6052_v25, %v5024_v35 }
0x2a52   :  { %v5048_v28 = vmul.f32 %v5390_v9, %v5040_v48 }
0x2a53   :  { %v6054_v46 = vpop.eup %6053 }
0x2a54   :  { %v5041_v40 = vmul.f32 %v6054_v46, %v5025_v34  ;;  %v5056_v51 = vadd.f32 %v5391_v50, %v5048_v28 }
0x2a56   :  { %v5049_v21 = vmul.f32 %v5390_v9, %v5041_v40  ;;  %5948 = vmatprep.mubr.msk.f32.mxu0 %vm99_vm0, %v5056_v51 }
0x2a58   :  { %v5057_v52 = vadd.f32 %v5391_v50, %v5049_v21 }
0x2a5a   :  { %5949 = vmatmul.mubr.msk.f32.vlgmr.msra.gmra.mxu0 %vm99_vm0, %v5057_v52 }
0x2a5b   :  { %5952 = vmatpush3.msra.mxu0 %v5155_v53 }
0x2a5c   :  { %5953 = vmatprep.subr.mxu0 %v5154_v15 }
0x2a5d   :  { %5954 = vmatpush3.msra.mxu0 %v5154_v15 }
0x2a5e   :  { %5955 = vmatprep.subr.mxu0 %v5153_v55 }
0x2a5f   :  { %5956 = vmatpush3.msra.mxu0 %v5153_v55 }
0x2a60   :  { %5957 = vmatprep.subr.mxu0 %v5152_v57 }
0x2a61   :  { %5958 = vmatpush3.msra.mxu0 %v5152_v57 }
0x2b1a   :  { %v5950_v56 = vpop.f32.mrf.mxu0 }
0x2b1b   :  { %v5147_v58 = vadd.f32 %v5950_v56, %v5392_v49 }
0x2b1c   :  { %v5141_v59 = vpop.f32.mrf.mxu0 }
0x2b1d   :  { %v5142_v43 = vadd.f32 %v5392_v49, %v5141_v59 }
0x2b1f   :  { %6055 = vtanh.f32 %v5142_v43 }
0x2b20   :  { %6057 = vtanh.f32 %v5147_v58 }
0x2b2c   :  { %v6056_v16 = vpop.eup %6055 }
0x2b2d   :  { %v6058_v61 = vpop.eup %6057  ;;  %5959 = vmatprep.mubr.msk.f32.mxu0 %vm99_vm0, %v6056_v16 }
0x2b2e   :  { %5960 = vmatmul.mubr.msk.f32.vlgmr.msra.gmra.mxu0 %vm99_vm0, %v6058_v61 }
0x2bee   :  { %v5961_v10 = vpop.f32.mrf.mxu0 }
0x2bef   :  { %v5241_v62 = vadd.f32 %v5961_v10, %v5395_v63 }
0x2bf0   :  { %v5235_v0 = vpop.f32.mrf.mxu0 }
0x2bf1   :  { %5245 = vst [vmem:[%s6970_s22 + $0x8] sm:$0xff] %v5241_v62  ;;  %v5236_v1 = vadd.f32 %v5395_v63, %v5235_v0 }
0x2bf3   :  { %5244 = vst [vmem:[%s6970_s22] sm:$0xff] %v5236_v1 }

</bundles_post_ra>
